<compile_context>
chip_gen: v7x
topology: tpu7x:2x2x1
jax: 0.10.0
libtpu: 0.0.40
codegen_flags: <defaults>
</compile_context>

<pallas_src>
import functools

import numpy as np
import jax
import jax.numpy as jnp
from jax.experimental import pallas as pl
from jax.experimental.pallas import tpu as pltpu

_LANE = 128          # lane-dense channel padding granularity
_BN_EPS = 1e-5


# ------------------------------- activations -------------------------------

def _mish_ref(x):
    # Reference mish: x * tanh(softplus(x)), torch softplus threshold = 20.
    sp = jnp.where(x > 20.0, x, jnp.log1p(jnp.exp(jnp.minimum(x, 20.0))))
    return x * jnp.tanh(sp)


def _mish(x, fast):
    # tanh(softplus(x)) = (u^2 - 1) / (u^2 + 1),  u = 1 + e^x
    # -> one exp + one divide (approx-EUP reciprocal in the fast path).
    u = 1.0 + jnp.exp(jnp.minimum(x, 20.0))
    u2 = u * u
    if fast:
        t = (u2 - 1.0) * pl.reciprocal(u2 + 1.0, approx=True)
    else:
        t = (u2 - 1.0) / (u2 + 1.0)
    return jnp.where(x > 20.0, x, x * t)


# ----------------------------- fused EdgeConv kernel ------------------------

def _edgeconv_kernel(*refs, k, n_rows, use_sc, has_pts, fast):
    # refs: [pts?], fts, shift, mask, w1_nbr, w1_diff, b1, w2, b2, w3, b3,
    #       [wsc, bsc], out
    i = 0
    if has_pts:
        pts_ref = refs[i]; i += 1
    fts_ref, shift_ref, mask_ref = refs[i], refs[i + 1], refs[i + 2]; i += 3
    w1n_ref, w1d_ref, b1_ref, w2_ref, b2_ref, w3_ref, b3_ref = refs[i:i + 7]
    i += 7
    if use_sc:
        wsc_ref, bsc_ref = refs[i], refs[i + 1]; i += 2
    out_ref = refs[i]

    N = fts_ref.shape[1]
    TN = n_rows
    ch = w2_ref.shape[1]
    dt = w1n_ref.dtype                       # matmul operand dtype (bf16 / f32)
    row0 = pl.multiple_of(pl.program_id(1) * TN, TN)

    fts_all = fts_ref[0]                                     # (N, cp_in)
    shift_all = shift_ref[0]                                 # (N, 1) f32
    mask_rows = mask_ref[0]                                  # (TN, 1) f32
    fts_q = fts_ref[0, pl.ds(row0, TN), :]                   # query rows
    shift_q = shift_ref[0, pl.ds(row0, TN), :]

    # ---- kNN scores: -(||q_i - key_j||^2) with coord_shift fused in-kernel ----
    if has_pts:
        keys = pts_ref[0].astype(jnp.float32) + shift_all
        q = pts_ref[0, pl.ds(row0, TN), :].astype(jnp.float32) + shift_q
    else:
        keys = fts_all.astype(jnp.float32) + shift_all
        q = fts_q.astype(jnp.float32) + shift_q
    g = jax.lax.dot_general(q.astype(dt), keys.astype(dt),
                            (((1,), (1,)), ((), ())),
                            preferred_element_type=jnp.float32)        # (TN, N)
    xx_q = jnp.sum(q * q, axis=-1, keepdims=True)                      # (TN, 1)
    ones8 = jnp.ones((8, keys.shape[-1]), jnp.float32)
    xx_k = jax.lax.dot_general(ones8, keys * keys,
                               (((1,), (1,)), ((), ())),
                               preferred_element_type=jnp.float32)[0:1, :]
    d = 2.0 * g - xx_q - xx_k                                          # (TN, N)

    # ---- conv1 reassociated around the gather (per-point transforms once) ----
    g1 = jnp.dot(fts_all.astype(dt), w1n_ref[...],
                 preferred_element_type=jnp.float32).astype(dt)        # (N, ch)
    pt = jnp.dot(fts_q.astype(dt), w1d_ref[...],
                 preferred_element_type=jnp.float32) + b1_ref[...]     # (TN, ch)

    # ---- iterative top-(k+1) + fused gather / convs / mean-over-k ----
    colf = jax.lax.broadcasted_iota(jnp.int32, (TN, N), 1).astype(jnp.float32)
    NEG = jnp.float32(-3.0e38)
    acc = jnp.zeros((TN, ch), jnp.float32)
    for t in range(k + 1):
        m = jnp.max(d, axis=-1, keepdims=True)                         # (TN, 1)
        hit = d == m
        jsel = jnp.min(jnp.where(hit, colf, jnp.float32(N)),
                       axis=-1, keepdims=True)        # lowest index among ties
        sel = colf == jsel                                             # one-hot
        d = jnp.where(sel, NEG, d)
        if t == 0:
            continue            # nearest entry is the point itself -> dropped
        selm = jnp.where(sel, jnp.float32(1.0), jnp.float32(0.0)).astype(dt)
        nb = jnp.dot(selm, g1, preferred_element_type=jnp.float32)     # gather
        h = _mish(nb + pt, fast)
        h = _mish(jnp.dot(h.astype(dt), w2_ref[...],
                          preferred_element_type=jnp.float32) + b2_ref[...],
                  fast)
        h = _mish(jnp.dot(h.astype(dt), w3_ref[...],
                          preferred_element_type=jnp.float32) + b3_ref[...],
                  fast)
        acc = acc + h
    agg = acc * (1.0 / k)

    if use_sc:
        sc = jnp.dot(fts_q.astype(dt), wsc_ref[...],
                     preferred_element_type=jnp.float32) + bsc_ref[...]
    else:
        sc = fts_q.astype(jnp.float32)                    # identity shortcut
    out_ref[0] = (_mish(sc + agg, fast) * mask_rows).astype(out_ref.dtype)


# ----------------------------- wrapper utilities ---------------------------

def _round_up(x, m):
    return ((x + m - 1) // m) * m


def _vmem_limit_bytes():
    phys = 128 * 1024 * 1024
    try:
        info = pltpu.get_tpu_info()
        phys = int(getattr(info, "vmem_capacity_bytes", phys))
    except Exception:
        pass
    # Keep the scoped budget below physical VMEM (v7x has 64 MiB per core).
    return min(64 * 1024 * 1024, (phys * 3) // 4)


def _pick_row_tile(N, requested, out_dtype):
    align = 16 if jnp.dtype(out_dtype) == jnp.dtype(jnp.bfloat16) else 8
    if requested is None:
        tn = 128 if (N > 128 and N % 128 == 0) else N
    else:
        tn = int(requested)
    if tn >= N:
        return N
    assert N % tn == 0, f"row_tile {tn} must divide N={N}"
    assert tn % align == 0, f"row_tile {tn} must be a multiple of {align}"
    return tn


def edge_conv_block(points_or_none, fts_bnc, shift_bn1, mask_bn1, blk, *,
                    matmul_dtype, row_tile, out_dtype):
    """One fused EdgeConvBlock: knn + gather + 3x(conv+BN+mish) + mean + shortcut."""
    B, N, cp_in = fts_bnc.shape
    cp_blk = blk["cp_blk"]
    k = blk["k"]
    assert N > k, "need at least k+1 points for kNN"
    assert cp_in == blk["cp_in"]

    has_pts = points_or_none is not None
    use_sc = blk["w_sc"] is not None
    fast = jnp.dtype(matmul_dtype) != jnp.dtype(jnp.float32)
    dt = matmul_dtype

    TN = _pick_row_tile(N, row_tile, out_dtype)
    grid = (B, N // TN)

    weight_args = [blk["w1_nbr"].astype(dt), blk["w1_diff"].astype(dt), blk["b1"],
                   blk["w2"].astype(dt), blk["b2"],
                   blk["w3"].astype(dt), blk["b3"]]
    if use_sc:
        weight_args += [blk["w_sc"].astype(dt), blk["b_sc"]]

    def bcast_spec(shape):
        nd = len(shape)
        return pl.BlockSpec(shape, lambda b, r, _nd=nd: (0,) * _nd)

    in_specs, call_args = [], []
    if has_pts:
        Dp = points_or_none.shape[-1]
        in_specs.append(pl.BlockSpec((1, N, Dp), lambda b, r: (b, 0, 0)))
        call_args.append(points_or_none)
    in_specs += [pl.BlockSpec((1, N, cp_in), lambda b, r: (b, 0, 0)),   # fts (keys)
                 pl.BlockSpec((1, N, 1), lambda b, r: (b, 0, 0)),       # coord shift
                 pl.BlockSpec((1, TN, 1), lambda b, r: (b, r, 0))]      # mask rows
    call_args += [fts_bnc, shift_bn1, mask_bn1]
    in_specs += [bcast_spec(w.shape) for w in weight_args]
    call_args += weight_args

    kernel = functools.partial(_edgeconv_kernel, k=k, n_rows=TN,
                               use_sc=use_sc, has_pts=has_pts, fast=fast)
    return pl.pallas_call(
        kernel,
        out_shape=jax.ShapeDtypeStruct((B, N, cp_blk), out_dtype),
        grid=grid,
        in_specs=in_specs,
        out_specs=pl.BlockSpec((1, TN, cp_blk), lambda b, r: (b, r, 0)),
        compiler_params=pltpu.CompilerParams(
            dimension_semantics=("parallel", "parallel"),
            vmem_limit_bytes=_vmem_limit_bytes()),
    )(*call_args)


# ------------------------- parameter initialization ------------------------

def _init_bn(key, c):
    k1, k2, k3, k4 = jax.random.split(key, 4)
    gamma = 1.0 + 0.1 * jax.random.normal(k1, (c,), jnp.float32)
    beta = 0.1 * jax.random.normal(k2, (c,), jnp.float32)
    mean = 0.1 * jax.random.normal(k3, (c,), jnp.float32)
    var = 1.0 + 0.1 * jax.random.uniform(k4, (c,), jnp.float32)
    return gamma, beta, mean, var


def _fold_bn(gamma, beta, mean, var):
    s = gamma / jnp.sqrt(var + _BN_EPS)
    return s, beta - mean * s


def init_params(key, input_dims, conv_params):
    """Logical (unpadded, f32) parameters; BN folded into the 1x1 convs."""
    keys = jax.random.split(key, 1 + len(conv_params))
    params = {"bn_fts": _fold_bn(*_init_bn(keys[0], input_dims))}
    blocks = []
    for i, (k, channels) in enumerate(conv_params):
        assert len(channels) == 3, "kernel is written for the default 3-layer EdgeConv"
        cin = input_dims if i == 0 else conv_params[i - 1][1][-1]
        bk = jax.random.split(keys[1 + i], 8)
        blk = {"k": k, "cin": cin, "cout": channels[-1]}
        prev = 2 * cin
        for li, c_out in enumerate(channels):
            w = 0.1 * jax.random.normal(bk[2 * li], (prev, c_out), jnp.float32)
            s, b = _fold_bn(*_init_bn(bk[2 * li + 1], c_out))
            blk[f"w{li + 1}"] = w * s[None, :]          # conv + BN folded
            blk[f"b{li + 1}"] = b[None, :]
            prev = c_out
        cout = channels[-1]
        if cin == cout:     # identity shortcut (no sc conv / bn in the torch module)
            blk["wsc"] = None
            blk["bsc"] = None
        else:
            w = 0.1 * jax.random.normal(bk[6], (cin, cout), jnp.float32)
            s, b = _fold_bn(*_init_bn(bk[7], cout))
            blk["wsc"] = w * s[None, :]
            blk["bsc"] = b[None, :]
        blocks.append(blk)
    params["edge_convs"] = blocks
    return params


def _pad2(w, rows, cols):
    assert w.shape[0] <= rows and w.shape[1] <= cols
    return jnp.zeros((rows, cols), jnp.float32).at[:w.shape[0], :w.shape[1]].set(w)


def prepare_kernel_params(params, lane=_LANE):
    """Split conv1 into centre/neighbour halves; per-block channel padding."""
    blocks = []
    in_width = None
    for blk in params["edge_convs"]:
        cin, cout, k = blk["cin"], blk["cout"], blk["k"]
        widths = [blk["w1"].shape[1], blk["w2"].shape[1], blk["w3"].shape[1]]
        cp_in = _round_up(cin, lane) if in_width is None else in_width
        cp_blk = _round_up(max(widths), lane)
        w1 = blk["w1"]
        w1_ctr, w1_nbr = w1[:cin], w1[cin:]
        pb = {"k": k, "cout": cout, "cp_in": cp_in, "cp_blk": cp_blk,
              "w1_nbr": _pad2(w1_nbr, cp_in, cp_blk),
              "w1_diff": _pad2(w1_ctr - w1_nbr, cp_in, cp_blk),
              "b1": _pad2(blk["b1"], 1, cp_blk),
              "w2": _pad2(blk["w2"], cp_blk, cp_blk),
              "b2": _pad2(blk["b2"], 1, cp_blk),
              "w3": _pad2(blk["w3"], cp_blk, cp_blk),
              "b3": _pad2(blk["b3"], 1, cp_blk)}
        if blk["wsc"] is not None:
            pb["w_sc"] = _pad2(blk["wsc"], cp_in, cp_blk)
            pb["b_sc"] = _pad2(blk["bsc"], 1, cp_blk)
        elif cp_in != cp_blk:
            # identity shortcut but padded widths differ -> explicit identity matmul
            pb["w_sc"] = _pad2(jnp.eye(cin, cout, dtype=jnp.float32), cp_in, cp_blk)
            pb["b_sc"] = jnp.zeros((1, cp_blk), jnp.float32)
        else:
            pb["w_sc"] = None
            pb["b_sc"] = None
        blocks.append(pb)
        in_width = cp_blk
    return blocks


# ------------------------------- forward pass ------------------------------

def particlenet_x_forward(params, points, features, *,
                          matmul_dtype=jnp.bfloat16, row_tile=None):
    """points: (B, Dp, N), features: (B, C, N)  (PyTorch NCL layout)."""
    B, c_in, N = features.shape
    mask = jnp.sum(jnp.abs(features), axis=1, keepdims=True) != 0          # (B,1,N)
    coord_shift = jnp.where(mask, 0.0, 9999.0).astype(jnp.float32)
    counts = jnp.maximum(jnp.sum(mask, axis=-1).astype(jnp.float32), 1.0)  # (B,1)

    s, b = params["bn_fts"]
    fts = features * s[None, :, None] + b[None, :, None]                   # bn_fts (eval)

    kblocks = prepare_kernel_params(params)
    cp0 = kblocks[0]["cp_in"]
    assert c_in <= cp0
    store_dt = (jnp.bfloat16 if jnp.dtype(matmul_dtype) == jnp.dtype(jnp.bfloat16)
                else jnp.float32)

    fts = jnp.transpose(fts, (0, 2, 1))                                    # (B, N, C)
    fts = jnp.pad(fts, ((0, 0), (0, 0), (0, cp0 - c_in))).astype(store_dt)
    pts0 = jnp.transpose(points, (0, 2, 1)).astype(jnp.float32)            # (B, N, Dp)
    shift = jnp.transpose(coord_shift, (0, 2, 1))                          # (B, N, 1)
    mask_n = jnp.transpose(mask, (0, 2, 1)).astype(jnp.float32)            # (B, N, 1)

    for i, blk in enumerate(kblocks):
        fts = edge_conv_block(pts0 if i == 0 else None, fts, shift, mask_n, blk,
                              matmul_dtype=matmul_dtype, row_tile=row_tile,
                              out_dtype=store_dt)                          # (B, N, cp)
    out = jnp.sum(fts.astype(jnp.float32), axis=1) / counts                # (B, cp)
    return out[:, :kblocks[-1]["cout"]]


# ------------------------- pure-JAX reference check ------------------------

def reference_forward(params, points, features):
    mask = jnp.sum(jnp.abs(features), axis=1, keepdims=True) != 0
    coord_shift = jnp.where(mask, 0.0, 9999.0)
    counts = jnp.maximum(jnp.sum(mask, axis=-1).astype(jnp.float32), 1.0)
    s, b = params["bn_fts"]
    fts = features * s[None, :, None] + b[None, :, None]                   # (B, C, N)
    for i, blk in enumerate(params["edge_convs"]):
        k = blk["k"]
        pts = (points if i == 0 else fts) + coord_shift
        inner = -2.0 * jnp.einsum("bdn,bdm->bnm", pts, pts)
        xx = jnp.sum(pts * pts, axis=1, keepdims=True)
        pd = -xx - inner - jnp.transpose(xx, (0, 2, 1))
        idx = jax.lax.top_k(pd, k + 1)[1][:, :, 1:]
        f_nlc = jnp.transpose(fts, (0, 2, 1))
        nbr = jax.vmap(lambda f, ii: f[ii])(f_nlc, idx)
        ctr = f_nlc[:, :, None, :]
        x = jnp.concatenate([jnp.broadcast_to(ctr, nbr.shape), nbr - ctr], axis=-1)
        h = x
        for li in range(3):
            h = _mish_ref(h @ blk[f"w{li + 1}"] + blk[f"b{li + 1}"])
        agg = jnp.mean(h, axis=2)
        sc = f_nlc if blk["wsc"] is None else f_nlc @ blk["wsc"] + blk["bsc"]
        out = _mish_ref(sc + agg) * jnp.transpose(mask, (0, 2, 1)).astype(jnp.float32)
        fts = jnp.transpose(out, (0, 2, 1))
    return jnp.sum(jnp.transpose(fts, (0, 2, 1)), axis=1) / counts


if __name__ == "__main__":
    key = jax.random.PRNGKey(0)
    kp, kf, kw = jax.random.split(key, 3)

    B, N = 2, 16
    input_dims, coord_dims = 4, 2
    conv_params = [(7, (32, 32, 32)), (7, (64, 64, 64))]

    points = jax.random.normal(kp, (B, coord_dims, N), jnp.float32)
    features = jax.random.normal(kf, (B, input_dims, N), jnp.float32)
    params = init_params(kw, input_dims, conv_params)

    # Fast path: bf16 operands / bf16 inter-block storage, single row tile.
    out_bf16 = jax.block_until_ready(
        particlenet_x_forward(params, points, features, matmul_dtype=jnp.bfloat16))
    assert out_bf16.shape == (B, conv_params[-1][1][-1])
    assert bool(jnp.all(jnp.isfinite(out_bf16)))

    # Strict numerical check against the pure-JAX reference in f32 mode,
    # exercising the multi row-tile grid path (row_tile=8 -> grid (B, 2)).
    out_f32 = jax.block_until_ready(
        particlenet_x_forward(params, points, features,
                              matmul_dtype=jnp.float32, row_tile=8))
    ref = jax.block_until_ready(reference_forward(params, points, features))
    np.testing.assert_allclose(np.asarray(out_f32), np.asarray(ref),
                               rtol=2e-2, atol=2e-2)

    # Loose sanity bound between bf16 and f32 paths (bf16 kNN near-ties may
    # legitimately flip dynamic neighbour selections, so this is not strict).
    np.testing.assert_allclose(np.asarray(out_bf16), np.asarray(out_f32),
                               rtol=0.5, atol=0.5)
    print("KERNEL_OK")
</pallas_src>

<mosaic_0001>
module attributes {stable_mosaic.version = 11 : i64} {
  func.func @_edgeconv_kernel(%arg0: i32, %arg1: i32, %arg2: memref<1x16x2xf32, #tpu.memory_space<vmem>>, %arg3: memref<1x16x128xbf16, #tpu.memory_space<vmem>>, %arg4: memref<1x16x1xf32, #tpu.memory_space<vmem>>, %arg5: memref<1x16x1xf32, #tpu.memory_space<vmem>>, %arg6: memref<128x128xbf16, #tpu.memory_space<vmem>>, %arg7: memref<128x128xbf16, #tpu.memory_space<vmem>>, %arg8: memref<1x128xf32, #tpu.memory_space<vmem>>, %arg9: memref<128x128xbf16, #tpu.memory_space<vmem>>, %arg10: memref<1x128xf32, #tpu.memory_space<vmem>>, %arg11: memref<128x128xbf16, #tpu.memory_space<vmem>>, %arg12: memref<1x128xf32, #tpu.memory_space<vmem>>, %arg13: memref<128x128xbf16, #tpu.memory_space<vmem>>, %arg14: memref<1x128xf32, #tpu.memory_space<vmem>>, %arg15: memref<1x16x128xbf16, #tpu.memory_space<vmem>>) attributes {dimension_semantics = [#tpu.dimension_semantics<parallel>, #tpu.dimension_semantics<parallel>], iteration_bounds = array<i64: 2, 1>, scalar_prefetch = 0 : i64, scratch_operands = 0 : i64, tpu.core_type = #tpu.core_type<tc>, window_params = [{transform_indices = @transform_0, window_bounds = array<i64: 1, 16, 2>}, {transform_indices = @transform_1, window_bounds = array<i64: 1, 16, 128>}, {transform_indices = @transform_2, window_bounds = array<i64: 1, 16, 1>}, {transform_indices = @transform_3, window_bounds = array<i64: 1, 16, 1>}, {pipeline_mode = #tpu.pipeline_mode<synchronous>, transform_indices = @transform_4, window_bounds = array<i64: 128, 128>}, {pipeline_mode = #tpu.pipeline_mode<synchronous>, transform_indices = @transform_5, window_bounds = array<i64: 128, 128>}, {pipeline_mode = #tpu.pipeline_mode<synchronous>, transform_indices = @transform_6, window_bounds = array<i64: 1, 128>}, {pipeline_mode = #tpu.pipeline_mode<synchronous>, transform_indices = @transform_7, window_bounds = array<i64: 128, 128>}, {pipeline_mode = #tpu.pipeline_mode<synchronous>, transform_indices = @transform_8, window_bounds = array<i64: 1, 128>}, {pipeline_mode = #tpu.pipeline_mode<synchronous>, transform_indices = @transform_9, window_bounds = array<i64: 128, 128>}, {pipeline_mode = #tpu.pipeline_mode<synchronous>, transform_indices = @transform_10, window_bounds = array<i64: 1, 128>}, {pipeline_mode = #tpu.pipeline_mode<synchronous>, transform_indices = @transform_11, window_bounds = array<i64: 128, 128>}, {pipeline_mode = #tpu.pipeline_mode<synchronous>, transform_indices = @transform_12, window_bounds = array<i64: 1, 128>}, {transform_indices = @transform_13, window_bounds = array<i64: 1, 16, 128>}]} {
    %c16_i32 = arith.constant 16 : i32
    %0 = arith.muli %arg1, %c16_i32 : i32
    %1 = tpu.assume_multiple %0, 16 : i32
    %c0 = arith.constant 0 : index
    %c0_0 = arith.constant 0 : index
    %c0_1 = arith.constant 0 : index
    %2 = vector.load %arg3[%c0, %c0_0, %c0_1] : memref<1x16x128xbf16, #tpu.memory_space<vmem>>, vector<1x16x128xbf16>
    %3 = vector.shape_cast %2 : vector<1x16x128xbf16> to vector<16x128xbf16>
    %c0_2 = arith.constant 0 : index
    %c0_3 = arith.constant 0 : index
    %c0_4 = arith.constant 0 : index
    %4 = vector.load %arg4[%c0_2, %c0_3, %c0_4] : memref<1x16x1xf32, #tpu.memory_space<vmem>>, vector<1x16x1xf32>
    %5 = vector.shape_cast %4 : vector<1x16x1xf32> to vector<16x1xf32>
    %c0_5 = arith.constant 0 : index
    %c0_6 = arith.constant 0 : index
    %c0_7 = arith.constant 0 : index
    %6 = vector.load %arg5[%c0_5, %c0_6, %c0_7] : memref<1x16x1xf32, #tpu.memory_space<vmem>>, vector<1x16x1xf32>
    %7 = vector.shape_cast %6 : vector<1x16x1xf32> to vector<16x1xf32>
    %c0_8 = arith.constant 0 : index
    %8 = arith.index_cast %1 : i32 to index
    %c0_9 = arith.constant 0 : index
    %9 = vector.load %arg3[%c0_8, %8, %c0_9] : memref<1x16x128xbf16, #tpu.memory_space<vmem>>, vector<1x16x128xbf16>
    %10 = vector.shape_cast %9 : vector<1x16x128xbf16> to vector<16x128xbf16>
    %c0_10 = arith.constant 0 : index
    %11 = arith.index_cast %1 : i32 to index
    %c0_11 = arith.constant 0 : index
    %12 = vector.load %arg4[%c0_10, %11, %c0_11] : memref<1x16x1xf32, #tpu.memory_space<vmem>>, vector<1x16x1xf32>
    %13 = vector.shape_cast %12 : vector<1x16x1xf32> to vector<16x1xf32>
    %c0_12 = arith.constant 0 : index
    %c0_13 = arith.constant 0 : index
    %c0_14 = arith.constant 0 : index
    %14 = vector.load %arg2[%c0_12, %c0_13, %c0_14] : memref<1x16x2xf32, #tpu.memory_space<vmem>>, vector<1x16x2xf32>
    %15 = vector.shape_cast %14 : vector<1x16x2xf32> to vector<16x2xf32>
    %16 = vector.broadcast %5 : vector<16x1xf32> to vector<16x2xf32>
    %17 = arith.addf %15, %16 : vector<16x2xf32>
    %c0_15 = arith.constant 0 : index
    %18 = arith.index_cast %1 : i32 to index
    %c0_16 = arith.constant 0 : index
    %19 = vector.load %arg2[%c0_15, %18, %c0_16] : memref<1x16x2xf32, #tpu.memory_space<vmem>>, vector<1x16x2xf32>
    %20 = vector.shape_cast %19 : vector<1x16x2xf32> to vector<16x2xf32>
    %21 = vector.broadcast %13 : vector<16x1xf32> to vector<16x2xf32>
    %22 = arith.addf %20, %21 : vector<16x2xf32>
    %23 = arith.truncf %22 : vector<16x2xf32> to vector<16x2xbf16>
    %24 = arith.truncf %17 : vector<16x2xf32> to vector<16x2xbf16>
    %cst = arith.constant dense<0.000000e+00> : vector<16x16xf32>
    %25 = tpu.matmul %23, %24, %cst {dimension_numbers = #tpu.dot_dimension_numbers<[1], [1], [0], [0], [0, 0, 1, 0], [], []>} : vector<16x2xbf16>, vector<16x2xbf16>, vector<16x16xf32> -> vector<16x16xf32>
    %26 = arith.mulf %22, %22 : vector<16x2xf32>
    %cst_17 = arith.constant dense<0.000000e+00> : vector<16xf32>
    %27 = vector.multi_reduction <add>, %26, %cst_17 [1] : vector<16x2xf32> to vector<16xf32>
    %28 = vector.shape_cast %27 : vector<16xf32> to vector<16x1xf32>
    %cst_18 = arith.constant 1.000000e+00 : f32
    %29 = vector.broadcast %cst_18 : f32 to vector<8x2xf32>
    %30 = arith.mulf %17, %17 : vector<16x2xf32>
    %cst_19 = arith.constant dense<0.000000e+00> : vector<8x16xf32>
    %31 = tpu.matmul %29, %30, %cst_19 {dimension_numbers = #tpu.dot_dimension_numbers<[1], [1], [0], [0], [0, 0, 1, 0], [], []>} : vector<8x2xf32>, vector<16x2xf32>, vector<8x16xf32> -> vector<8x16xf32>
    %32 = vector.extract_strided_slice %31 {offsets = [0, 0], sizes = [1, 16], strides = [1, 1]} : vector<8x16xf32> to vector<1x16xf32>
    %cst_20 = arith.constant 2.000000e+00 : f32
    %33 = vector.broadcast %cst_20 : f32 to vector<16x16xf32>
    %34 = arith.mulf %33, %25 : vector<16x16xf32>
    %35 = vector.broadcast %28 : vector<16x1xf32> to vector<16x16xf32>
    %36 = arith.subf %34, %35 : vector<16x16xf32>
    %37 = vector.broadcast %32 : vector<1x16xf32> to vector<16x16xf32>
    %38 = arith.subf %36, %37 : vector<16x16xf32>
    %c0_21 = arith.constant 0 : index
    %c0_22 = arith.constant 0 : index
    %39 = vector.load %arg6[%c0_21, %c0_22] : memref<128x128xbf16, #tpu.memory_space<vmem>>, vector<128x128xbf16>
    %cst_23 = arith.constant dense<0.000000e+00> : vector<16x128xf32>
    %40 = tpu.matmul %3, %39, %cst_23 {dimension_numbers = #tpu.dot_dimension_numbers<[1], [0], [0], [1], [0, 0, 1, 1], [], []>} : vector<16x128xbf16>, vector<128x128xbf16>, vector<16x128xf32> -> vector<16x128xf32>
    %41 = arith.truncf %40 : vector<16x128xf32> to vector<16x128xbf16>
    %c0_24 = arith.constant 0 : index
    %c0_25 = arith.constant 0 : index
    %42 = vector.load %arg7[%c0_24, %c0_25] : memref<128x128xbf16, #tpu.memory_space<vmem>>, vector<128x128xbf16>
    %cst_26 = arith.constant dense<0.000000e+00> : vector<16x128xf32>
    %43 = tpu.matmul %10, %42, %cst_26 {dimension_numbers = #tpu.dot_dimension_numbers<[1], [0], [0], [1], [0, 0, 1, 1], [], []>} : vector<16x128xbf16>, vector<128x128xbf16>, vector<16x128xf32> -> vector<16x128xf32>
    %c0_27 = arith.constant 0 : index
    %c0_28 = arith.constant 0 : index
    %44 = vector.load %arg8[%c0_27, %c0_28] : memref<1x128xf32, #tpu.memory_space<vmem>>, vector<1x128xf32>
    %45 = vector.broadcast %44 : vector<1x128xf32> to vector<16x128xf32>
    %46 = arith.addf %43, %45 : vector<16x128xf32>
    %47 = tpu.iota {dimensions = array<i32: 1>} : vector<16x16xi32>
    %48 = arith.sitofp %47 : vector<16x16xi32> to vector<16x16xf32>
    %cst_29 = arith.constant 0.000000e+00 : f32
    %49 = vector.broadcast %cst_29 : f32 to vector<16x128xf32>
    %cst_30 = arith.constant dense<0xFF800000> : vector<16xf32>
    %50 = vector.multi_reduction <maximumf>, %38, %cst_30 [1] : vector<16x16xf32> to vector<16xf32>
    %51 = vector.shape_cast %50 : vector<16xf32> to vector<16x1xf32>
    %52 = vector.broadcast %51 : vector<16x1xf32> to vector<16x16xf32>
    %53 = arith.cmpf oeq, %38, %52 : vector<16x16xf32>
    %cst_31 = arith.constant 1.600000e+01 : f32
    %54 = vector.broadcast %cst_31 : f32 to vector<16x16xf32>
    %55 = arith.select %53, %48, %54 : vector<16x16xi1>, vector<16x16xf32>
    %cst_32 = arith.constant dense<0x7F800000> : vector<16xf32>
    %56 = vector.multi_reduction <minimumf>, %55, %cst_32 [1] : vector<16x16xf32> to vector<16xf32>
    %57 = vector.shape_cast %56 : vector<16xf32> to vector<16x1xf32>
    %58 = vector.broadcast %57 : vector<16x1xf32> to vector<16x16xf32>
    %59 = arith.cmpf oeq, %48, %58 : vector<16x16xf32>
    %cst_33 = arith.constant -3.000000e+38 : f32
    %60 = vector.broadcast %cst_33 : f32 to vector<16x16xf32>
    %61 = arith.select %59, %60, %38 : vector<16x16xi1>, vector<16x16xf32>
    %cst_34 = arith.constant dense<0xFF800000> : vector<16xf32>
    %62 = vector.multi_reduction <maximumf>, %61, %cst_34 [1] : vector<16x16xf32> to vector<16xf32>
    %63 = vector.shape_cast %62 : vector<16xf32> to vector<16x1xf32>
    %64 = vector.broadcast %63 : vector<16x1xf32> to vector<16x16xf32>
    %65 = arith.cmpf oeq, %61, %64 : vector<16x16xf32>
    %cst_35 = arith.constant 1.600000e+01 : f32
    %66 = vector.broadcast %cst_35 : f32 to vector<16x16xf32>
    %67 = arith.select %65, %48, %66 : vector<16x16xi1>, vector<16x16xf32>
    %cst_36 = arith.constant dense<0x7F800000> : vector<16xf32>
    %68 = vector.multi_reduction <minimumf>, %67, %cst_36 [1] : vector<16x16xf32> to vector<16xf32>
    %69 = vector.shape_cast %68 : vector<16xf32> to vector<16x1xf32>
    %70 = vector.broadcast %69 : vector<16x1xf32> to vector<16x16xf32>
    %71 = arith.cmpf oeq, %48, %70 : vector<16x16xf32>
    %cst_37 = arith.constant -3.000000e+38 : f32
    %72 = vector.broadcast %cst_37 : f32 to vector<16x16xf32>
    %73 = arith.select %71, %72, %61 : vector<16x16xi1>, vector<16x16xf32>
    %cst_38 = arith.constant 1.000000e+00 : f32
    %cst_39 = arith.constant 0.000000e+00 : f32
    %74 = vector.broadcast %cst_38 : f32 to vector<16x16xf32>
    %75 = vector.broadcast %cst_39 : f32 to vector<16x16xf32>
    %76 = arith.select %71, %74, %75 : vector<16x16xi1>, vector<16x16xf32>
    %77 = arith.truncf %76 : vector<16x16xf32> to vector<16x16xbf16>
    %cst_40 = arith.constant dense<0.000000e+00> : vector<16x128xf32>
    %78 = tpu.matmul %77, %41, %cst_40 {dimension_numbers = #tpu.dot_dimension_numbers<[1], [0], [0], [1], [0, 0, 1, 1], [], []>} : vector<16x16xbf16>, vector<16x128xbf16>, vector<16x128xf32> -> vector<16x128xf32>
    %79 = arith.addf %78, %46 : vector<16x128xf32>
    %cst_41 = arith.constant 2.000000e+01 : f32
    %80 = vector.broadcast %cst_41 : f32 to vector<16x128xf32>
    %81 = arith.minimumf %79, %80 : vector<16x128xf32>
    %82 = math.exp %81 : vector<16x128xf32>
    %cst_42 = arith.constant 1.000000e+00 : f32
    %83 = vector.broadcast %cst_42 : f32 to vector<16x128xf32>
    %84 = arith.addf %83, %82 : vector<16x128xf32>
    %85 = arith.mulf %84, %84 : vector<16x128xf32>
    %cst_43 = arith.constant 1.000000e+00 : f32
    %86 = vector.broadcast %cst_43 : f32 to vector<16x128xf32>
    %87 = arith.subf %85, %86 : vector<16x128xf32>
    %cst_44 = arith.constant 1.000000e+00 : f32
    %88 = vector.broadcast %cst_44 : f32 to vector<16x128xf32>
    %89 = arith.addf %85, %88 : vector<16x128xf32>
    %90 = tpu.reciprocal %89 {approx = true} : vector<16x128xf32> -> vector<16x128xf32>
    %91 = arith.mulf %87, %90 : vector<16x128xf32>
    %cst_45 = arith.constant 2.000000e+01 : f32
    %92 = vector.broadcast %cst_45 : f32 to vector<16x128xf32>
    %93 = arith.cmpf ogt, %79, %92 : vector<16x128xf32>
    %94 = arith.mulf %79, %91 : vector<16x128xf32>
    %95 = arith.select %93, %79, %94 : vector<16x128xi1>, vector<16x128xf32>
    %96 = arith.truncf %95 : vector<16x128xf32> to vector<16x128xbf16>
    %c0_46 = arith.constant 0 : index
    %c0_47 = arith.constant 0 : index
    %97 = vector.load %arg9[%c0_46, %c0_47] : memref<128x128xbf16, #tpu.memory_space<vmem>>, vector<128x128xbf16>
    %cst_48 = arith.constant dense<0.000000e+00> : vector<16x128xf32>
    %98 = tpu.matmul %96, %97, %cst_48 {dimension_numbers = #tpu.dot_dimension_numbers<[1], [0], [0], [1], [0, 0, 1, 1], [], []>} : vector<16x128xbf16>, vector<128x128xbf16>, vector<16x128xf32> -> vector<16x128xf32>
    %c0_49 = arith.constant 0 : index
    %c0_50 = arith.constant 0 : index
    %99 = vector.load %arg10[%c0_49, %c0_50] : memref<1x128xf32, #tpu.memory_space<vmem>>, vector<1x128xf32>
    %100 = vector.broadcast %99 : vector<1x128xf32> to vector<16x128xf32>
    %101 = arith.addf %98, %100 : vector<16x128xf32>
    %cst_51 = arith.constant 2.000000e+01 : f32
    %102 = vector.broadcast %cst_51 : f32 to vector<16x128xf32>
    %103 = arith.minimumf %101, %102 : vector<16x128xf32>
    %104 = math.exp %103 : vector<16x128xf32>
    %cst_52 = arith.constant 1.000000e+00 : f32
    %105 = vector.broadcast %cst_52 : f32 to vector<16x128xf32>
    %106 = arith.addf %105, %104 : vector<16x128xf32>
    %107 = arith.mulf %106, %106 : vector<16x128xf32>
    %cst_53 = arith.constant 1.000000e+00 : f32
    %108 = vector.broadcast %cst_53 : f32 to vector<16x128xf32>
    %109 = arith.subf %107, %108 : vector<16x128xf32>
    %cst_54 = arith.constant 1.000000e+00 : f32
    %110 = vector.broadcast %cst_54 : f32 to vector<16x128xf32>
    %111 = arith.addf %107, %110 : vector<16x128xf32>
    %112 = tpu.reciprocal %111 {approx = true} : vector<16x128xf32> -> vector<16x128xf32>
    %113 = arith.mulf %109, %112 : vector<16x128xf32>
    %cst_55 = arith.constant 2.000000e+01 : f32
    %114 = vector.broadcast %cst_55 : f32 to vector<16x128xf32>
    %115 = arith.cmpf ogt, %101, %114 : vector<16x128xf32>
    %116 = arith.mulf %101, %113 : vector<16x128xf32>
    %117 = arith.select %115, %101, %116 : vector<16x128xi1>, vector<16x128xf32>
    %118 = arith.truncf %117 : vector<16x128xf32> to vector<16x128xbf16>
    %c0_56 = arith.constant 0 : index
    %c0_57 = arith.constant 0 : index
    %119 = vector.load %arg11[%c0_56, %c0_57] : memref<128x128xbf16, #tpu.memory_space<vmem>>, vector<128x128xbf16>
    %cst_58 = arith.constant dense<0.000000e+00> : vector<16x128xf32>
    %120 = tpu.matmul %118, %119, %cst_58 {dimension_numbers = #tpu.dot_dimension_numbers<[1], [0], [0], [1], [0, 0, 1, 1], [], []>} : vector<16x128xbf16>, vector<128x128xbf16>, vector<16x128xf32> -> vector<16x128xf32>
    %c0_59 = arith.constant 0 : index
    %c0_60 = arith.constant 0 : index
    %121 = vector.load %arg12[%c0_59, %c0_60] : memref<1x128xf32, #tpu.memory_space<vmem>>, vector<1x128xf32>
    %122 = vector.broadcast %121 : vector<1x128xf32> to vector<16x128xf32>
    %123 = arith.addf %120, %122 : vector<16x128xf32>
    %cst_61 = arith.constant 2.000000e+01 : f32
    %124 = vector.broadcast %cst_61 : f32 to vector<16x128xf32>
    %125 = arith.minimumf %123, %124 : vector<16x128xf32>
    %126 = math.exp %125 : vector<16x128xf32>
    %cst_62 = arith.constant 1.000000e+00 : f32
    %127 = vector.broadcast %cst_62 : f32 to vector<16x128xf32>
    %128 = arith.addf %127, %126 : vector<16x128xf32>
    %129 = arith.mulf %128, %128 : vector<16x128xf32>
    %cst_63 = arith.constant 1.000000e+00 : f32
    %130 = vector.broadcast %cst_63 : f32 to vector<16x128xf32>
    %131 = arith.subf %129, %130 : vector<16x128xf32>
    %cst_64 = arith.constant 1.000000e+00 : f32
    %132 = vector.broadcast %cst_64 : f32 to vector<16x128xf32>
    %133 = arith.addf %129, %132 : vector<16x128xf32>
    %134 = tpu.reciprocal %133 {approx = true} : vector<16x128xf32> -> vector<16x128xf32>
    %135 = arith.mulf %131, %134 : vector<16x128xf32>
    %cst_65 = arith.constant 2.000000e+01 : f32
    %136 = vector.broadcast %cst_65 : f32 to vector<16x128xf32>
    %137 = arith.cmpf ogt, %123, %136 : vector<16x128xf32>
    %138 = arith.mulf %123, %135 : vector<16x128xf32>
    %139 = arith.select %137, %123, %138 : vector<16x128xi1>, vector<16x128xf32>
    %140 = arith.addf %49, %139 : vector<16x128xf32>
    %cst_66 = arith.constant dense<0xFF800000> : vector<16xf32>
    %141 = vector.multi_reduction <maximumf>, %73, %cst_66 [1] : vector<16x16xf32> to vector<16xf32>
    %142 = vector.shape_cast %141 : vector<16xf32> to vector<16x1xf32>
    %143 = vector.broadcast %142 : vector<16x1xf32> to vector<16x16xf32>
    %144 = arith.cmpf oeq, %73, %143 : vector<16x16xf32>
    %cst_67 = arith.constant 1.600000e+01 : f32
    %145 = vector.broadcast %cst_67 : f32 to vector<16x16xf32>
    %146 = arith.select %144, %48, %145 : vector<16x16xi1>, vector<16x16xf32>
    %cst_68 = arith.constant dense<0x7F800000> : vector<16xf32>
    %147 = vector.multi_reduction <minimumf>, %146, %cst_68 [1] : vector<16x16xf32> to vector<16xf32>
    %148 = vector.shape_cast %147 : vector<16xf32> to vector<16x1xf32>
    %149 = vector.broadcast %148 : vector<16x1xf32> to vector<16x16xf32>
    %150 = arith.cmpf oeq, %48, %149 : vector<16x16xf32>
    %cst_69 = arith.constant -3.000000e+38 : f32
    %151 = vector.broadcast %cst_69 : f32 to vector<16x16xf32>
    %152 = arith.select %150, %151, %73 : vector<16x16xi1>, vector<16x16xf32>
    %cst_70 = arith.constant 1.000000e+00 : f32
    %cst_71 = arith.constant 0.000000e+00 : f32
    %153 = vector.broadcast %cst_70 : f32 to vector<16x16xf32>
    %154 = vector.broadcast %cst_71 : f32 to vector<16x16xf32>
    %155 = arith.select %150, %153, %154 : vector<16x16xi1>, vector<16x16xf32>
    %156 = arith.truncf %155 : vector<16x16xf32> to vector<16x16xbf16>
    %cst_72 = arith.constant dense<0.000000e+00> : vector<16x128xf32>
    %157 = tpu.matmul %156, %41, %cst_72 {dimension_numbers = #tpu.dot_dimension_numbers<[1], [0], [0], [1], [0, 0, 1, 1], [], []>} : vector<16x16xbf16>, vector<16x128xbf16>, vector<16x128xf32> -> vector<16x128xf32>
    %158 = arith.addf %157, %46 : vector<16x128xf32>
    %cst_73 = arith.constant 2.000000e+01 : f32
    %159 = vector.broadcast %cst_73 : f32 to vector<16x128xf32>
    %160 = arith.minimumf %158, %159 : vector<16x128xf32>
    %161 = math.exp %160 : vector<16x128xf32>
    %cst_74 = arith.constant 1.000000e+00 : f32
    %162 = vector.broadcast %cst_74 : f32 to vector<16x128xf32>
    %163 = arith.addf %162, %161 : vector<16x128xf32>
    %164 = arith.mulf %163, %163 : vector<16x128xf32>
    %cst_75 = arith.constant 1.000000e+00 : f32
    %165 = vector.broadcast %cst_75 : f32 to vector<16x128xf32>
    %166 = arith.subf %164, %165 : vector<16x128xf32>
    %cst_76 = arith.constant 1.000000e+00 : f32
    %167 = vector.broadcast %cst_76 : f32 to vector<16x128xf32>
    %168 = arith.addf %164, %167 : vector<16x128xf32>
    %169 = tpu.reciprocal %168 {approx = true} : vector<16x128xf32> -> vector<16x128xf32>
    %170 = arith.mulf %166, %169 : vector<16x128xf32>
    %cst_77 = arith.constant 2.000000e+01 : f32
    %171 = vector.broadcast %cst_77 : f32 to vector<16x128xf32>
    %172 = arith.cmpf ogt, %158, %171 : vector<16x128xf32>
    %173 = arith.mulf %158, %170 : vector<16x128xf32>
    %174 = arith.select %172, %158, %173 : vector<16x128xi1>, vector<16x128xf32>
    %175 = arith.truncf %174 : vector<16x128xf32> to vector<16x128xbf16>
    %c0_78 = arith.constant 0 : index
    %c0_79 = arith.constant 0 : index
    %176 = vector.load %arg9[%c0_78, %c0_79] : memref<128x128xbf16, #tpu.memory_space<vmem>>, vector<128x128xbf16>
    %cst_80 = arith.constant dense<0.000000e+00> : vector<16x128xf32>
    %177 = tpu.matmul %175, %176, %cst_80 {dimension_numbers = #tpu.dot_dimension_numbers<[1], [0], [0], [1], [0, 0, 1, 1], [], []>} : vector<16x128xbf16>, vector<128x128xbf16>, vector<16x128xf32> -> vector<16x128xf32>
    %c0_81 = arith.constant 0 : index
    %c0_82 = arith.constant 0 : index
    %178 = vector.load %arg10[%c0_81, %c0_82] : memref<1x128xf32, #tpu.memory_space<vmem>>, vector<1x128xf32>
    %179 = vector.broadcast %178 : vector<1x128xf32> to vector<16x128xf32>
    %180 = arith.addf %177, %179 : vector<16x128xf32>
    %cst_83 = arith.constant 2.000000e+01 : f32
    %181 = vector.broadcast %cst_83 : f32 to vector<16x128xf32>
    %182 = arith.minimumf %180, %181 : vector<16x128xf32>
    %183 = math.exp %182 : vector<16x128xf32>
    %cst_84 = arith.constant 1.000000e+00 : f32
    %184 = vector.broadcast %cst_84 : f32 to vector<16x128xf32>
    %185 = arith.addf %184, %183 : vector<16x128xf32>
    %186 = arith.mulf %185, %185 : vector<16x128xf32>
    %cst_85 = arith.constant 1.000000e+00 : f32
    %187 = vector.broadcast %cst_85 : f32 to vector<16x128xf32>
    %188 = arith.subf %186, %187 : vector<16x128xf32>
    %cst_86 = arith.constant 1.000000e+00 : f32
    %189 = vector.broadcast %cst_86 : f32 to vector<16x128xf32>
    %190 = arith.addf %186, %189 : vector<16x128xf32>
    %191 = tpu.reciprocal %190 {approx = true} : vector<16x128xf32> -> vector<16x128xf32>
    %192 = arith.mulf %188, %191 : vector<16x128xf32>
    %cst_87 = arith.constant 2.000000e+01 : f32
    %193 = vector.broadcast %cst_87 : f32 to vector<16x128xf32>
    %194 = arith.cmpf ogt, %180, %193 : vector<16x128xf32>
    %195 = arith.mulf %180, %192 : vector<16x128xf32>
    %196 = arith.select %194, %180, %195 : vector<16x128xi1>, vector<16x128xf32>
    %197 = arith.truncf %196 : vector<16x128xf32> to vector<16x128xbf16>
    %c0_88 = arith.constant 0 : index
    %c0_89 = arith.constant 0 : index
    %198 = vector.load %arg11[%c0_88, %c0_89] : memref<128x128xbf16, #tpu.memory_space<vmem>>, vector<128x128xbf16>
    %cst_90 = arith.constant dense<0.000000e+00> : vector<16x128xf32>
    %199 = tpu.matmul %197, %198, %cst_90 {dimension_numbers = #tpu.dot_dimension_numbers<[1], [0], [0], [1], [0, 0, 1, 1], [], []>} : vector<16x128xbf16>, vector<128x128xbf16>, vector<16x128xf32> -> vector<16x128xf32>
    %c0_91 = arith.constant 0 : index
    %c0_92 = arith.constant 0 : index
    %200 = vector.load %arg12[%c0_91, %c0_92] : memref<1x128xf32, #tpu.memory_space<vmem>>, vector<1x128xf32>
    %201 = vector.broadcast %200 : vector<1x128xf32> to vector<16x128xf32>
    %202 = arith.addf %199, %201 : vector<16x128xf32>
    %cst_93 = arith.constant 2.000000e+01 : f32
    %203 = vector.broadcast %cst_93 : f32 to vector<16x128xf32>
    %204 = arith.minimumf %202, %203 : vector<16x128xf32>
    %205 = math.exp %204 : vector<16x128xf32>
    %cst_94 = arith.constant 1.000000e+00 : f32
    %206 = vector.broadcast %cst_94 : f32 to vector<16x128xf32>
    %207 = arith.addf %206, %205 : vector<16x128xf32>
    %208 = arith.mulf %207, %207 : vector<16x128xf32>
    %cst_95 = arith.constant 1.000000e+00 : f32
    %209 = vector.broadcast %cst_95 : f32 to vector<16x128xf32>
    %210 = arith.subf %208, %209 : vector<16x128xf32>
    %cst_96 = arith.constant 1.000000e+00 : f32
    %211 = vector.broadcast %cst_96 : f32 to vector<16x128xf32>
    %212 = arith.addf %208, %211 : vector<16x128xf32>
    %213 = tpu.reciprocal %212 {approx = true} : vector<16x128xf32> -> vector<16x128xf32>
    %214 = arith.mulf %210, %213 : vector<16x128xf32>
    %cst_97 = arith.constant 2.000000e+01 : f32
    %215 = vector.broadcast %cst_97 : f32 to vector<16x128xf32>
    %216 = arith.cmpf ogt, %202, %215 : vector<16x128xf32>
    %217 = arith.mulf %202, %214 : vector<16x128xf32>
    %218 = arith.select %216, %202, %217 : vector<16x128xi1>, vector<16x128xf32>
    %219 = arith.addf %140, %218 : vector<16x128xf32>
    %cst_98 = arith.constant dense<0xFF800000> : vector<16xf32>
    %220 = vector.multi_reduction <maximumf>, %152, %cst_98 [1] : vector<16x16xf32> to vector<16xf32>
    %221 = vector.shape_cast %220 : vector<16xf32> to vector<16x1xf32>
    %222 = vector.broadcast %221 : vector<16x1xf32> to vector<16x16xf32>
    %223 = arith.cmpf oeq, %152, %222 : vector<16x16xf32>
    %cst_99 = arith.constant 1.600000e+01 : f32
    %224 = vector.broadcast %cst_99 : f32 to vector<16x16xf32>
    %225 = arith.select %223, %48, %224 : vector<16x16xi1>, vector<16x16xf32>
    %cst_100 = arith.constant dense<0x7F800000> : vector<16xf32>
    %226 = vector.multi_reduction <minimumf>, %225, %cst_100 [1] : vector<16x16xf32> to vector<16xf32>
    %227 = vector.shape_cast %226 : vector<16xf32> to vector<16x1xf32>
    %228 = vector.broadcast %227 : vector<16x1xf32> to vector<16x16xf32>
    %229 = arith.cmpf oeq, %48, %228 : vector<16x16xf32>
    %cst_101 = arith.constant -3.000000e+38 : f32
    %230 = vector.broadcast %cst_101 : f32 to vector<16x16xf32>
    %231 = arith.select %229, %230, %152 : vector<16x16xi1>, vector<16x16xf32>
    %cst_102 = arith.constant 1.000000e+00 : f32
    %cst_103 = arith.constant 0.000000e+00 : f32
    %232 = vector.broadcast %cst_102 : f32 to vector<16x16xf32>
    %233 = vector.broadcast %cst_103 : f32 to vector<16x16xf32>
    %234 = arith.select %229, %232, %233 : vector<16x16xi1>, vector<16x16xf32>
    %235 = arith.truncf %234 : vector<16x16xf32> to vector<16x16xbf16>
    %cst_104 = arith.constant dense<0.000000e+00> : vector<16x128xf32>
    %236 = tpu.matmul %235, %41, %cst_104 {dimension_numbers = #tpu.dot_dimension_numbers<[1], [0], [0], [1], [0, 0, 1, 1], [], []>} : vector<16x16xbf16>, vector<16x128xbf16>, vector<16x128xf32> -> vector<16x128xf32>
    %237 = arith.addf %236, %46 : vector<16x128xf32>
    %cst_105 = arith.constant 2.000000e+01 : f32
    %238 = vector.broadcast %cst_105 : f32 to vector<16x128xf32>
    %239 = arith.minimumf %237, %238 : vector<16x128xf32>
    %240 = math.exp %239 : vector<16x128xf32>
    %cst_106 = arith.constant 1.000000e+00 : f32
    %241 = vector.broadcast %cst_106 : f32 to vector<16x128xf32>
    %242 = arith.addf %241, %240 : vector<16x128xf32>
    %243 = arith.mulf %242, %242 : vector<16x128xf32>
    %cst_107 = arith.constant 1.000000e+00 : f32
    %244 = vector.broadcast %cst_107 : f32 to vector<16x128xf32>
    %245 = arith.subf %243, %244 : vector<16x128xf32>
    %cst_108 = arith.constant 1.000000e+00 : f32
    %246 = vector.broadcast %cst_108 : f32 to vector<16x128xf32>
    %247 = arith.addf %243, %246 : vector<16x128xf32>
    %248 = tpu.reciprocal %247 {approx = true} : vector<16x128xf32> -> vector<16x128xf32>
    %249 = arith.mulf %245, %248 : vector<16x128xf32>
    %cst_109 = arith.constant 2.000000e+01 : f32
    %250 = vector.broadcast %cst_109 : f32 to vector<16x128xf32>
    %251 = arith.cmpf ogt, %237, %250 : vector<16x128xf32>
    %252 = arith.mulf %237, %249 : vector<16x128xf32>
    %253 = arith.select %251, %237, %252 : vector<16x128xi1>, vector<16x128xf32>
    %254 = arith.truncf %253 : vector<16x128xf32> to vector<16x128xbf16>
    %c0_110 = arith.constant 0 : index
    %c0_111 = arith.constant 0 : index
    %255 = vector.load %arg9[%c0_110, %c0_111] : memref<128x128xbf16, #tpu.memory_space<vmem>>, vector<128x128xbf16>
    %cst_112 = arith.constant dense<0.000000e+00> : vector<16x128xf32>
    %256 = tpu.matmul %254, %255, %cst_112 {dimension_numbers = #tpu.dot_dimension_numbers<[1], [0], [0], [1], [0, 0, 1, 1], [], []>} : vector<16x128xbf16>, vector<128x128xbf16>, vector<16x128xf32> -> vector<16x128xf32>
    %c0_113 = arith.constant 0 : index
    %c0_114 = arith.constant 0 : index
    %257 = vector.load %arg10[%c0_113, %c0_114] : memref<1x128xf32, #tpu.memory_space<vmem>>, vector<1x128xf32>
    %258 = vector.broadcast %257 : vector<1x128xf32> to vector<16x128xf32>
    %259 = arith.addf %256, %258 : vector<16x128xf32>
    %cst_115 = arith.constant 2.000000e+01 : f32
    %260 = vector.broadcast %cst_115 : f32 to vector<16x128xf32>
    %261 = arith.minimumf %259, %260 : vector<16x128xf32>
    %262 = math.exp %261 : vector<16x128xf32>
    %cst_116 = arith.constant 1.000000e+00 : f32
    %263 = vector.broadcast %cst_116 : f32 to vector<16x128xf32>
    %264 = arith.addf %263, %262 : vector<16x128xf32>
    %265 = arith.mulf %264, %264 : vector<16x128xf32>
    %cst_117 = arith.constant 1.000000e+00 : f32
    %266 = vector.broadcast %cst_117 : f32 to vector<16x128xf32>
    %267 = arith.subf %265, %266 : vector<16x128xf32>
    %cst_118 = arith.constant 1.000000e+00 : f32
    %268 = vector.broadcast %cst_118 : f32 to vector<16x128xf32>
    %269 = arith.addf %265, %268 : vector<16x128xf32>
    %270 = tpu.reciprocal %269 {approx = true} : vector<16x128xf32> -> vector<16x128xf32>
    %271 = arith.mulf %267, %270 : vector<16x128xf32>
    %cst_119 = arith.constant 2.000000e+01 : f32
    %272 = vector.broadcast %cst_119 : f32 to vector<16x128xf32>
    %273 = arith.cmpf ogt, %259, %272 : vector<16x128xf32>
    %274 = arith.mulf %259, %271 : vector<16x128xf32>
    %275 = arith.select %273, %259, %274 : vector<16x128xi1>, vector<16x128xf32>
    %276 = arith.truncf %275 : vector<16x128xf32> to vector<16x128xbf16>
    %c0_120 = arith.constant 0 : index
    %c0_121 = arith.constant 0 : index
    %277 = vector.load %arg11[%c0_120, %c0_121] : memref<128x128xbf16, #tpu.memory_space<vmem>>, vector<128x128xbf16>
    %cst_122 = arith.constant dense<0.000000e+00> : vector<16x128xf32>
    %278 = tpu.matmul %276, %277, %cst_122 {dimension_numbers = #tpu.dot_dimension_numbers<[1], [0], [0], [1], [0, 0, 1, 1], [], []>} : vector<16x128xbf16>, vector<128x128xbf16>, vector<16x128xf32> -> vector<16x128xf32>
    %c0_123 = arith.constant 0 : index
    %c0_124 = arith.constant 0 : index
    %279 = vector.load %arg12[%c0_123, %c0_124] : memref<1x128xf32, #tpu.memory_space<vmem>>, vector<1x128xf32>
    %280 = vector.broadcast %279 : vector<1x128xf32> to vector<16x128xf32>
    %281 = arith.addf %278, %280 : vector<16x128xf32>
    %cst_125 = arith.constant 2.000000e+01 : f32
    %282 = vector.broadcast %cst_125 : f32 to vector<16x128xf32>
    %283 = arith.minimumf %281, %282 : vector<16x128xf32>
    %284 = math.exp %283 : vector<16x128xf32>
    %cst_126 = arith.constant 1.000000e+00 : f32
    %285 = vector.broadcast %cst_126 : f32 to vector<16x128xf32>
    %286 = arith.addf %285, %284 : vector<16x128xf32>
    %287 = arith.mulf %286, %286 : vector<16x128xf32>
    %cst_127 = arith.constant 1.000000e+00 : f32
    %288 = vector.broadcast %cst_127 : f32 to vector<16x128xf32>
    %289 = arith.subf %287, %288 : vector<16x128xf32>
    %cst_128 = arith.constant 1.000000e+00 : f32
    %290 = vector.broadcast %cst_128 : f32 to vector<16x128xf32>
    %291 = arith.addf %287, %290 : vector<16x128xf32>
    %292 = tpu.reciprocal %291 {approx = true} : vector<16x128xf32> -> vector<16x128xf32>
    %293 = arith.mulf %289, %292 : vector<16x128xf32>
    %cst_129 = arith.constant 2.000000e+01 : f32
    %294 = vector.broadcast %cst_129 : f32 to vector<16x128xf32>
    %295 = arith.cmpf ogt, %281, %294 : vector<16x128xf32>
    %296 = arith.mulf %281, %293 : vector<16x128xf32>
    %297 = arith.select %295, %281, %296 : vector<16x128xi1>, vector<16x128xf32>
    %298 = arith.addf %219, %297 : vector<16x128xf32>
    %cst_130 = arith.constant dense<0xFF800000> : vector<16xf32>
    %299 = vector.multi_reduction <maximumf>, %231, %cst_130 [1] : vector<16x16xf32> to vector<16xf32>
    %300 = vector.shape_cast %299 : vector<16xf32> to vector<16x1xf32>
    %301 = vector.broadcast %300 : vector<16x1xf32> to vector<16x16xf32>
    %302 = arith.cmpf oeq, %231, %301 : vector<16x16xf32>
    %cst_131 = arith.constant 1.600000e+01 : f32
    %303 = vector.broadcast %cst_131 : f32 to vector<16x16xf32>
    %304 = arith.select %302, %48, %303 : vector<16x16xi1>, vector<16x16xf32>
    %cst_132 = arith.constant dense<0x7F800000> : vector<16xf32>
    %305 = vector.multi_reduction <minimumf>, %304, %cst_132 [1] : vector<16x16xf32> to vector<16xf32>
    %306 = vector.shape_cast %305 : vector<16xf32> to vector<16x1xf32>
    %307 = vector.broadcast %306 : vector<16x1xf32> to vector<16x16xf32>
    %308 = arith.cmpf oeq, %48, %307 : vector<16x16xf32>
    %cst_133 = arith.constant -3.000000e+38 : f32
    %309 = vector.broadcast %cst_133 : f32 to vector<16x16xf32>
    %310 = arith.select %308, %309, %231 : vector<16x16xi1>, vector<16x16xf32>
    %cst_134 = arith.constant 1.000000e+00 : f32
    %cst_135 = arith.constant 0.000000e+00 : f32
    %311 = vector.broadcast %cst_134 : f32 to vector<16x16xf32>
    %312 = vector.broadcast %cst_135 : f32 to vector<16x16xf32>
    %313 = arith.select %308, %311, %312 : vector<16x16xi1>, vector<16x16xf32>
    %314 = arith.truncf %313 : vector<16x16xf32> to vector<16x16xbf16>
    %cst_136 = arith.constant dense<0.000000e+00> : vector<16x128xf32>
    %315 = tpu.matmul %314, %41, %cst_136 {dimension_numbers = #tpu.dot_dimension_numbers<[1], [0], [0], [1], [0, 0, 1, 1], [], []>} : vector<16x16xbf16>, vector<16x128xbf16>, vector<16x128xf32> -> vector<16x128xf32>
    %316 = arith.addf %315, %46 : vector<16x128xf32>
    %cst_137 = arith.constant 2.000000e+01 : f32
    %317 = vector.broadcast %cst_137 : f32 to vector<16x128xf32>
    %318 = arith.minimumf %316, %317 : vector<16x128xf32>
    %319 = math.exp %318 : vector<16x128xf32>
    %cst_138 = arith.constant 1.000000e+00 : f32
    %320 = vector.broadcast %cst_138 : f32 to vector<16x128xf32>
    %321 = arith.addf %320, %319 : vector<16x128xf32>
    %322 = arith.mulf %321, %321 : vector<16x128xf32>
    %cst_139 = arith.constant 1.000000e+00 : f32
    %323 = vector.broadcast %cst_139 : f32 to vector<16x128xf32>
    %324 = arith.subf %322, %323 : vector<16x128xf32>
    %cst_140 = arith.constant 1.000000e+00 : f32
    %325 = vector.broadcast %cst_140 : f32 to vector<16x128xf32>
    %326 = arith.addf %322, %325 : vector<16x128xf32>
    %327 = tpu.reciprocal %326 {approx = true} : vector<16x128xf32> -> vector<16x128xf32>
    %328 = arith.mulf %324, %327 : vector<16x128xf32>
    %cst_141 = arith.constant 2.000000e+01 : f32
    %329 = vector.broadcast %cst_141 : f32 to vector<16x128xf32>
    %330 = arith.cmpf ogt, %316, %329 : vector<16x128xf32>
    %331 = arith.mulf %316, %328 : vector<16x128xf32>
    %332 = arith.select %330, %316, %331 : vector<16x128xi1>, vector<16x128xf32>
    %333 = arith.truncf %332 : vector<16x128xf32> to vector<16x128xbf16>
    %c0_142 = arith.constant 0 : index
    %c0_143 = arith.constant 0 : index
    %334 = vector.load %arg9[%c0_142, %c0_143] : memref<128x128xbf16, #tpu.memory_space<vmem>>, vector<128x128xbf16>
    %cst_144 = arith.constant dense<0.000000e+00> : vector<16x128xf32>
    %335 = tpu.matmul %333, %334, %cst_144 {dimension_numbers = #tpu.dot_dimension_numbers<[1], [0], [0], [1], [0, 0, 1, 1], [], []>} : vector<16x128xbf16>, vector<128x128xbf16>, vector<16x128xf32> -> vector<16x128xf32>
    %c0_145 = arith.constant 0 : index
    %c0_146 = arith.constant 0 : index
    %336 = vector.load %arg10[%c0_145, %c0_146] : memref<1x128xf32, #tpu.memory_space<vmem>>, vector<1x128xf32>
    %337 = vector.broadcast %336 : vector<1x128xf32> to vector<16x128xf32>
    %338 = arith.addf %335, %337 : vector<16x128xf32>
    %cst_147 = arith.constant 2.000000e+01 : f32
    %339 = vector.broadcast %cst_147 : f32 to vector<16x128xf32>
    %340 = arith.minimumf %338, %339 : vector<16x128xf32>
    %341 = math.exp %340 : vector<16x128xf32>
    %cst_148 = arith.constant 1.000000e+00 : f32
    %342 = vector.broadcast %cst_148 : f32 to vector<16x128xf32>
    %343 = arith.addf %342, %341 : vector<16x128xf32>
    %344 = arith.mulf %343, %343 : vector<16x128xf32>
    %cst_149 = arith.constant 1.000000e+00 : f32
    %345 = vector.broadcast %cst_149 : f32 to vector<16x128xf32>
    %346 = arith.subf %344, %345 : vector<16x128xf32>
    %cst_150 = arith.constant 1.000000e+00 : f32
    %347 = vector.broadcast %cst_150 : f32 to vector<16x128xf32>
    %348 = arith.addf %344, %347 : vector<16x128xf32>
    %349 = tpu.reciprocal %348 {approx = true} : vector<16x128xf32> -> vector<16x128xf32>
    %350 = arith.mulf %346, %349 : vector<16x128xf32>
    %cst_151 = arith.constant 2.000000e+01 : f32
    %351 = vector.broadcast %cst_151 : f32 to vector<16x128xf32>
    %352 = arith.cmpf ogt, %338, %351 : vector<16x128xf32>
    %353 = arith.mulf %338, %350 : vector<16x128xf32>
    %354 = arith.select %352, %338, %353 : vector<16x128xi1>, vector<16x128xf32>
    %355 = arith.truncf %354 : vector<16x128xf32> to vector<16x128xbf16>
    %c0_152 = arith.constant 0 : index
    %c0_153 = arith.constant 0 : index
    %356 = vector.load %arg11[%c0_152, %c0_153] : memref<128x128xbf16, #tpu.memory_space<vmem>>, vector<128x128xbf16>
    %cst_154 = arith.constant dense<0.000000e+00> : vector<16x128xf32>
    %357 = tpu.matmul %355, %356, %cst_154 {dimension_numbers = #tpu.dot_dimension_numbers<[1], [0], [0], [1], [0, 0, 1, 1], [], []>} : vector<16x128xbf16>, vector<128x128xbf16>, vector<16x128xf32> -> vector<16x128xf32>
    %c0_155 = arith.constant 0 : index
    %c0_156 = arith.constant 0 : index
    %358 = vector.load %arg12[%c0_155, %c0_156] : memref<1x128xf32, #tpu.memory_space<vmem>>, vector<1x128xf32>
    %359 = vector.broadcast %358 : vector<1x128xf32> to vector<16x128xf32>
    %360 = arith.addf %357, %359 : vector<16x128xf32>
    %cst_157 = arith.constant 2.000000e+01 : f32
    %361 = vector.broadcast %cst_157 : f32 to vector<16x128xf32>
    %362 = arith.minimumf %360, %361 : vector<16x128xf32>
    %363 = math.exp %362 : vector<16x128xf32>
    %cst_158 = arith.constant 1.000000e+00 : f32
    %364 = vector.broadcast %cst_158 : f32 to vector<16x128xf32>
    %365 = arith.addf %364, %363 : vector<16x128xf32>
    %366 = arith.mulf %365, %365 : vector<16x128xf32>
    %cst_159 = arith.constant 1.000000e+00 : f32
    %367 = vector.broadcast %cst_159 : f32 to vector<16x128xf32>
    %368 = arith.subf %366, %367 : vector<16x128xf32>
    %cst_160 = arith.constant 1.000000e+00 : f32
    %369 = vector.broadcast %cst_160 : f32 to vector<16x128xf32>
    %370 = arith.addf %366, %369 : vector<16x128xf32>
    %371 = tpu.reciprocal %370 {approx = true} : vector<16x128xf32> -> vector<16x128xf32>
    %372 = arith.mulf %368, %371 : vector<16x128xf32>
    %cst_161 = arith.constant 2.000000e+01 : f32
    %373 = vector.broadcast %cst_161 : f32 to vector<16x128xf32>
    %374 = arith.cmpf ogt, %360, %373 : vector<16x128xf32>
    %375 = arith.mulf %360, %372 : vector<16x128xf32>
    %376 = arith.select %374, %360, %375 : vector<16x128xi1>, vector<16x128xf32>
    %377 = arith.addf %298, %376 : vector<16x128xf32>
    %cst_162 = arith.constant dense<0xFF800000> : vector<16xf32>
    %378 = vector.multi_reduction <maximumf>, %310, %cst_162 [1] : vector<16x16xf32> to vector<16xf32>
    %379 = vector.shape_cast %378 : vector<16xf32> to vector<16x1xf32>
    %380 = vector.broadcast %379 : vector<16x1xf32> to vector<16x16xf32>
    %381 = arith.cmpf oeq, %310, %380 : vector<16x16xf32>
    %cst_163 = arith.constant 1.600000e+01 : f32
    %382 = vector.broadcast %cst_163 : f32 to vector<16x16xf32>
    %383 = arith.select %381, %48, %382 : vector<16x16xi1>, vector<16x16xf32>
    %cst_164 = arith.constant dense<0x7F800000> : vector<16xf32>
    %384 = vector.multi_reduction <minimumf>, %383, %cst_164 [1] : vector<16x16xf32> to vector<16xf32>
    %385 = vector.shape_cast %384 : vector<16xf32> to vector<16x1xf32>
    %386 = vector.broadcast %385 : vector<16x1xf32> to vector<16x16xf32>
    %387 = arith.cmpf oeq, %48, %386 : vector<16x16xf32>
    %cst_165 = arith.constant -3.000000e+38 : f32
    %388 = vector.broadcast %cst_165 : f32 to vector<16x16xf32>
    %389 = arith.select %387, %388, %310 : vector<16x16xi1>, vector<16x16xf32>
    %cst_166 = arith.constant 1.000000e+00 : f32
    %cst_167 = arith.constant 0.000000e+00 : f32
    %390 = vector.broadcast %cst_166 : f32 to vector<16x16xf32>
    %391 = vector.broadcast %cst_167 : f32 to vector<16x16xf32>
    %392 = arith.select %387, %390, %391 : vector<16x16xi1>, vector<16x16xf32>
    %393 = arith.truncf %392 : vector<16x16xf32> to vector<16x16xbf16>
    %cst_168 = arith.constant dense<0.000000e+00> : vector<16x128xf32>
    %394 = tpu.matmul %393, %41, %cst_168 {dimension_numbers = #tpu.dot_dimension_numbers<[1], [0], [0], [1], [0, 0, 1, 1], [], []>} : vector<16x16xbf16>, vector<16x128xbf16>, vector<16x128xf32> -> vector<16x128xf32>
    %395 = arith.addf %394, %46 : vector<16x128xf32>
    %cst_169 = arith.constant 2.000000e+01 : f32
    %396 = vector.broadcast %cst_169 : f32 to vector<16x128xf32>
    %397 = arith.minimumf %395, %396 : vector<16x128xf32>
    %398 = math.exp %397 : vector<16x128xf32>
    %cst_170 = arith.constant 1.000000e+00 : f32
    %399 = vector.broadcast %cst_170 : f32 to vector<16x128xf32>
    %400 = arith.addf %399, %398 : vector<16x128xf32>
    %401 = arith.mulf %400, %400 : vector<16x128xf32>
    %cst_171 = arith.constant 1.000000e+00 : f32
    %402 = vector.broadcast %cst_171 : f32 to vector<16x128xf32>
    %403 = arith.subf %401, %402 : vector<16x128xf32>
    %cst_172 = arith.constant 1.000000e+00 : f32
    %404 = vector.broadcast %cst_172 : f32 to vector<16x128xf32>
    %405 = arith.addf %401, %404 : vector<16x128xf32>
    %406 = tpu.reciprocal %405 {approx = true} : vector<16x128xf32> -> vector<16x128xf32>
    %407 = arith.mulf %403, %406 : vector<16x128xf32>
    %cst_173 = arith.constant 2.000000e+01 : f32
    %408 = vector.broadcast %cst_173 : f32 to vector<16x128xf32>
    %409 = arith.cmpf ogt, %395, %408 : vector<16x128xf32>
    %410 = arith.mulf %395, %407 : vector<16x128xf32>
    %411 = arith.select %409, %395, %410 : vector<16x128xi1>, vector<16x128xf32>
    %412 = arith.truncf %411 : vector<16x128xf32> to vector<16x128xbf16>
    %c0_174 = arith.constant 0 : index
    %c0_175 = arith.constant 0 : index
    %413 = vector.load %arg9[%c0_174, %c0_175] : memref<128x128xbf16, #tpu.memory_space<vmem>>, vector<128x128xbf16>
    %cst_176 = arith.constant dense<0.000000e+00> : vector<16x128xf32>
    %414 = tpu.matmul %412, %413, %cst_176 {dimension_numbers = #tpu.dot_dimension_numbers<[1], [0], [0], [1], [0, 0, 1, 1], [], []>} : vector<16x128xbf16>, vector<128x128xbf16>, vector<16x128xf32> -> vector<16x128xf32>
    %c0_177 = arith.constant 0 : index
    %c0_178 = arith.constant 0 : index
    %415 = vector.load %arg10[%c0_177, %c0_178] : memref<1x128xf32, #tpu.memory_space<vmem>>, vector<1x128xf32>
    %416 = vector.broadcast %415 : vector<1x128xf32> to vector<16x128xf32>
    %417 = arith.addf %414, %416 : vector<16x128xf32>
    %cst_179 = arith.constant 2.000000e+01 : f32
    %418 = vector.broadcast %cst_179 : f32 to vector<16x128xf32>
    %419 = arith.minimumf %417, %418 : vector<16x128xf32>
    %420 = math.exp %419 : vector<16x128xf32>
    %cst_180 = arith.constant 1.000000e+00 : f32
    %421 = vector.broadcast %cst_180 : f32 to vector<16x128xf32>
    %422 = arith.addf %421, %420 : vector<16x128xf32>
    %423 = arith.mulf %422, %422 : vector<16x128xf32>
    %cst_181 = arith.constant 1.000000e+00 : f32
    %424 = vector.broadcast %cst_181 : f32 to vector<16x128xf32>
    %425 = arith.subf %423, %424 : vector<16x128xf32>
    %cst_182 = arith.constant 1.000000e+00 : f32
    %426 = vector.broadcast %cst_182 : f32 to vector<16x128xf32>
    %427 = arith.addf %423, %426 : vector<16x128xf32>
    %428 = tpu.reciprocal %427 {approx = true} : vector<16x128xf32> -> vector<16x128xf32>
    %429 = arith.mulf %425, %428 : vector<16x128xf32>
    %cst_183 = arith.constant 2.000000e+01 : f32
    %430 = vector.broadcast %cst_183 : f32 to vector<16x128xf32>
    %431 = arith.cmpf ogt, %417, %430 : vector<16x128xf32>
    %432 = arith.mulf %417, %429 : vector<16x128xf32>
    %433 = arith.select %431, %417, %432 : vector<16x128xi1>, vector<16x128xf32>
    %434 = arith.truncf %433 : vector<16x128xf32> to vector<16x128xbf16>
    %c0_184 = arith.constant 0 : index
    %c0_185 = arith.constant 0 : index
    %435 = vector.load %arg11[%c0_184, %c0_185] : memref<128x128xbf16, #tpu.memory_space<vmem>>, vector<128x128xbf16>
    %cst_186 = arith.constant dense<0.000000e+00> : vector<16x128xf32>
    %436 = tpu.matmul %434, %435, %cst_186 {dimension_numbers = #tpu.dot_dimension_numbers<[1], [0], [0], [1], [0, 0, 1, 1], [], []>} : vector<16x128xbf16>, vector<128x128xbf16>, vector<16x128xf32> -> vector<16x128xf32>
    %c0_187 = arith.constant 0 : index
    %c0_188 = arith.constant 0 : index
    %437 = vector.load %arg12[%c0_187, %c0_188] : memref<1x128xf32, #tpu.memory_space<vmem>>, vector<1x128xf32>
    %438 = vector.broadcast %437 : vector<1x128xf32> to vector<16x128xf32>
    %439 = arith.addf %436, %438 : vector<16x128xf32>
    %cst_189 = arith.constant 2.000000e+01 : f32
    %440 = vector.broadcast %cst_189 : f32 to vector<16x128xf32>
    %441 = arith.minimumf %439, %440 : vector<16x128xf32>
    %442 = math.exp %441 : vector<16x128xf32>
    %cst_190 = arith.constant 1.000000e+00 : f32
    %443 = vector.broadcast %cst_190 : f32 to vector<16x128xf32>
    %444 = arith.addf %443, %442 : vector<16x128xf32>
    %445 = arith.mulf %444, %444 : vector<16x128xf32>
    %cst_191 = arith.constant 1.000000e+00 : f32
    %446 = vector.broadcast %cst_191 : f32 to vector<16x128xf32>
    %447 = arith.subf %445, %446 : vector<16x128xf32>
    %cst_192 = arith.constant 1.000000e+00 : f32
    %448 = vector.broadcast %cst_192 : f32 to vector<16x128xf32>
    %449 = arith.addf %445, %448 : vector<16x128xf32>
    %450 = tpu.reciprocal %449 {approx = true} : vector<16x128xf32> -> vector<16x128xf32>
    %451 = arith.mulf %447, %450 : vector<16x128xf32>
    %cst_193 = arith.constant 2.000000e+01 : f32
    %452 = vector.broadcast %cst_193 : f32 to vector<16x128xf32>
    %453 = arith.cmpf ogt, %439, %452 : vector<16x128xf32>
    %454 = arith.mulf %439, %451 : vector<16x128xf32>
    %455 = arith.select %453, %439, %454 : vector<16x128xi1>, vector<16x128xf32>
    %456 = arith.addf %377, %455 : vector<16x128xf32>
    %cst_194 = arith.constant dense<0xFF800000> : vector<16xf32>
    %457 = vector.multi_reduction <maximumf>, %389, %cst_194 [1] : vector<16x16xf32> to vector<16xf32>
    %458 = vector.shape_cast %457 : vector<16xf32> to vector<16x1xf32>
    %459 = vector.broadcast %458 : vector<16x1xf32> to vector<16x16xf32>
    %460 = arith.cmpf oeq, %389, %459 : vector<16x16xf32>
    %cst_195 = arith.constant 1.600000e+01 : f32
    %461 = vector.broadcast %cst_195 : f32 to vector<16x16xf32>
    %462 = arith.select %460, %48, %461 : vector<16x16xi1>, vector<16x16xf32>
    %cst_196 = arith.constant dense<0x7F800000> : vector<16xf32>
    %463 = vector.multi_reduction <minimumf>, %462, %cst_196 [1] : vector<16x16xf32> to vector<16xf32>
    %464 = vector.shape_cast %463 : vector<16xf32> to vector<16x1xf32>
    %465 = vector.broadcast %464 : vector<16x1xf32> to vector<16x16xf32>
    %466 = arith.cmpf oeq, %48, %465 : vector<16x16xf32>
    %cst_197 = arith.constant -3.000000e+38 : f32
    %467 = vector.broadcast %cst_197 : f32 to vector<16x16xf32>
    %468 = arith.select %466, %467, %389 : vector<16x16xi1>, vector<16x16xf32>
    %cst_198 = arith.constant 1.000000e+00 : f32
    %cst_199 = arith.constant 0.000000e+00 : f32
    %469 = vector.broadcast %cst_198 : f32 to vector<16x16xf32>
    %470 = vector.broadcast %cst_199 : f32 to vector<16x16xf32>
    %471 = arith.select %466, %469, %470 : vector<16x16xi1>, vector<16x16xf32>
    %472 = arith.truncf %471 : vector<16x16xf32> to vector<16x16xbf16>
    %cst_200 = arith.constant dense<0.000000e+00> : vector<16x128xf32>
    %473 = tpu.matmul %472, %41, %cst_200 {dimension_numbers = #tpu.dot_dimension_numbers<[1], [0], [0], [1], [0, 0, 1, 1], [], []>} : vector<16x16xbf16>, vector<16x128xbf16>, vector<16x128xf32> -> vector<16x128xf32>
    %474 = arith.addf %473, %46 : vector<16x128xf32>
    %cst_201 = arith.constant 2.000000e+01 : f32
    %475 = vector.broadcast %cst_201 : f32 to vector<16x128xf32>
    %476 = arith.minimumf %474, %475 : vector<16x128xf32>
    %477 = math.exp %476 : vector<16x128xf32>
    %cst_202 = arith.constant 1.000000e+00 : f32
    %478 = vector.broadcast %cst_202 : f32 to vector<16x128xf32>
    %479 = arith.addf %478, %477 : vector<16x128xf32>
    %480 = arith.mulf %479, %479 : vector<16x128xf32>
    %cst_203 = arith.constant 1.000000e+00 : f32
    %481 = vector.broadcast %cst_203 : f32 to vector<16x128xf32>
    %482 = arith.subf %480, %481 : vector<16x128xf32>
    %cst_204 = arith.constant 1.000000e+00 : f32
    %483 = vector.broadcast %cst_204 : f32 to vector<16x128xf32>
    %484 = arith.addf %480, %483 : vector<16x128xf32>
    %485 = tpu.reciprocal %484 {approx = true} : vector<16x128xf32> -> vector<16x128xf32>
    %486 = arith.mulf %482, %485 : vector<16x128xf32>
    %cst_205 = arith.constant 2.000000e+01 : f32
    %487 = vector.broadcast %cst_205 : f32 to vector<16x128xf32>
    %488 = arith.cmpf ogt, %474, %487 : vector<16x128xf32>
    %489 = arith.mulf %474, %486 : vector<16x128xf32>
    %490 = arith.select %488, %474, %489 : vector<16x128xi1>, vector<16x128xf32>
    %491 = arith.truncf %490 : vector<16x128xf32> to vector<16x128xbf16>
    %c0_206 = arith.constant 0 : index
    %c0_207 = arith.constant 0 : index
    %492 = vector.load %arg9[%c0_206, %c0_207] : memref<128x128xbf16, #tpu.memory_space<vmem>>, vector<128x128xbf16>
    %cst_208 = arith.constant dense<0.000000e+00> : vector<16x128xf32>
    %493 = tpu.matmul %491, %492, %cst_208 {dimension_numbers = #tpu.dot_dimension_numbers<[1], [0], [0], [1], [0, 0, 1, 1], [], []>} : vector<16x128xbf16>, vector<128x128xbf16>, vector<16x128xf32> -> vector<16x128xf32>
    %c0_209 = arith.constant 0 : index
    %c0_210 = arith.constant 0 : index
    %494 = vector.load %arg10[%c0_209, %c0_210] : memref<1x128xf32, #tpu.memory_space<vmem>>, vector<1x128xf32>
    %495 = vector.broadcast %494 : vector<1x128xf32> to vector<16x128xf32>
    %496 = arith.addf %493, %495 : vector<16x128xf32>
    %cst_211 = arith.constant 2.000000e+01 : f32
    %497 = vector.broadcast %cst_211 : f32 to vector<16x128xf32>
    %498 = arith.minimumf %496, %497 : vector<16x128xf32>
    %499 = math.exp %498 : vector<16x128xf32>
    %cst_212 = arith.constant 1.000000e+00 : f32
    %500 = vector.broadcast %cst_212 : f32 to vector<16x128xf32>
    %501 = arith.addf %500, %499 : vector<16x128xf32>
    %502 = arith.mulf %501, %501 : vector<16x128xf32>
    %cst_213 = arith.constant 1.000000e+00 : f32
    %503 = vector.broadcast %cst_213 : f32 to vector<16x128xf32>
    %504 = arith.subf %502, %503 : vector<16x128xf32>
    %cst_214 = arith.constant 1.000000e+00 : f32
    %505 = vector.broadcast %cst_214 : f32 to vector<16x128xf32>
    %506 = arith.addf %502, %505 : vector<16x128xf32>
    %507 = tpu.reciprocal %506 {approx = true} : vector<16x128xf32> -> vector<16x128xf32>
    %508 = arith.mulf %504, %507 : vector<16x128xf32>
    %cst_215 = arith.constant 2.000000e+01 : f32
    %509 = vector.broadcast %cst_215 : f32 to vector<16x128xf32>
    %510 = arith.cmpf ogt, %496, %509 : vector<16x128xf32>
    %511 = arith.mulf %496, %508 : vector<16x128xf32>
    %512 = arith.select %510, %496, %511 : vector<16x128xi1>, vector<16x128xf32>
    %513 = arith.truncf %512 : vector<16x128xf32> to vector<16x128xbf16>
    %c0_216 = arith.constant 0 : index
    %c0_217 = arith.constant 0 : index
    %514 = vector.load %arg11[%c0_216, %c0_217] : memref<128x128xbf16, #tpu.memory_space<vmem>>, vector<128x128xbf16>
    %cst_218 = arith.constant dense<0.000000e+00> : vector<16x128xf32>
    %515 = tpu.matmul %513, %514, %cst_218 {dimension_numbers = #tpu.dot_dimension_numbers<[1], [0], [0], [1], [0, 0, 1, 1], [], []>} : vector<16x128xbf16>, vector<128x128xbf16>, vector<16x128xf32> -> vector<16x128xf32>
    %c0_219 = arith.constant 0 : index
    %c0_220 = arith.constant 0 : index
    %516 = vector.load %arg12[%c0_219, %c0_220] : memref<1x128xf32, #tpu.memory_space<vmem>>, vector<1x128xf32>
    %517 = vector.broadcast %516 : vector<1x128xf32> to vector<16x128xf32>
    %518 = arith.addf %515, %517 : vector<16x128xf32>
    %cst_221 = arith.constant 2.000000e+01 : f32
    %519 = vector.broadcast %cst_221 : f32 to vector<16x128xf32>
    %520 = arith.minimumf %518, %519 : vector<16x128xf32>
    %521 = math.exp %520 : vector<16x128xf32>
    %cst_222 = arith.constant 1.000000e+00 : f32
    %522 = vector.broadcast %cst_222 : f32 to vector<16x128xf32>
    %523 = arith.addf %522, %521 : vector<16x128xf32>
    %524 = arith.mulf %523, %523 : vector<16x128xf32>
    %cst_223 = arith.constant 1.000000e+00 : f32
    %525 = vector.broadcast %cst_223 : f32 to vector<16x128xf32>
    %526 = arith.subf %524, %525 : vector<16x128xf32>
    %cst_224 = arith.constant 1.000000e+00 : f32
    %527 = vector.broadcast %cst_224 : f32 to vector<16x128xf32>
    %528 = arith.addf %524, %527 : vector<16x128xf32>
    %529 = tpu.reciprocal %528 {approx = true} : vector<16x128xf32> -> vector<16x128xf32>
    %530 = arith.mulf %526, %529 : vector<16x128xf32>
    %cst_225 = arith.constant 2.000000e+01 : f32
    %531 = vector.broadcast %cst_225 : f32 to vector<16x128xf32>
    %532 = arith.cmpf ogt, %518, %531 : vector<16x128xf32>
    %533 = arith.mulf %518, %530 : vector<16x128xf32>
    %534 = arith.select %532, %518, %533 : vector<16x128xi1>, vector<16x128xf32>
    %535 = arith.addf %456, %534 : vector<16x128xf32>
    %cst_226 = arith.constant dense<0xFF800000> : vector<16xf32>
    %536 = vector.multi_reduction <maximumf>, %468, %cst_226 [1] : vector<16x16xf32> to vector<16xf32>
    %537 = vector.shape_cast %536 : vector<16xf32> to vector<16x1xf32>
    %538 = vector.broadcast %537 : vector<16x1xf32> to vector<16x16xf32>
    %539 = arith.cmpf oeq, %468, %538 : vector<16x16xf32>
    %cst_227 = arith.constant 1.600000e+01 : f32
    %540 = vector.broadcast %cst_227 : f32 to vector<16x16xf32>
    %541 = arith.select %539, %48, %540 : vector<16x16xi1>, vector<16x16xf32>
    %cst_228 = arith.constant dense<0x7F800000> : vector<16xf32>
    %542 = vector.multi_reduction <minimumf>, %541, %cst_228 [1] : vector<16x16xf32> to vector<16xf32>
    %543 = vector.shape_cast %542 : vector<16xf32> to vector<16x1xf32>
    %544 = vector.broadcast %543 : vector<16x1xf32> to vector<16x16xf32>
    %545 = arith.cmpf oeq, %48, %544 : vector<16x16xf32>
    %cst_229 = arith.constant 1.000000e+00 : f32
    %cst_230 = arith.constant 0.000000e+00 : f32
    %546 = vector.broadcast %cst_229 : f32 to vector<16x16xf32>
    %547 = vector.broadcast %cst_230 : f32 to vector<16x16xf32>
    %548 = arith.select %545, %546, %547 : vector<16x16xi1>, vector<16x16xf32>
    %549 = arith.truncf %548 : vector<16x16xf32> to vector<16x16xbf16>
    %cst_231 = arith.constant dense<0.000000e+00> : vector<16x128xf32>
    %550 = tpu.matmul %549, %41, %cst_231 {dimension_numbers = #tpu.dot_dimension_numbers<[1], [0], [0], [1], [0, 0, 1, 1], [], []>} : vector<16x16xbf16>, vector<16x128xbf16>, vector<16x128xf32> -> vector<16x128xf32>
    %551 = arith.addf %550, %46 : vector<16x128xf32>
    %cst_232 = arith.constant 2.000000e+01 : f32
    %552 = vector.broadcast %cst_232 : f32 to vector<16x128xf32>
    %553 = arith.minimumf %551, %552 : vector<16x128xf32>
    %554 = math.exp %553 : vector<16x128xf32>
    %cst_233 = arith.constant 1.000000e+00 : f32
    %555 = vector.broadcast %cst_233 : f32 to vector<16x128xf32>
    %556 = arith.addf %555, %554 : vector<16x128xf32>
    %557 = arith.mulf %556, %556 : vector<16x128xf32>
    %cst_234 = arith.constant 1.000000e+00 : f32
    %558 = vector.broadcast %cst_234 : f32 to vector<16x128xf32>
    %559 = arith.subf %557, %558 : vector<16x128xf32>
    %cst_235 = arith.constant 1.000000e+00 : f32
    %560 = vector.broadcast %cst_235 : f32 to vector<16x128xf32>
    %561 = arith.addf %557, %560 : vector<16x128xf32>
    %562 = tpu.reciprocal %561 {approx = true} : vector<16x128xf32> -> vector<16x128xf32>
    %563 = arith.mulf %559, %562 : vector<16x128xf32>
    %cst_236 = arith.constant 2.000000e+01 : f32
    %564 = vector.broadcast %cst_236 : f32 to vector<16x128xf32>
    %565 = arith.cmpf ogt, %551, %564 : vector<16x128xf32>
    %566 = arith.mulf %551, %563 : vector<16x128xf32>
    %567 = arith.select %565, %551, %566 : vector<16x128xi1>, vector<16x128xf32>
    %568 = arith.truncf %567 : vector<16x128xf32> to vector<16x128xbf16>
    %c0_237 = arith.constant 0 : index
    %c0_238 = arith.constant 0 : index
    %569 = vector.load %arg9[%c0_237, %c0_238] : memref<128x128xbf16, #tpu.memory_space<vmem>>, vector<128x128xbf16>
    %cst_239 = arith.constant dense<0.000000e+00> : vector<16x128xf32>
    %570 = tpu.matmul %568, %569, %cst_239 {dimension_numbers = #tpu.dot_dimension_numbers<[1], [0], [0], [1], [0, 0, 1, 1], [], []>} : vector<16x128xbf16>, vector<128x128xbf16>, vector<16x128xf32> -> vector<16x128xf32>
    %c0_240 = arith.constant 0 : index
    %c0_241 = arith.constant 0 : index
    %571 = vector.load %arg10[%c0_240, %c0_241] : memref<1x128xf32, #tpu.memory_space<vmem>>, vector<1x128xf32>
    %572 = vector.broadcast %571 : vector<1x128xf32> to vector<16x128xf32>
    %573 = arith.addf %570, %572 : vector<16x128xf32>
    %cst_242 = arith.constant 2.000000e+01 : f32
    %574 = vector.broadcast %cst_242 : f32 to vector<16x128xf32>
    %575 = arith.minimumf %573, %574 : vector<16x128xf32>
    %576 = math.exp %575 : vector<16x128xf32>
    %cst_243 = arith.constant 1.000000e+00 : f32
    %577 = vector.broadcast %cst_243 : f32 to vector<16x128xf32>
    %578 = arith.addf %577, %576 : vector<16x128xf32>
    %579 = arith.mulf %578, %578 : vector<16x128xf32>
    %cst_244 = arith.constant 1.000000e+00 : f32
    %580 = vector.broadcast %cst_244 : f32 to vector<16x128xf32>
    %581 = arith.subf %579, %580 : vector<16x128xf32>
    %cst_245 = arith.constant 1.000000e+00 : f32
    %582 = vector.broadcast %cst_245 : f32 to vector<16x128xf32>
    %583 = arith.addf %579, %582 : vector<16x128xf32>
    %584 = tpu.reciprocal %583 {approx = true} : vector<16x128xf32> -> vector<16x128xf32>
    %585 = arith.mulf %581, %584 : vector<16x128xf32>
    %cst_246 = arith.constant 2.000000e+01 : f32
    %586 = vector.broadcast %cst_246 : f32 to vector<16x128xf32>
    %587 = arith.cmpf ogt, %573, %586 : vector<16x128xf32>
    %588 = arith.mulf %573, %585 : vector<16x128xf32>
    %589 = arith.select %587, %573, %588 : vector<16x128xi1>, vector<16x128xf32>
    %590 = arith.truncf %589 : vector<16x128xf32> to vector<16x128xbf16>
    %c0_247 = arith.constant 0 : index
    %c0_248 = arith.constant 0 : index
    %591 = vector.load %arg11[%c0_247, %c0_248] : memref<128x128xbf16, #tpu.memory_space<vmem>>, vector<128x128xbf16>
    %cst_249 = arith.constant dense<0.000000e+00> : vector<16x128xf32>
    %592 = tpu.matmul %590, %591, %cst_249 {dimension_numbers = #tpu.dot_dimension_numbers<[1], [0], [0], [1], [0, 0, 1, 1], [], []>} : vector<16x128xbf16>, vector<128x128xbf16>, vector<16x128xf32> -> vector<16x128xf32>
    %c0_250 = arith.constant 0 : index
    %c0_251 = arith.constant 0 : index
    %593 = vector.load %arg12[%c0_250, %c0_251] : memref<1x128xf32, #tpu.memory_space<vmem>>, vector<1x128xf32>
    %594 = vector.broadcast %593 : vector<1x128xf32> to vector<16x128xf32>
    %595 = arith.addf %592, %594 : vector<16x128xf32>
    %cst_252 = arith.constant 2.000000e+01 : f32
    %596 = vector.broadcast %cst_252 : f32 to vector<16x128xf32>
    %597 = arith.minimumf %595, %596 : vector<16x128xf32>
    %598 = math.exp %597 : vector<16x128xf32>
    %cst_253 = arith.constant 1.000000e+00 : f32
    %599 = vector.broadcast %cst_253 : f32 to vector<16x128xf32>
    %600 = arith.addf %599, %598 : vector<16x128xf32>
    %601 = arith.mulf %600, %600 : vector<16x128xf32>
    %cst_254 = arith.constant 1.000000e+00 : f32
    %602 = vector.broadcast %cst_254 : f32 to vector<16x128xf32>
    %603 = arith.subf %601, %602 : vector<16x128xf32>
    %cst_255 = arith.constant 1.000000e+00 : f32
    %604 = vector.broadcast %cst_255 : f32 to vector<16x128xf32>
    %605 = arith.addf %601, %604 : vector<16x128xf32>
    %606 = tpu.reciprocal %605 {approx = true} : vector<16x128xf32> -> vector<16x128xf32>
    %607 = arith.mulf %603, %606 : vector<16x128xf32>
    %cst_256 = arith.constant 2.000000e+01 : f32
    %608 = vector.broadcast %cst_256 : f32 to vector<16x128xf32>
    %609 = arith.cmpf ogt, %595, %608 : vector<16x128xf32>
    %610 = arith.mulf %595, %607 : vector<16x128xf32>
    %611 = arith.select %609, %595, %610 : vector<16x128xi1>, vector<16x128xf32>
    %612 = arith.addf %535, %611 : vector<16x128xf32>
    %cst_257 = arith.constant 0.142857149 : f32
    %613 = vector.broadcast %cst_257 : f32 to vector<16x128xf32>
    %614 = arith.mulf %612, %613 : vector<16x128xf32>
    %c0_258 = arith.constant 0 : index
    %c0_259 = arith.constant 0 : index
    %615 = vector.load %arg13[%c0_258, %c0_259] : memref<128x128xbf16, #tpu.memory_space<vmem>>, vector<128x128xbf16>
    %cst_260 = arith.constant dense<0.000000e+00> : vector<16x128xf32>
    %616 = tpu.matmul %10, %615, %cst_260 {dimension_numbers = #tpu.dot_dimension_numbers<[1], [0], [0], [1], [0, 0, 1, 1], [], []>} : vector<16x128xbf16>, vector<128x128xbf16>, vector<16x128xf32> -> vector<16x128xf32>
    %c0_261 = arith.constant 0 : index
    %c0_262 = arith.constant 0 : index
    %617 = vector.load %arg14[%c0_261, %c0_262] : memref<1x128xf32, #tpu.memory_space<vmem>>, vector<1x128xf32>
    %618 = vector.broadcast %617 : vector<1x128xf32> to vector<16x128xf32>
    %619 = arith.addf %616, %618 : vector<16x128xf32>
    %620 = arith.addf %619, %614 : vector<16x128xf32>
    %cst_263 = arith.constant 2.000000e+01 : f32
    %621 = vector.broadcast %cst_263 : f32 to vector<16x128xf32>
    %622 = arith.minimumf %620, %621 : vector<16x128xf32>
    %623 = math.exp %622 : vector<16x128xf32>
    %cst_264 = arith.constant 1.000000e+00 : f32
    %624 = vector.broadcast %cst_264 : f32 to vector<16x128xf32>
    %625 = arith.addf %624, %623 : vector<16x128xf32>
    %626 = arith.mulf %625, %625 : vector<16x128xf32>
    %cst_265 = arith.constant 1.000000e+00 : f32
    %627 = vector.broadcast %cst_265 : f32 to vector<16x128xf32>
    %628 = arith.subf %626, %627 : vector<16x128xf32>
    %cst_266 = arith.constant 1.000000e+00 : f32
    %629 = vector.broadcast %cst_266 : f32 to vector<16x128xf32>
    %630 = arith.addf %626, %629 : vector<16x128xf32>
    %631 = tpu.reciprocal %630 {approx = true} : vector<16x128xf32> -> vector<16x128xf32>
    %632 = arith.mulf %628, %631 : vector<16x128xf32>
    %cst_267 = arith.constant 2.000000e+01 : f32
    %633 = vector.broadcast %cst_267 : f32 to vector<16x128xf32>
    %634 = arith.cmpf ogt, %620, %633 : vector<16x128xf32>
    %635 = arith.mulf %620, %632 : vector<16x128xf32>
    %636 = arith.select %634, %620, %635 : vector<16x128xi1>, vector<16x128xf32>
    %637 = vector.broadcast %7 : vector<16x1xf32> to vector<16x128xf32>
    %638 = arith.mulf %636, %637 : vector<16x128xf32>
    %639 = arith.truncf %638 : vector<16x128xf32> to vector<16x128xbf16>
    %c0_268 = arith.constant 0 : index
    %c0_269 = arith.constant 0 : index
    %c0_270 = arith.constant 0 : index
    %640 = vector.load %arg15[%c0_268, %c0_269, %c0_270] : memref<1x16x128xbf16, #tpu.memory_space<vmem>>, vector<1x16x128xbf16>
    %641 = vector.shape_cast %640 : vector<1x16x128xbf16> to vector<16x128xbf16>
    %642 = vector.shape_cast %639 : vector<16x128xbf16> to vector<1x16x128xbf16>
    tpu.vector_store %arg15[%c0_268, %c0_269, %c0_270], %642 {strides = array<i32>} : memref<1x16x128xbf16, #tpu.memory_space<vmem>>, vector<1x16x128xbf16>,
    return
  }
  func.func @transform_0(%arg0: i32, %arg1: i32) -> (i32, i32, i32) {
    %c0_i32 = arith.constant 0 : i32
    %c0_i32_0 = arith.constant 0 : i32
    %c0_i32_1 = arith.constant 0 : i32
    return %arg0, %c0_i32, %c0_i32_0 : i32, i32, i32
  }
  func.func @transform_1(%arg0: i32, %arg1: i32) -> (i32, i32, i32) {
    %c0_i32 = arith.constant 0 : i32
    %c0_i32_0 = arith.constant 0 : i32
    %c0_i32_1 = arith.constant 0 : i32
    return %arg0, %c0_i32, %c0_i32_0 : i32, i32, i32
  }
  func.func @transform_2(%arg0: i32, %arg1: i32) -> (i32, i32, i32) {
    %c0_i32 = arith.constant 0 : i32
    %c0_i32_0 = arith.constant 0 : i32
    %c0_i32_1 = arith.constant 0 : i32
    return %arg0, %c0_i32, %c0_i32_0 : i32, i32, i32
  }
  func.func @transform_3(%arg0: i32, %arg1: i32) -> (i32, i32, i32) {
    %c0_i32 = arith.constant 0 : i32
    %c0_i32_0 = arith.constant 0 : i32
    return %arg0, %arg1, %c0_i32 : i32, i32, i32
  }
  func.func @transform_4(%arg0: i32, %arg1: i32) -> (i32, i32) {
    %c0_i32 = arith.constant 0 : i32
    %c0_i32_0 = arith.constant 0 : i32
    %c0_i32_1 = arith.constant 0 : i32
    return %c0_i32, %c0_i32_0 : i32, i32
  }
  func.func @transform_5(%arg0: i32, %arg1: i32) -> (i32, i32) {
    %c0_i32 = arith.constant 0 : i32
    %c0_i32_0 = arith.constant 0 : i32
    %c0_i32_1 = arith.constant 0 : i32
    return %c0_i32, %c0_i32_0 : i32, i32
  }
  func.func @transform_6(%arg0: i32, %arg1: i32) -> (i32, i32) {
    %c0_i32 = arith.constant 0 : i32
    %c0_i32_0 = arith.constant 0 : i32
    %c0_i32_1 = arith.constant 0 : i32
    return %c0_i32, %c0_i32_0 : i32, i32
  }
  func.func @transform_7(%arg0: i32, %arg1: i32) -> (i32, i32) {
    %c0_i32 = arith.constant 0 : i32
    %c0_i32_0 = arith.constant 0 : i32
    %c0_i32_1 = arith.constant 0 : i32
    return %c0_i32, %c0_i32_0 : i32, i32
  }
  func.func @transform_8(%arg0: i32, %arg1: i32) -> (i32, i32) {
    %c0_i32 = arith.constant 0 : i32
    %c0_i32_0 = arith.constant 0 : i32
    %c0_i32_1 = arith.constant 0 : i32
    return %c0_i32, %c0_i32_0 : i32, i32
  }
  func.func @transform_9(%arg0: i32, %arg1: i32) -> (i32, i32) {
    %c0_i32 = arith.constant 0 : i32
    %c0_i32_0 = arith.constant 0 : i32
    %c0_i32_1 = arith.constant 0 : i32
    return %c0_i32, %c0_i32_0 : i32, i32
  }
  func.func @transform_10(%arg0: i32, %arg1: i32) -> (i32, i32) {
    %c0_i32 = arith.constant 0 : i32
    %c0_i32_0 = arith.constant 0 : i32
    %c0_i32_1 = arith.constant 0 : i32
    return %c0_i32, %c0_i32_0 : i32, i32
  }
  func.func @transform_11(%arg0: i32, %arg1: i32) -> (i32, i32) {
    %c0_i32 = arith.constant 0 : i32
    %c0_i32_0 = arith.constant 0 : i32
    %c0_i32_1 = arith.constant 0 : i32
    return %c0_i32, %c0_i32_0 : i32, i32
  }
  func.func @transform_12(%arg0: i32, %arg1: i32) -> (i32, i32) {
    %c0_i32 = arith.constant 0 : i32
    %c0_i32_0 = arith.constant 0 : i32
    %c0_i32_1 = arith.constant 0 : i32
    return %c0_i32, %c0_i32_0 : i32, i32
  }
  func.func @transform_13(%arg0: i32, %arg1: i32) -> (i32, i32, i32) {
    %c0_i32 = arith.constant 0 : i32
    %c0_i32_0 = arith.constant 0 : i32
    return %arg0, %arg1, %c0_i32 : i32, i32, i32
  }
}

</mosaic_0001>

<bundles_post_ra>
// kernel: tpu_custom_call.1
= control target key start
LH: loop header
LB: loop body
LE: loop exit
PB: predicated region body
PF: predicated region fallthrough
CT: control target
= control target key end

     0   :  { %s6229_s0 = inlined_call_operand.hbm [shape: f32[2,16,2], index: 0, kind: input, shape index: {}]   ;;  %s6230_s1 = inlined_call_operand.hbm [shape: bf16[2,16,128], index: 1, kind: input, shape index: {}]   ;;  %s6231_s2 = inlined_call_operand.hbm [shape: f32[2,16,1], index: 2, kind: input, shape index: {}]   ;;  %s6232_s3 = inlined_call_operand.hbm [shape: f32[2,16,1], index: 3, kind: input, shape index: {}]   ;;  %s6233_s4 = inlined_call_operand.hbm [shape: bf16[128,128], index: 4, kind: input, shape index: {}]   ;;  %s6234_s5 = inlined_call_operand.hbm [shape: bf16[128,128], index: 5, kind: input, shape index: {}]   ;;  %s6235_s6 = inlined_call_operand.hbm [shape: f32[1,128], index: 6, kind: input, shape index: {}]   ;;  %s6236_s7 = inlined_call_operand.hbm [shape: bf16[128,128], index: 7, kind: input, shape index: {}]   ;;  %s6237_s8 = inlined_call_operand.hbm [shape: f32[1,128], index: 8, kind: input, shape index: {}]   ;;  %s6238_s9 = inlined_call_operand.hbm [shape: bf16[128,128], index: 9, kind: input, shape index: {}]   ;;  %s6239_s10 = inlined_call_operand.hbm [shape: f32[1,128], index: 10, kind: input, shape index: {}]   ;;  %s6240_s11 = inlined_call_operand.hbm [shape: bf16[128,128], index: 11, kind: input, shape index: {}]   ;;  %s6241_s12 = inlined_call_operand.hbm [shape: f32[1,128], index: 12, kind: input, shape index: {}]   ;;  %s6242_s13 = inlined_call_operand.hbm [shape: bf16[2,16,128], index: 13, kind: output, shape index: {}]  }
   0x1   :  { %6267 = sst [smem:[#allocation39_spill]] %s6229_s0 }
   0x2   :  { %6268 = sst [smem:[#allocation40_spill]] %s6230_s1 }
   0x3   :  { %6269 = sst [smem:[#allocation41_spill]] %s6231_s2 }
   0x4   :  { %6270 = sst [smem:[#allocation42_spill]] %s6232_s3 }
   0x5   :  { %6271 = sst [smem:[#allocation43_spill]] %s6233_s4 }
   0x6   :  { %6272 = sst [smem:[#allocation44_spill]] %s6234_s5 }
   0x7   :  { %6273 = sst [smem:[#allocation45_spill]] %s6235_s6 }
   0x8   :  { %6274 = sst [smem:[#allocation46_spill]] %s6236_s7 }
   0x9   :  { %6275 = sst [smem:[#allocation47_spill]] %s6237_s8 }
   0xa   :  { %6276 = sst [smem:[#allocation48_spill]] %s6238_s9 }
   0xb   :  { %6277 = sst [smem:[#allocation49_spill]] %s6240_s11 }
   0xc   :  { %6278 = sst [smem:[#allocation50_spill]] %s6241_s12 }
   0xd   :  { %6279 = sst [smem:[#allocation51_spill]] %s6242_s13 }
   0xe   :  { %18 = vsyncpa [#allocation3], 0 }
   0xf   :  { %20 = vsyncpa [#allocation3 + $0x1], 0 }
  0x10   :  { %21 = vsyncpa [#allocation6], 0 }
  0x11   :  { %23 = vsyncpa [#allocation6 + $0x1], 0 }
  0x12   :  { %24 = vsyncpa [#allocation9], 0 }
  0x13   :  { %26 = vsyncpa [#allocation9 + $0x1], 0 }
  0x14   :  { %27 = vsyncpa [#allocation12], 0 }
  0x15   :  { %28 = vsyncpa [#allocation15], 0 }
  0x16   :  { %29 = vsyncpa [#allocation18], 0 }
  0x17   :  { %30 = vsyncpa [#allocation21], 0 }
  0x18   :  { %31 = vsyncpa [#allocation4], 0 }
  0x19   :  { %33 = vsyncpa [#allocation4 + $0x1], 0  ;;  %s5032_s25 = smov 0   ;;  %s5034_s26 = smov 0  }
  0x1a   :  { %s5036_s27 = smov 0   ;;  %s5038_s28 = smov 0  }
  0x1b   :  { %s5040_s29 = smov 0   ;;  %s5042_s30 = smov 0  }
  0x1c LB: > { %6280 = sst [smem:[#allocation33_spill]] %s4923_s27  ;;  %s5063_s14 = sadd.s32 4294967295, %s4935_s30   ;;  %s4935_s30 = sphi %s5042_s30, %s39_s30   ;;  %s4931_s29 = sphi %s5040_s29, %s6339_s29   ;;  %s4927_s28 = sphi %s5038_s28, %s6338_s28   ;;  %s4923_s27 = sphi %s5036_s27, %s6334_s27   ;;  %s4919_s26 = sphi %s5034_s26, %s6337_s26   ;;  %s4915_s25 = sphi %s5032_s25, %s6336_s25  }
  0x1d   : > { %6281 = sst [smem:[#allocation34_spill]] %s4927_s28  ;;  %p3306_p0 = scmp.ge.s32.totalorder %s4935_s30, 1 }
  0x1e   : > { %p6249_p1 = scmp.eq.s32.totalorder %s5063_s14, 0  ;;  %p379_p2 = scmp.lt.s32.totalorder %s4935_s30, 3 }
  0x1f   : > { %s4937_s16 = smov [#allocation10]   ;;  %s4938_s19 = smov [#allocation11]  }
  0x20   : > { %p5068_p3 = pnand %p3306_p0, %p379_p2  ;;  %s391_s17 = sshll.u32 %s4937_s16, 4  ;;  %s5072_s17 = int_to_ptr.vmem [resolvable:$true] %s391_s17 }
  0x21   : > { %s404_s20 = sshll.u32 %s4938_s19, 4  ;;  %s4939_s21 = smov [#allocation14]   ;;  %s5083_s20 = int_to_ptr.vmem [resolvable:$true] %s404_s20 }
  0x22   : > { %s6282_s15 = scalar_select %p5068_p3, 1, 0 }
  0x23   : > { %p4081_p4 = pneg %p5068_p3  ;;  %s5085_s22 = sshll.u32 %s4939_s21, 4  ;;  %s429_s22 = int_to_ptr.vmem [resolvable:$true] %s5085_s22 }
  0x24   : > { %6283 = sst [smem:[#allocation35_spill]] %s6282_s15  ;;  %s6285_s4 = sld [smem:[#allocation43_spill]] }
  0x25   : > { %p5079_p6 = pnand %p4081_p4, %p6249_p1 }
  0x27   : > { %s6284_s18 = scalar_select %p5079_p6, 1, 0 }
  0x28   : > { %p5095_p8 = pneg %p5079_p6 }
  0x2a   : > { %s4453_s16 = scalar_lea.hbm %s6285_s4, 1024 }
  0x2b   : > { %p4454_p7 = scmp.ne.s32.totalorder %s6285_s4, %s4453_s16  ;;  %p4460_p11 = scmp.lt.u32.totalorder %s4453_s16, %s6285_s4 }
  0x2c   : > { %s6286_s15 = scalar_select %p5095_p8, 1, 0 }
  0x2d   : > { %p4456_p9 = pnand %p5095_p8, %p4454_p7 }
  0x2f   : > { %p4457_p10 = pneg %p4456_p9 }
  0x31   : > { %p4462_p12 = pnand %p4460_p11, %p4457_p10 }
  0x33   : > { %4465 = shalt.err (!%p4462_p12)
}
  0x34   : > { %s4466_s13 = scalar_lea.vmem %s5072_s17, 1024  ;;  %p4474_p4 = scmp.lt.s32.totalorder %s5072_s17, %s5072_s17 }
  0x35   : > { %p4467_p13 = scmp.ne.s32.totalorder %s5072_s17, %s4466_s13  ;;  %p4475_p5 = scmp.lt.s32.totalorder %s4466_s13, %s4466_s13 }
  0x37   : > { %p4469_p0 = pnand %p4467_p13, %p5095_p8  ;;  %p4476_p7 = por %p4475_p5, %p4474_p4 }
  0x39   : > { %p4470_p2 = pneg %p4469_p0 }
  0x3b   : > { %p4477_p9 = pnand %p4476_p7, %p4470_p2 }
  0x3d   : > { %4480 = shalt.err (!%p4477_p9)
}
  0x3e   : > { %s6251_s28 = smov 64   ;;  %s6252_s23 = smov 4  }
  0x3f   : > { %4084 = dma.hbm_to_vmem [thread:$0]  (!%p5079_p6), %s6285_s4, 1024, %s5072_s17, [#allocation9], %s6251_s28, %s6251_s28, %s6252_s23  }
  0x40   : > { %s6287_s5 = sld [smem:[#allocation44_spill]] }
  0x46   : > { %s4481_s13 = scalar_lea.hbm %s6287_s5, 1024 }
  0x47   : > { %p4482_p5 = scmp.ne.s32.totalorder %s6287_s5, %s4481_s13  ;;  %p4488_p12 = scmp.lt.u32.totalorder %s4481_s13, %s6287_s5 }
  0x49   : > { %p4484_p10 = pnand %p4482_p5, %p5095_p8 }
  0x4b   : > { %p4485_p11 = pneg %p4484_p10 }
  0x4d   : > { %p4490_p13 = pnand %p4488_p12, %p4485_p11 }
  0x4f   : > { %4493 = shalt.err (!%p4490_p13)
}
  0x50   : > { %s4494_s17 = scalar_lea.vmem %s5083_s20, 1024  ;;  %p4502_p7 = scmp.lt.s32.totalorder %s5083_s20, %s5083_s20 }
  0x51   : > { %p4495_p0 = scmp.ne.s32.totalorder %s5083_s20, %s4494_s17  ;;  %p4503_p9 = scmp.lt.s32.totalorder %s4494_s17, %s4494_s17 }
  0x53   : > { %p4497_p2 = pnand %p4495_p0, %p5095_p8  ;;  %p4504_p5 = por %p4503_p9, %p4502_p7 }
  0x55   : > { %p4498_p4 = pneg %p4497_p2 }
  0x57   : > { %p4505_p10 = pnand %p4504_p5, %p4498_p4 }
  0x59   : > { %4508 = shalt.err (!%p4505_p10)
}
  0x5a   : > { %4087 = dma.hbm_to_vmem [thread:$0]  (!%p5079_p6), %s6287_s5, 1024, %s5083_s20, [#allocation12], %s6251_s28, %s6251_s28, %s6252_s23  }
  0x5b   : > { %s6288_s7 = sld [smem:[#allocation46_spill]] }
  0x61   : > { %s4509_s24 = scalar_lea.hbm %s6288_s7, 1024 }
  0x62   : > { %p4510_p11 = scmp.ne.s32.totalorder %s6288_s7, %s4509_s24  ;;  %p4516_p0 = scmp.lt.u32.totalorder %s4509_s24, %s6288_s7 }
  0x64   : > { %p4512_p12 = pnand %p4510_p11, %p5095_p8 }
  0x66   : > { %p4513_p13 = pneg %p4512_p12 }
  0x68   : > { %p4518_p2 = pnand %p4516_p0, %p4513_p13 }
  0x6a   : > { %4521 = shalt.err (!%p4518_p2)
}
  0x6b   : > { %s4522_s17 = scalar_lea.vmem %s429_s22, 1024  ;;  %p4530_p5 = scmp.lt.s32.totalorder %s429_s22, %s429_s22 }
  0x6c   : > { %p4523_p4 = scmp.ne.s32.totalorder %s429_s22, %s4522_s17  ;;  %p4531_p10 = scmp.lt.s32.totalorder %s4522_s17, %s4522_s17 }
  0x6e   : > { %p4525_p7 = pnand %p4523_p4, %p5095_p8  ;;  %p4532_p1 = por %p4531_p10, %p4530_p5 }
  0x70   : > { %p4526_p9 = pneg %p4525_p7 }
  0x72   : > { %p4533_p3 = pnand %p4532_p1, %p4526_p9 }
  0x74   : > { %4536 = shalt.err (!%p4533_p3)
}
  0x75   : > { %4093 = dma.hbm_to_vmem [thread:$0]  (!%p5079_p6), %s6288_s7, 1024, %s429_s22, [#allocation15], %s6251_s28, %s6251_s28, %s6252_s23  }
  0x76   : > { %s4942_s2 = smov [#allocation17]   ;;  %s4943_s12 = smov [#allocation20]  }
  0x77   : > { %s452_s3 = sshll.u32 %s4942_s2, 4  ;;  %s476_s24 = sshll.u32 %s4943_s12, 4  ;;  %s453_s3 = int_to_ptr.vmem [resolvable:$true] %s452_s3  ;;  %s477_s24 = int_to_ptr.vmem [resolvable:$true] %s476_s24 }
  0x78   : > { %s6289_s9 = sld [smem:[#allocation48_spill]] }
  0x7e   : > { %s4537_s21 = scalar_lea.hbm %s6289_s9, 1024 }
  0x7f   : > { %p4538_p1 = scmp.ne.s32.totalorder %s6289_s9, %s4537_s21  ;;  %p4544_p12 = scmp.lt.u32.totalorder %s4537_s21, %s6289_s9 }
  0x81   : > { %p4540_p3 = pnand %p4538_p1, %p5095_p8 }
  0x83   : > { %p4541_p11 = pneg %p4540_p3 }
  0x85   : > { %p4546_p13 = pnand %p4544_p12, %p4541_p11 }
  0x87   : > { %4549 = shalt.err (!%p4546_p13)
}
  0x88   : > { %s4550_s22 = scalar_lea.vmem %s453_s3, 1024  ;;  %p4558_p7 = scmp.lt.s32.totalorder %s453_s3, %s453_s3 }
  0x89   : > { %p4551_p0 = scmp.ne.s32.totalorder %s453_s3, %s4550_s22  ;;  %p4559_p9 = scmp.lt.s32.totalorder %s4550_s22, %s4550_s22 }
  0x8b   : > { %p4553_p2 = pnand %p4551_p0, %p5095_p8  ;;  %p4560_p5 = por %p4559_p9, %p4558_p7 }
  0x8d   : > { %p4554_p4 = pneg %p4553_p2 }
  0x8f   : > { %p4561_p10 = pnand %p4560_p5, %p4554_p4 }
  0x91   : > { %4564 = shalt.err (!%p4561_p10)
}
  0x92   : > { %4099 = dma.hbm_to_vmem [thread:$0]  (!%p5079_p6), %s6289_s9, 1024, %s453_s3, [#allocation18], %s6251_s28, %s6251_s28, %s6252_s23  }
  0x93   : > { %s6290_s11 = sld [smem:[#allocation49_spill]] }
  0x99   : > { %s4565_s16 = scalar_lea.hbm %s6290_s11, 1024 }
  0x9a   : > { %p4566_p1 = scmp.ne.s32.totalorder %s6290_s11, %s4565_s16  ;;  %p4572_p12 = scmp.lt.u32.totalorder %s4565_s16, %s6290_s11 }
  0x9c   : > { %p4568_p3 = pnand %p4566_p1, %p5095_p8 }
  0x9e   : > { %p4569_p11 = pneg %p4568_p3 }
  0xa0   : > { %p4574_p13 = pnand %p4572_p12, %p4569_p11 }
  0xa2   : > { %4577 = shalt.err (!%p4574_p13)
}
  0xa3   : > { %s4578_s20 = scalar_lea.vmem %s477_s24, 1024  ;;  %p4586_p7 = scmp.lt.s32.totalorder %s477_s24, %s477_s24 }
  0xa4   : > { %p4579_p0 = scmp.ne.s32.totalorder %s477_s24, %s4578_s20  ;;  %p4587_p9 = scmp.lt.s32.totalorder %s4578_s20, %s4578_s20 }
  0xa6   : > { %p4581_p2 = pnand %p4579_p0, %p5095_p8  ;;  %p4588_p5 = por %p4587_p9, %p4586_p7 }
  0xa8   : > { %p4582_p4 = pneg %p4581_p2 }
  0xaa   : > { %p4589_p10 = pnand %p4588_p5, %p4582_p4 }
  0xac   : > { %4592 = shalt.err (!%p4589_p10)
}
  0xad   : > { %4105 = dma.hbm_to_vmem [thread:$0]  (!%p5079_p6), %s6290_s11, 1024, %s477_s24, [#allocation21], %s6251_s28, %s6251_s28, %s6252_s23  }
  0xae   : > { %s3305_s4 = sadd.s32 4294967294, %s4935_s30   ;;  %s51_s0 = sadd.s32 1, %s4931_s29 }
  0xaf   : > { %s58_s2 = sadd.s32 1, %s4923_s27  ;;  %p53_p1 = scmp.ge.s32.totalorder %s51_s0, 2 }
  0xb0   : > { %p65_p3 = scmp.ne.s32.totalorder %s4923_s27, %s4919_s26  ;;  %p66_p11 = scmp.eq.s32.totalorder %s4935_s30, 0 }
  0xb1   : > { %p71_p12 = scmp.ne.s32.totalorder %s4919_s26, %s4915_s25  ;;  %s6341_s0 = smov (%p53_p1, %s51_s0), 0 }
  0xb2   : > { %6291 = sst [smem:[#allocation36_spill]] %s6341_s0  ;;  %p67_p13 = por %p66_p11, %p65_p3 }
  0xb3   : > { %p6292_p0 = scmp.eq.s32.totalorder %s5063_s14, 0  ;;  %s55_s24 = ssub.s32 %s4931_s29, %s6341_s0 }
  0xb4   : > { %p366_p4 = scmp.eq.s32.totalorder %s5063_s14, 1  ;;  %p56_p7 = scmp.eq.s32.totalorder %s55_s24, 0 }
  0xb5   : > { %p5221_p2 = por %p6292_p0, %p71_p12  ;;  %p372_p9 = scmp.eq.s32.totalorder %s3305_s4, 1 }
  0xb6   : > { %p5228_p5 = por %p366_p4, %p65_p3  ;;  %p4135_p10 = scmp.lt.s32.totalorder %s4935_s30, 2 }
  0xb7   : > { %s6293_s12 = scalar_select %p5221_p2, 1, 0 }
  0xb8   : > { %s6294_s16 = scalar_select %p5228_p5, 1, 0 }
  0xb9   : > { %s5234_s19 = scalar_select %p56_p7, %s4923_s27, %s58_s2  }
  0xba   : > { %p5236_p1 = por %p372_p9, %p71_p12  ;;  %s5241_s13 = sand.u32 1, %s4923_s27  }
  0xbb   : > { %6295 = sst [smem:[#allocation37_spill]] %s5234_s19  ;;  %p5243_p11 = pnand %p4135_p10, %p67_p13 }
  0xbc   : > { %s6296_s21 = scalar_select %p5236_p1, 1, 0 }
  0xbd   : > { %s6298_s17 = scalar_select %p5243_p11, 1, 0 }
  0xbe   : > { %6297 = sst [smem:[#allocation38_spill]] %s6296_s21  ;;  %s6254_s20 = sand.u32 1, %s4935_s30  }
  0xbf   : > { %s3320_s3 = sshll.u32 %s5241_s13, 3  ;;  %s3453_s22 = sshll.u32 %s4931_s29, 7 }
  0xc0   : > { %s526_s4 = scalar_lea.vmem [#allocation5], %s3320_s3  ;;  %s6299_s1 = sld [smem:[#allocation40_spill]] }
  0xc1   : > { %s533_s24 = sshll.u32 %s526_s4, 4  ;;  %s5259_s5 = scalar_lea.sflag [#allocation6], %s6254_s20  ;;  %s5255_s24 = int_to_ptr.vmem [resolvable:$true] %s533_s24 }
  0xc2   : > { %p5265_p12 = pneg %p5243_p11 }
  0xc4   : > { %s6300_s3 = scalar_select %p5265_p12, 1, 0 }
  0xc6   : > { %s5253_s23 = scalar_lea.hbm %s6299_s1, %s3453_s22  ;;  %s4598_s4 = scalar_lea.hbm %s6299_s1, 256 }
  0xc7   : > { %s4593_s7 = scalar_lea.hbm %s5253_s23, 128  ;;  %p4599_p4 = scmp.lt.u32.totalorder %s5253_s23, %s6299_s1 }
  0xc8   : > { %p4594_p3 = scmp.ne.s32.totalorder %s5253_s23, %s4593_s7  ;;  %p4600_p7 = scmp.lt.u32.totalorder %s4598_s4, %s4593_s7 }
  0xc9   : > { %p4602_p10 = scmp.lt.u32.totalorder %s4593_s7, %s5253_s23 }
  0xca   : > { %p4596_p13 = pnand %p5265_p12, %p4594_p3  ;;  %p4601_p9 = por %p4600_p7, %p4599_p4 }
  0xcc   : > { %p4597_p0 = pneg %p4596_p13  ;;  %p4603_p1 = por %p4602_p10, %p4601_p9 }
  0xce   : > { %p4604_p5 = pnand %p4603_p1, %p4597_p0 }
  0xd0   : > { %4607 = shalt.err (!%p4604_p5)
}
  0xd1   : > { %s4608_s20 = scalar_lea.vmem %s5255_s24, 128  ;;  %s4944_s28 = smov [#allocation5]  }
  0xd2   : > { %p4609_p3 = scmp.ne.s32.totalorder %s5255_s24, %s4608_s20  ;;  %s4613_s22 = sshll.u32 %s4944_s28, 4  ;;  %s4614_s22 = int_to_ptr.vmem [resolvable:$false] %s4613_s22 }
  0xd3   : > { %s4615_s9 = scalar_lea.vmem %s4614_s22, 256  ;;  %p4616_p6 = scmp.lt.s32.totalorder %s5255_s24, %s4614_s22 }
  0xd4   : > { %p4611_p13 = pnand %p4609_p3, %p5265_p12  ;;  %p4617_p8 = scmp.lt.s32.totalorder %s4615_s9, %s4608_s20 }
  0xd6   : > { %p4612_p2 = pneg %p4611_p13  ;;  %p4618_p4 = por %p4617_p8, %p4616_p6 }
  0xd8   : > { %p4619_p7 = pnand %p4618_p4, %p4612_p2 }
  0xda   : > { %4622 = shalt.err (!%p4619_p7)
}
  0xdb   : > { %s6301_s7 = smov 4   ;;  %s6302_s4 = smov 64  }
  0xdc   : > { %4115 = dma.hbm_to_vmem [thread:$0]  (!%p5243_p11), %s5253_s23, 128, %s5255_s24, %s5259_s5, %s6302_s4, %s6302_s4, %s6301_s7  }
  0xdd   : > { %s4945_s2 = smov [#allocation13]   ;;  %s4946_s28 = smov [#allocation16]  }
  0xde   : > { %s418_s1 = sshll.u32 %s4945_s2, 4  ;;  %s442_s11 = sshll.u32 %s4946_s28, 4  ;;  %s419_s1 = int_to_ptr.vmem [resolvable:$true] %s418_s1  ;;  %s443_s11 = int_to_ptr.vmem [resolvable:$true] %s442_s11 }
  0xdf   : > { %s6303_s6 = sld [smem:[#allocation45_spill]]  ;;  %p6304_p8 = scmp.ne.s32.totalorder %s6286_s15, 0 }
  0xe5   : > { %s4623_s9 = scalar_lea.hbm %s6303_s6, 16 }
  0xe6   : > { %p4624_p6 = scmp.ne.s32.totalorder %s6303_s6, %s4623_s9  ;;  %p4630_p1 = scmp.lt.u32.totalorder %s4623_s9, %s6303_s6 }
  0xe8   : > { %p4626_p2 = pnand %p4624_p6, %p6304_p8 }
  0xea   : > { %p4627_p5 = pneg %p4626_p2 }
  0xec   : > { %p4632_p0 = pnand %p4630_p1, %p4627_p5 }
  0xee   : > { %4635 = shalt.err (!%p4632_p0)
}
  0xef   : > { %s4636_s23 = scalar_lea.vmem %s419_s1, 16  ;;  %s4643_s24 = scalar_lea.vmem %s419_s1, 32 }
  0xf0   : > { %p4637_p9 = scmp.ne.s32.totalorder %s419_s1, %s4636_s23  ;;  %p4644_p13 = scmp.lt.s32.totalorder %s419_s1, %s419_s1 }
  0xf1   : > { %p4645_p4 = scmp.lt.s32.totalorder %s4643_s24, %s4636_s23 }
  0xf2   : > { %p4639_p10 = pnand %p4637_p9, %p6304_p8 }
  0xf3   : > { %p4646_p7 = por %p4645_p4, %p4644_p13 }
  0xf4   : > { %p4640_p3 = pneg %p4639_p10 }
  0xf6   : > { %p4647_p11 = pnand %p4646_p7, %p4640_p3 }
  0xf8   : > { %4650 = shalt.err (!%p4647_p11)
}
  0xf9   : > { %p6305_p6 = scmp.ne.s32.totalorder %s6284_s18, 0  ;;  %s6306_s8 = sld [smem:[#allocation47_spill]] }
  0xfb   : > { %4090 = dma.hbm_to_vmem [thread:$0]  (!%p6305_p6), %s6303_s6, 16, %s419_s1, [#allocation12]  }
  0xff   : > { %s4651_s7 = scalar_lea.hbm %s6306_s8, 16 }
 0x100   : > { %p4652_p2 = scmp.ne.s32.totalorder %s6306_s8, %s4651_s7  ;;  %p4658_p11 = scmp.lt.u32.totalorder %s4651_s7, %s6306_s8 }
 0x102   : > { %p4654_p5 = pnand %p4652_p2, %p6304_p8 }
 0x104   : > { %p4655_p1 = pneg %p4654_p5 }
 0x106   : > { %p4660_p0 = pnand %p4658_p11, %p4655_p1 }
 0x108   : > { %4663 = shalt.err (!%p4660_p0)
}
 0x109   : > { %s4664_s20 = scalar_lea.vmem %s443_s11, 16  ;;  %s4671_s1 = scalar_lea.vmem %s443_s11, 32 }
 0x10a   : > { %p4665_p9 = scmp.ne.s32.totalorder %s443_s11, %s4664_s20  ;;  %p4672_p13 = scmp.lt.s32.totalorder %s443_s11, %s443_s11 }
 0x10b   : > { %p4673_p4 = scmp.lt.s32.totalorder %s4671_s1, %s4664_s20 }
 0x10c   : > { %p4667_p10 = pnand %p4665_p9, %p6304_p8 }
 0x10d   : > { %p4674_p7 = por %p4673_p4, %p4672_p13 }
 0x10e   : > { %p4668_p3 = pneg %p4667_p10 }
 0x110   : > { %p4675_p12 = pnand %p4674_p7, %p4668_p3 }
 0x112   : > { %4678 = shalt.err (!%p4675_p12)
}
 0x113   : > { %4096 = dma.hbm_to_vmem [thread:$0]  (!%p6305_p6), %s6306_s8, 16, %s443_s11, [#allocation15]  }
 0x114   : > { %s4947_s24 = smov [#allocation19]   ;;  %s4948_s19 = smov [#allocation22]  }
 0x115   : > { %s466_s0 = sshll.u32 %s4947_s24, 4  ;;  %s490_s27 = sshll.u32 %s4948_s19, 4  ;;  %s467_s0 = int_to_ptr.vmem [resolvable:$true] %s466_s0  ;;  %s491_s27 = int_to_ptr.vmem [resolvable:$true] %s490_s27 }
 0x116   : > { %s4679_s4 = scalar_lea.hbm %s6239_s10, 16 }
 0x117   : > { %p4680_p12 = scmp.ne.s32.totalorder %s6239_s10, %s4679_s4  ;;  %p4686_p1 = scmp.lt.u32.totalorder %s4679_s4, %s6239_s10 }
 0x119   : > { %p4682_p2 = pnand %p4680_p12, %p6304_p8 }
 0x11b   : > { %p4683_p5 = pneg %p4682_p2 }
 0x11d   : > { %p4688_p11 = pnand %p4686_p1, %p4683_p5 }
 0x11f   : > { %4691 = shalt.err (!%p4688_p11)
}
 0x120   : > { %s4692_s11 = scalar_lea.vmem %s467_s0, 16  ;;  %s4699_s1 = scalar_lea.vmem %s467_s0, 32 }
 0x121   : > { %p4693_p0 = scmp.ne.s32.totalorder %s467_s0, %s4692_s11  ;;  %p4700_p3 = scmp.lt.s32.totalorder %s467_s0, %s467_s0 }
 0x122   : > { %p4701_p13 = scmp.lt.s32.totalorder %s4699_s1, %s4692_s11 }
 0x123   : > { %p4695_p9 = pnand %p4693_p0, %p6304_p8 }
 0x124   : > { %p4702_p4 = por %p4701_p13, %p4700_p3 }
 0x125   : > { %p4696_p10 = pneg %p4695_p9 }
 0x127   : > { %p4703_p7 = pnand %p4702_p4, %p4696_p10 }
 0x129   : > { %4706 = shalt.err (!%p4703_p7)
}
 0x12a   : > { %4102 = dma.hbm_to_vmem [thread:$0]  (!%p6305_p6), %s6239_s10, 16, %s467_s0, [#allocation18]  }
 0x12b   : > { %s6307_s21 = sld [smem:[#allocation50_spill]] }
 0x131   : > { %s4707_s7 = scalar_lea.hbm %s6307_s21, 16 }
 0x132   : > { %p4708_p12 = scmp.ne.s32.totalorder %s6307_s21, %s4707_s7  ;;  %p4714_p1 = scmp.lt.u32.totalorder %s4707_s7, %s6307_s21 }
 0x134   : > { %p4710_p2 = pnand %p4708_p12, %p6304_p8 }
 0x136   : > { %p4711_p5 = pneg %p4710_p2 }
 0x138   : > { %p4716_p11 = pnand %p4714_p1, %p4711_p5 }
 0x13a   : > { %4719 = shalt.err (!%p4716_p11)
}
 0x13b   : > { %s4720_s20 = scalar_lea.vmem %s491_s27, 16  ;;  %s4727_s0 = scalar_lea.vmem %s491_s27, 32 }
 0x13c   : > { %p4721_p0 = scmp.ne.s32.totalorder %s491_s27, %s4720_s20  ;;  %p4728_p3 = scmp.lt.s32.totalorder %s491_s27, %s491_s27 }
 0x13d   : > { %p4729_p13 = scmp.lt.s32.totalorder %s4727_s0, %s4720_s20 }
 0x13e   : > { %p4723_p9 = pnand %p4721_p0, %p6304_p8 }
 0x13f   : > { %p4730_p4 = por %p4729_p13, %p4728_p3 }
 0x140   : > { %p4724_p10 = pneg %p4723_p9 }
 0x142   : > { %p4731_p7 = pnand %p4730_p4, %p4724_p10 }
 0x144   : > { %4734 = shalt.err (!%p4731_p7)
}
 0x145   : > { %4108 = dma.hbm_to_vmem [thread:$0]  (!%p6305_p6), %s6307_s21, 16, %s491_s27, [#allocation21]  }
 0x146   : > { %s5365_s9 = sshll.u32 %s5241_s13, 4  ;;  %s5368_s15 = sshll.u32 %s4931_s29, 8 }
 0x147   : > { %s6308_s19 = sld [smem:[#allocation39_spill]]  ;;  %s505_s18 = scalar_lea.vmem [#allocation2], %s5365_s9 }
 0x148   : > { %s512_s4 = sshll.u32 %s505_s18, 4  ;;  %s502_s27 = scalar_lea.sflag [#allocation3], %s5241_s13  ;;  %s5377_s4 = int_to_ptr.vmem [resolvable:$true] %s512_s4 }
 0x149   : > { %p6309_p6 = scmp.ne.s32.totalorder %s6300_s3, 0 }
 0x14d   : > { %s5374_s7 = scalar_lea.hbm %s6308_s19, %s5368_s15  ;;  %s4740_s20 = scalar_lea.hbm %s6308_s19, 512 }
 0x14e   : > { %s4735_s2 = scalar_lea.hbm %s5374_s7, 256  ;;  %p4741_p5 = scmp.lt.u32.totalorder %s5374_s7, %s6308_s19 }
 0x14f   : > { %p4736_p8 = scmp.ne.s32.totalorder %s5374_s7, %s4735_s2  ;;  %p4742_p1 = scmp.lt.u32.totalorder %s4740_s20, %s4735_s2 }
 0x150   : > { %p4744_p0 = scmp.lt.u32.totalorder %s4735_s2, %s5374_s7 }
 0x151   : > { %p4738_p12 = pnand %p4736_p8, %p6309_p6  ;;  %p4743_p11 = por %p4742_p1, %p4741_p5 }
 0x153   : > { %p4739_p2 = pneg %p4738_p12  ;;  %p4745_p9 = por %p4744_p0, %p4743_p11 }
 0x155   : > { %p4746_p10 = pnand %p4745_p9, %p4739_p2 }
 0x157   : > { %4749 = shalt.err (!%p4746_p10)
}
 0x158   : > { %s4750_s1 = scalar_lea.vmem %s5377_s4, 256  ;;  %s4949_s23 = smov [#allocation2]  }
 0x159   : > { %p4751_p3 = scmp.ne.s32.totalorder %s5377_s4, %s4750_s1  ;;  %s4755_s24 = sshll.u32 %s4949_s23, 4  ;;  %s4756_s24 = int_to_ptr.vmem [resolvable:$false] %s4755_s24 }
 0x15a   : > { %s4757_s18 = scalar_lea.vmem %s4756_s24, 512  ;;  %p4758_p7 = scmp.lt.s32.totalorder %s5377_s4, %s4756_s24 }
 0x15b   : > { %p4753_p13 = pnand %p4751_p3, %p6309_p6  ;;  %p4759_p8 = scmp.lt.s32.totalorder %s4757_s18, %s4750_s1 }
 0x15d   : > { %p4754_p4 = pneg %p4753_p13  ;;  %p4760_p12 = por %p4759_p8, %p4758_p7 }
 0x15f   : > { %p4761_p5 = pnand %p4760_p12, %p4754_p4 }
 0x161   : > { %4764 = shalt.err (!%p4761_p5)
}
 0x162   : > { %s4950_s2 = smov 128   ;;  %s4951_s28 = smov 8  }
 0x163   : > { %p6310_p2 = scmp.ne.s32.totalorder %s6298_s17, 0  ;;  %s6311_s0 = sld [smem:[#allocation41_spill]] }
 0x164   : > { %s547_s1 = scalar_lea.vmem [#allocation7], %s5365_s9  ;;  %s6312_s6 = sld [smem:[#allocation42_spill]] }
 0x165   : > { %4112 = dma.hbm_to_vmem [thread:$0]  (!%p6310_p2), %s5374_s7, 256, %s5377_s4, %s502_s27, %s4950_s2, %s4950_s2, %s4951_s28  }
 0x166   : > { %s554_s23 = sshll.u32 %s547_s1, 4  ;;  %s5413_s23 = int_to_ptr.vmem [resolvable:$true] %s554_s23 }
 0x169   : > { %s5410_s11 = scalar_lea.hbm %s6311_s0, %s5368_s15  ;;  %s4770_s27 = scalar_lea.hbm %s6311_s0, 512 }
 0x16a   : > { %s5419_s8 = scalar_lea.hbm %s6312_s6, %s5368_s15  ;;  %s4765_s13 = scalar_lea.hbm %s5410_s11, 256 }
 0x16b   : > { %p4766_p1 = scmp.ne.s32.totalorder %s5410_s11, %s4765_s13  ;;  %p4771_p9 = scmp.lt.u32.totalorder %s5410_s11, %s6311_s0 }
 0x16c   : > { %p4772_p10 = scmp.lt.u32.totalorder %s4770_s27, %s4765_s13  ;;  %p4774_p13 = scmp.lt.u32.totalorder %s4765_s13, %s5410_s11 }
 0x16d   : > { %p4768_p11 = pnand %p4766_p1, %p6309_p6 }
 0x16e   : > { %p4773_p3 = por %p4772_p10, %p4771_p9 }
 0x16f   : > { %p4769_p0 = pneg %p4768_p11 }
 0x170   : > { %p4775_p4 = por %p4774_p13, %p4773_p3 }
 0x172   : > { %p4776_p7 = pnand %p4775_p4, %p4769_p0 }
 0x174   : > { %4779 = shalt.err (!%p4776_p7)
}
 0x175   : > { %s4780_s15 = scalar_lea.vmem %s5413_s23, 256  ;;  %s4952_s1 = smov [#allocation7]  }
 0x176   : > { %p4781_p8 = scmp.ne.s32.totalorder %s5413_s23, %s4780_s15  ;;  %s4785_s24 = sshll.u32 %s4952_s1, 4  ;;  %s4786_s24 = int_to_ptr.vmem [resolvable:$false] %s4785_s24 }
 0x177   : > { %s4787_s18 = scalar_lea.vmem %s4786_s24, 512  ;;  %p4788_p1 = scmp.lt.s32.totalorder %s5413_s23, %s4786_s24 }
 0x178   : > { %p4783_p12 = pnand %p4781_p8, %p6309_p6  ;;  %p4789_p11 = scmp.lt.s32.totalorder %s4787_s18, %s4780_s15 }
 0x17a   : > { %p4784_p5 = pneg %p4783_p12  ;;  %p4790_p9 = por %p4789_p11, %p4788_p1 }
 0x17c   : > { %p4791_p10 = pnand %p4790_p9, %p4784_p5 }
 0x17e   : > { %4794 = shalt.err (!%p4791_p10)
}
 0x17f   : > { %4118 = dma.hbm_to_vmem [thread:$0]  (!%p6310_p2), %s5410_s11, 256, %s5413_s23, %s5259_s5, %s4950_s2, %s4950_s2, %s4951_s28  }
 0x180   : > { %s568_s13 = scalar_lea.vmem [#allocation8], %s5365_s9  ;;  %s6313_s4 = sand.u32 1, %s4935_s30  }
 0x181   : > { %s577_s7 = sshll.u32 %s568_s13, 4  ;;  %s5451_s27 = scalar_lea.sflag [#allocation9], %s6313_s4  ;;  %s5447_s7 = int_to_ptr.vmem [resolvable:$true] %s577_s7 }
 0x182   : > { %s4795_s22 = scalar_lea.hbm %s5419_s8, 256  ;;  %s4800_s1 = scalar_lea.hbm %s6312_s6, 512 }
 0x183   : > { %p4796_p0 = scmp.ne.s32.totalorder %s5419_s8, %s4795_s22  ;;  %p4801_p4 = scmp.lt.u32.totalorder %s5419_s8, %s6312_s6 }
 0x184   : > { %p4802_p7 = scmp.lt.u32.totalorder %s4800_s1, %s4795_s22  ;;  %p4804_p12 = scmp.lt.u32.totalorder %s4795_s22, %s5419_s8 }
 0x185   : > { %p4798_p3 = pnand %p4796_p0, %p6309_p6 }
 0x186   : > { %p4803_p8 = por %p4802_p7, %p4801_p4 }
 0x187   : > { %p4799_p13 = pneg %p4798_p3 }
 0x188   : > { %p4805_p5 = por %p4804_p12, %p4803_p8 }
 0x18a   : > { %p4806_p1 = pnand %p4805_p5, %p4799_p13 }
 0x18c   : > { %4809 = shalt.err (!%p4806_p1)
}
 0x18d   : > { %s4810_s5 = scalar_lea.vmem %s5447_s7, 256  ;;  %s4953_s9 = smov [#allocation8]  }
 0x18e   : > { %p4811_p11 = scmp.ne.s32.totalorder %s5447_s7, %s4810_s5  ;;  %s4815_s11 = sshll.u32 %s4953_s9, 4  ;;  %s4816_s11 = int_to_ptr.vmem [resolvable:$false] %s4815_s11 }
 0x18f   : > { %s4817_s23 = scalar_lea.vmem %s4816_s11, 512  ;;  %p4818_p0 = scmp.lt.s32.totalorder %s5447_s7, %s4816_s11 }
 0x190   : > { %p4813_p9 = pnand %p4811_p11, %p6309_p6  ;;  %p4819_p3 = scmp.lt.s32.totalorder %s4817_s23, %s4810_s5 }
 0x192   : > { %p4814_p10 = pneg %p4813_p9  ;;  %p4820_p4 = por %p4819_p3, %p4818_p0 }
 0x194   : > { %p4821_p7 = pnand %p4820_p4, %p4814_p10 }
 0x196   : > { %4824 = shalt.err (!%p4821_p7)
}
 0x197   : > { %4121 = dma.hbm_to_vmem [thread:$0]  (!%p6310_p2), %s5419_s8, 256, %s5447_s7, %s5451_s27, %s4950_s2, %s4950_s2, %s4951_s28  }
 0x198   : > { %s6314_s3 = sld [smem:[#allocation35_spill]] }
 0x19e   : > { %p6315_p6 = scmp.ne.s32.totalorder %s6314_s3, 0 }
 0x19f   : > { %s5481_s13 = sand.u32 (!%p6315_p6), 1, %s4919_s26   ;;  %p6316_p13 = scmp.ne.s32.totalorder (!%p6315_p6), %s6293_s12, 0 }
 0x1a0   : > { %589 = sbr.rel (%p6315_p6) target bundleno = 3966 (0xf7e), region = 72  ;;  %s5484_s4 = sshll.u32 (!%p6315_p6), %s5481_s13, 4 }
 0x1a1   : > { %s592_s17 = scalar_lea.sflag (!%p6315_p6), [#allocation3], %s5481_s13  ;;  %s595_s22 = scalar_lea.vmem (!%p6315_p6), [#allocation2], %s5484_s4 }
 0x1a7   : > { %4878 = dma.done.wait (%p6316_p13), %s592_s17, 256  }
 0x1a8   : > { %4880 = vsyncadd (%p6316_p13), %s592_s17, 4294967040  ;;  %s600_s8 = sand.u32 1, %s5063_s14   ;;  %s3331_s2 = sshll.u32 %s5481_s13, 3 }
 0x1a9   : > { %s601_s28 = scalar_lea.sflag [#allocation6], %s600_s8  ;;  %s5496_s7 = scalar_lea.vmem [#allocation5], %s3331_s2 }
 0x1aa   : > { %4882 = dma.done.wait (%p6316_p13), %s601_s28, 384  }
 0x1ab   : > { %4884 = vsyncadd (%p6316_p13), %s601_s28, 4294966912  ;;  %s613_s27 = scalar_lea.vmem [#allocation7], %s5484_s4  ;;  %s619_s20 = scalar_lea.sflag [#allocation9], %s600_s8 }
 0x1ac   : > { %s622_s15 = scalar_lea.vmem [#allocation8], %s5484_s4 }
 0x1ad   : > { %4886 = dma.done.wait (%p6316_p13), %s619_s20, 256  }
 0x1ae   : > { %4888 = vsyncadd (%p6316_p13), %s619_s20, 4294967040  ;;  %p6317_p2 = scmp.eq.s32.totalorder %s5063_s14, 0 }
 0x1b0   : > { %4890 = dma.done.wait (%p6317_p2), [#allocation9], 1024   ;;  %p6318_p8 = pmov %p6317_p2 }
 0x1b1   : > { %p6319_p12 = pmov %p6317_p2 }
 0x1b2   : > { %4892 = vsyncadd (%p6318_p8), [#allocation9], 4294966272 }
 0x1b3   : > { %4894 = dma.done.wait (%p6319_p12), [#allocation12], 1040   ;;  %p6320_p5 = pmov %p6317_p2 }
 0x1b4   : > { %p6321_p1 = pmov %p6317_p2 }
 0x1b5   : > { %4896 = vsyncadd (%p6320_p5), [#allocation12], 4294966256 }
 0x1b6   : > { %4898 = dma.done.wait (%p6321_p1), [#allocation15], 1040   ;;  %p6322_p11 = pmov %p6321_p1 }
 0x1b7   : > { %p6323_p9 = pmov %p6321_p1 }
 0x1b8   : > { %4900 = vsyncadd (%p6322_p11), [#allocation15], 4294966256 }
 0x1b9   : > { %4902 = dma.done.wait (%p6323_p9), [#allocation18], 1040   ;;  %p6324_p10 = pmov %p6321_p1 }
 0x1ba   : > { %p6325_p0 = pmov %p6321_p1 }
 0x1bb   : > { %4904 = vsyncadd (%p6324_p10), [#allocation18], 4294966256 }
 0x1bc   : > { %4906 = dma.done.wait (%p6325_p0), [#allocation21], 1040   ;;  %p6326_p3 = pmov %p6325_p0 }
 0x1bd   : > { %v4954_v0 = vmov 0   ;;  %v722_v1 = vld [vmem:[%s613_s27] sm:$0xff]  ;;  %v723_v2 = vld [vmem:[%s613_s27 + $0x8] sm:$0xff]  ;;  %v4955_v3 = vmov 0.0   ;;  %vm4956_vm0 = vmmov 0   ;;  %v735_v4 = vld [vmem:[%s595_s22] sm:$0xff]  ;;  %v907_v26 = vlaneseq }
 0x1be   : > { %4908 = vsyncadd (%p6326_p3), [#allocation21], 4294966256  ;;  %4214 = vset.pattern.permute.xlu0 %v4954_v0  ;;  %4215 = vset.pattern.permute.xlu1 %v4954_v0  ;;  %v736_v8 = vld [vmem:[%s595_s22 + $0x8] sm:$0xff]  ;;  %vm766_vm1 = vcmask 15360   ;;  %v4957_v20 = vmov 0.0|0.0   ;;  %v4958_v25 = vmov 1.0  }
 0x1bf   : > { %739 = vperm.xlu0 %4214, %v722_v1   ;;  %754 = vperm.xlu1 %4215, %v722_v1   ;;  %vm4033_vm2 = vmpackc.low %vm766_vm1, %vm766_vm1  ;;  %v908_v29 = vshrl.u32 %v907_v26, 7  ;;  %vm1146_vm3 = vcmask 130048   ;;  %v1144_v46 = vand.u32 127, %v907_v26  ;;  %v4216_v54 = vld [vmem:[#allocation10] sm:$0xff]   ;;  %v4217_v55 = vld [vmem:[#allocation10 + $0x8] sm:$0xff]   ;;  %s6327_s14 = sld [smem:[#allocation34_spill]] }
 0x1c0   : > { %3636 = vmatprep.subr.bf16.mxu0 %v4955_v3  ;;  %3669 = vmatprep.subr.bf16.mxu1 %v4955_v3  ;;  %v4218_v56 = vld [vmem:[#allocation10 + $0x10] sm:$0xff]   ;;  %v4219_v57 = vld [vmem:[#allocation10 + $0x18] sm:$0xff]   ;;  %v4220_v58 = vld [vmem:[#allocation10 + $0x20] sm:$0xff]   ;;  %s715_s1 = scalar_lea.vmem [#allocation23], %s3331_s2  ;;  %s6328_s9 = sld [smem:[#allocation51_spill]] }
 0x1c1   : > { %3638 = vmatprep.mubr.msk.bf16.mxu0 %vm4956_vm0, %v4955_v3  ;;  %3685 = vmatprep.mubr.msk.bf16.mxu1 %vm4956_vm0, %v4955_v3  ;;  %v909_v34 = vsub.s32 0, %v908_v29  ;;  %v5552_v47 = vcvt.s32.f32 %v1144_v46  ;;  %v4221_v59 = vld [vmem:[#allocation10 + $0x28] sm:$0xff]   ;;  %v4222_v60 = vld [vmem:[#allocation10 + $0x30] sm:$0xff]   ;;  %v4223_v61 = vld [vmem:[#allocation10 + $0x38] sm:$0xff]   ;;  %s3060_s24 = sshll.u32 %s715_s1, 4  ;;  %s3045_s23 = scalar_lea.sflag [#allocation4], %s5481_s13  ;;  %s6180_s24 = int_to_ptr.vmem [resolvable:$true] %s3060_s24 }
 0x1c2   : > { %v4224_v62 = vld [vmem:[%s5496_s7] sm:$0xff]   ;;  %s4825_s3 = scalar_lea.vmem %s6180_s24, 128  ;;  %p6329_p7 = scmp.ne.s32.totalorder %s6294_s16, 0 }
 0x1c3   : > { %744 = vperm.xlu0 %4214, %v723_v2   ;;  %759 = vperm.xlu1 %4215, %v723_v2   ;;  %v5635_v46 = vld [vmem:[#allocation14 + $0x38] sm:$0xff]   ;;  %p4826_p4 = scmp.ne.s32.totalorder %s6180_s24, %s4825_s3  ;;  %s4959_s4 = smov [#allocation23]  }
 0x1c4   : > { %s4829_s17 = sshll.u32 %s4959_s4, 4  ;;  %s4830_s17 = int_to_ptr.vmem [resolvable:$false] %s4829_s17 }
 0x1c5   : > { %s3458_s12 = sshll.u32 %s6327_s14, 7  ;;  %p4827_p6 = pnand %p4826_p4, %p6329_p7 }
 0x1c6   : > { %s6178_s11 = scalar_lea.hbm %s6328_s9, %s3458_s12  ;;  %s4831_s22 = scalar_lea.vmem %s4830_s17, 256 }
 0x1c7   : > { %p4828_p13 = pneg %p4827_p6  ;;  %p4832_p2 = scmp.lt.s32.totalorder %s6180_s24, %s4830_s17 }
 0x1c8   : > { %p4833_p8 = scmp.lt.s32.totalorder %s4831_s22, %s4825_s3 }
 0x1ca   : > { %p4834_p12 = por %p4833_p8, %p4832_p2 }
 0x1cc   : > { %p4835_p5 = pnand %p4834_p12, %p4828_p13 }
 0x23e   : > { %v740_v5 = vpop.permute.xlu0 %739  ;;  %v755_v6 = vpop.permute.xlu1 %754 }
 0x23f   : > { %v762_v7 = vadd.f32 %v755_v6, %v735_v4  ;;  %v747_v12 = vadd.f32 %v740_v5, %v735_v4  ;;  %v4225_v6 = vld [vmem:[#allocation11] sm:$0xff]  }
 0x240   : > { %3670 = vmatpush3.bf16.msra.mxu1 %v4225_v6 }
 0x241   : > { %v814_v9 = vmul.f32 %v762_v7, %v762_v7  ;;  %v822_v22 = vmul.f32 %v747_v12, %v747_v12  ;;  %3671 = vmatprep.subr.bf16.mxu1 %v4955_v3 }
 0x242   : > { %v745_v10 = vpop.permute.xlu0 %744  ;;  %v760_v11 = vpop.permute.xlu1 %759 }
 0x243   : > { %v748_v13 = vadd.f32 %v745_v10, %v736_v8  ;;  %v763_v14 = vadd.f32 %v760_v11, %v736_v8  ;;  %v816_v15 = vsel %vm766_vm1, %v814_v9, 0.0  ;;  %v4227_v8 = vld [vmem:[#allocation11 + $0x10] sm:$0xff]   ;;  %v4228_v9 = vld [vmem:[#allocation11 + $0x18] sm:$0xff]   ;;  %v4229_v10 = vld [vmem:[#allocation11 + $0x20] sm:$0xff]  }
 0x244   : > { %817 = vadd.xlane.f32.xlu0 %v816_v15  ;;  %v4230_v11 = vld [vmem:[#allocation11 + $0x28] sm:$0xff]  }
 0x245   : > { %v765_v16 = vpack.c.bf16 %v748_v13, %v747_v12  ;;  %v815_v17 = vmul.f32 %v763_v14, %v763_v14  ;;  %v823_v21 = vmul.f32 %v748_v13, %v748_v13  ;;  %v764_v23 = vpack.c.bf16 %v763_v14, %v762_v7  ;;  %v4226_v7 = vld [vmem:[#allocation11 + $0x8] sm:$0xff]   ;;  %v4231_v12 = vld [vmem:[#allocation11 + $0x30] sm:$0xff]  }
 0x246   : > { %3672 = vmatpush3.bf16.msra.mxu1 %v4226_v7 }
 0x247   : > { %v771_v18 = vsel %vm766_vm1, %v765_v16, 0  ;;  %v819_v19 = vsel %vm766_vm1, %v815_v17, 0.0  ;;  %v4032_v24 = vpack.c.bf16 %v823_v21, %v822_v22  ;;  %3673 = vmatprep.subr.bf16.mxu1 %v4955_v3  ;;  %v4232_v21 = vld [vmem:[#allocation11 + $0x38] sm:$0xff]  }
 0x248   : > { %3637 = vmatpush3.bf16.xpose.msra.mxu0 %v771_v18  ;;  %820 = vadd.xlane.f32.xlu1 %v819_v19 }
 0x249   : > { %4031 = vmatprep.subr.bf16.mxu0 %v4957_v20 }
 0x24a   : > { %3674 = vmatpush3.bf16.msra.mxu1 %v4227_v8 }
 0x24b   : > { %3675 = vmatprep.subr.bf16.mxu1 %v4955_v3 }
 0x24e   : > { %3676 = vmatpush3.bf16.msra.mxu1 %v4228_v9 }
 0x24f   : > { %3639 = vmatmul.mubr.msk.bf16.vlgmr.msra.gmra.mrb[0].mxu0 %vm766_vm1, %v764_v23  ;;  %3677 = vmatprep.subr.bf16.mxu1 %v4955_v3 }
 0x250   : > { %4034 = vmatpush3.bf16.xpose.msk.msra.mxu0 %vm4033_vm2, %v4032_v24  ;;  %3646 = vmatprep.mubr.msk.f32.mxu0 %vm4956_vm0, %v4955_v3 }
 0x251   : > { %3649 = vmatprep.subr.bf16.mxu0 %v4955_v3 }
 0x252   : > { %3678 = vmatpush3.bf16.msra.mxu1 %v4229_v10 }
 0x253   : > { %3679 = vmatprep.subr.bf16.mxu1 %v4955_v3 }
 0x256   : > { %3680 = vmatpush3.bf16.msra.mxu1 %v4230_v11 }
 0x257   : > { %3647 = vmatmul.mubr.msk.f32.vlgmr.msra.gmra.mrb[4].mxu0 %vm766_vm1, %v4958_v25  ;;  %3681 = vmatprep.subr.bf16.mxu1 %v4955_v3  ;;  %v4233_v25 = vld [vmem:[%s5496_s7] sm:$0xff]  }
 0x258   : > { %3665 = vmatprep.mubr.msk.bf16.mxu0 %vm4956_vm0, %v4955_v3  ;;  %3650 = vmatpush3.bf16.msra.mxu0 %v4216_v54  ;;  %v3357_v54 = vld [vmem:[#allocation13] ss:$0 sm:$0xff] }
 0x259   : > { %3651 = vmatprep.subr.bf16.mxu0 %v4955_v3 }
 0x25a   : > { %3682 = vmatpush3.bf16.msra.mxu1 %v4231_v12 }
 0x25b   : > { %3683 = vmatprep.subr.bf16.mxu1 %v4955_v3 }
 0x25c   : > { %3652 = vmatpush3.bf16.msra.mxu0 %v4217_v55 }
 0x25d   : > { %3653 = vmatprep.subr.bf16.mxu0 %v4955_v3 }
 0x25e   : > { %3684 = vmatpush3.bf16.msra.mxu1 %v4232_v21 }
 0x25f   : > { %3695 = vmatprep.subr.bf16.mxu1 %v4955_v3 }
 0x260   : > { %3654 = vmatpush3.bf16.msra.mxu0 %v4218_v56 }
 0x261   : > { %3655 = vmatprep.subr.bf16.mxu0 %v4955_v3  ;;  %3686 = vmatmul.mubr.bf16.vlgmr.msra.gmra.mrb[0].mxu1 %v4233_v25 }
 0x262   : > { %3711 = vmatprep.mubr.msk.bf16.mxu1 %vm4956_vm0, %v4955_v3 }
 0x264   : > { %3656 = vmatpush3.bf16.msra.mxu0 %v4219_v57 }
 0x265   : > { %3657 = vmatprep.subr.bf16.mxu0 %v4955_v3 }
 0x268   : > { %3658 = vmatpush3.bf16.msra.mxu0 %v4220_v58 }
 0x269   : > { %3659 = vmatprep.subr.bf16.mxu0 %v4955_v3 }
 0x26c   : > { %3660 = vmatpush3.bf16.msra.mxu0 %v4221_v59 }
 0x26d   : > { %3661 = vmatprep.subr.bf16.mxu0 %v4955_v3 }
 0x270   : > { %3662 = vmatpush3.bf16.msra.mxu0 %v4222_v60 }
 0x271   : > { %3663 = vmatprep.subr.bf16.mxu0 %v4955_v3 }
 0x274   : > { %3664 = vmatpush3.bf16.msra.mxu0 %v4223_v61 }
 0x275   : > { %3689 = vmatprep.subr.bf16.mxu0 %v4955_v3 }
 0x277   : > { %3666 = vmatmul.mubr.bf16.vlgmr.msra.gmra.mrb[8].mxu0 %v4224_v62 }
 0x278   : > { %3691 = vmatprep.mubr.msk.bf16.mxu0 %vm4956_vm0, %v4955_v3 }
 0x2d1   : > { %v818_v35 = vpop.xlane.xlu0 %817 }
 0x2d5   : > { %v821_v36 = vpop.xlane.xlu1 %820 }
 0x322   : > { %v807_v27 = vpop.f32.mrb[0].mxu0 }
 0x323   : > { %v3640_v28 = vpop.f32.mrb[1].mxu0  ;;  %v903_v32 = vmul.f32 2.0, %v807_v27 }
 0x324   : > { %v810_v30 = vpop.f32.mrb[2].mxu0 }
 0x325   : > { %v3641_v31 = vpop.f32.mrb[3].mxu0  ;;  %v904_v33 = vmul.f32 2.0, %v810_v30  ;;  %v905_v38 = vsub.f32 %v903_v32, %v818_v35 }
 0x327   : > { %v906_v39 = vsub.f32 %v904_v33, %v821_v36 }
 0x32a   : > { %v899_v37 = vpop.f32.mrb[4].mxu0 }
 0x32b   : > { %v910_v40 = vrot.slane %v899_v37, %v909_v34  ;;  %v3648_v41 = vpop.f32.mrb[5].mxu0 }
 0x32c   : > { %v5615_v41 = vld [vmem:[#allocation14 + $0x10] sm:$0xff]  }
 0x32d   : > { %v911_v42 = vsub.f32 %v905_v38, %v910_v40  ;;  %v912_v43 = vsub.f32 %v906_v39, %v910_v40  ;;  %v5607_v39 = vld [vmem:[#allocation14] sm:$0xff]   ;;  %v5611_v40 = vld [vmem:[#allocation14 + $0x8] sm:$0xff]  }
 0x32e   : > { %3696 = vmatpush3.bf16.msra.mxu1 %v5607_v39 }
 0x32f   : > { %v1147_v44 = vsel %vm1146_vm3, %v911_v42, -inf  ;;  %v1150_v45 = vsel %vm1146_vm3, %v912_v43, -inf  ;;  %3697 = vmatprep.subr.bf16.mxu1 %v4955_v3 }
 0x330   : > { %1148 = vmax.xlane.f32.xlu0 %v1147_v44  ;;  %v5627_v44 = vld [vmem:[#allocation14 + $0x28] sm:$0xff]  }
 0x332   : > { %3698 = vmatpush3.bf16.msra.mxu1 %v5611_v40 }
 0x333   : > { %3699 = vmatprep.subr.bf16.mxu1 %v4955_v3 }
 0x334   : > { %1151 = vmax.xlane.f32.xlu0 %v1150_v45  ;;  %v1136_v35 = vpop.f32.mrb[0].mxu1  ;;  %v5631_v45 = vld [vmem:[#allocation14 + $0x30] sm:$0xff]  }
 0x335   : > { %v3687_v36 = vpop.f32.mrb[1].mxu1  ;;  %v5645_v55 = vadd.f32 %v3357_v54, %v1136_v35  ;;  %v5684_v35 = vld [vmem:[#allocation17 + $0x10] sm:$0xff]  }
 0x336   : > { %v1139_v37 = vpop.f32.mrb[2].mxu1  ;;  %3700 = vmatpush3.bf16.msra.mxu1 %v5615_v41  ;;  %v5690_v36 = vld [vmem:[#allocation17 + $0x18] sm:$0xff]  }
 0x337   : > { %v3688_v38 = vpop.f32.mrb[3].mxu1  ;;  %3701 = vmatprep.subr.bf16.mxu1 %v4955_v3  ;;  %v5647_v56 = vadd.f32 %v3357_v54, %v1139_v37  ;;  %v5696_v37 = vld [vmem:[#allocation17 + $0x20] sm:$0xff]  }
 0x338   : > { %v5702_v38 = vld [vmem:[#allocation17 + $0x28] sm:$0xff]  }
 0x34a   : > { %v1017_v19 = vpop.f32.mrb[8].mxu0 }
 0x34b   : > { %v3667_v20 = vpop.f32.mrb[9].mxu0 }
 0x34c   : > { %v1020_v22 = vpop.f32.mrb[10].mxu0 }
 0x34d   : > { %v5584_v23 = vpack.c.bf16 %v1020_v22, %v1017_v19  ;;  %v3668_v24 = vpop.f32.mrb[11].mxu0 }
 0x34f   : > { %3690 = vmatpush3.bf16.msra.mxu0 %v5584_v23 }
 0x350   : > { %3715 = vmatprep.subr.bf16.mxu0 %v4955_v3 }
 0x3bd   : > { %v1149_v48 = vpop.xlane.xlu0 %1148 }
 0x3be   : > { %vm1153_vm4 = vcmp.eq.f32.partialorder %v911_v42, %v1149_v48 }
 0x3bf   : > { %v1155_v49 = vsel %vm1153_vm4, %v5552_v47, 16.0 }
 0x3c0   : > { %v1157_v50 = vsel %vm1146_vm3, %v1155_v49, inf }
 0x3c1   : > { %1158 = vmin.xlane.f32.xlu1 %v1157_v50  ;;  %v1152_v51 = vpop.xlane.xlu0 %1151 }
 0x3c2   : > { %vm1154_vm5 = vcmp.eq.f32.partialorder %v912_v43, %v1152_v51 }
 0x3c3   : > { %v1156_v52 = vsel %vm1154_vm5, %v5552_v47, 16.0 }
 0x3c4   : > { %v1160_v53 = vsel %vm1146_vm3, %v1156_v52, inf }
 0x3c5   : > { %1161 = vmin.xlane.f32.xlu0 %v1160_v53 }
 0x44e   : > { %v1159_v63 = vpop.xlane.xlu1 %1158 }
 0x44f   : > { %vm1163_vm6 = vcmp.eq.f32.partialorder %v5552_v47, %v1159_v63 }
 0x450   : > { %v1165_v0 = vsel %vm1163_vm6, -3e+38, %v911_v42  ;;  %v5619_v42 = vld [vmem:[#allocation14 + $0x18] sm:$0xff]  }
 0x451   : > { %v1167_v1 = vsel %vm1146_vm3, %v1165_v0, -inf  ;;  %3702 = vmatpush3.bf16.msra.mxu1 %v5619_v42 }
 0x452   : > { %1168 = vmax.xlane.f32.xlu1 %v1167_v1  ;;  %v1162_v2 = vpop.xlane.xlu0 %1161  ;;  %3703 = vmatprep.subr.bf16.mxu1 %v4955_v3 }
 0x453   : > { %vm1164_vm7 = vcmp.eq.f32.partialorder %v5552_v47, %v1162_v2 }
 0x454   : > { %v1166_v4 = vsel %vm1164_vm7, -3e+38, %v912_v43  ;;  %v5623_v43 = vld [vmem:[#allocation14 + $0x20] sm:$0xff]  }
 0x455   : > { %v1170_v5 = vsel %vm1146_vm3, %v1166_v4, -inf  ;;  %3704 = vmatpush3.bf16.msra.mxu1 %v5623_v43 }
 0x456   : > { %1171 = vmax.xlane.f32.xlu0 %v1170_v5  ;;  %3705 = vmatprep.subr.bf16.mxu1 %v4955_v3 }
 0x459   : > { %3706 = vmatpush3.bf16.msra.mxu1 %v5627_v44 }
 0x45a   : > { %3707 = vmatprep.subr.bf16.mxu1 %v4955_v3 }
 0x45d   : > { %3708 = vmatpush3.bf16.msra.mxu1 %v5631_v45 }
 0x45e   : > { %3709 = vmatprep.subr.bf16.mxu1 %v4955_v3 }
 0x461   : > { %3710 = vmatpush3.bf16.msra.mxu1 %v5635_v46 }
 0x462   : > { %3735 = vmatprep.subr.bf16.mxu1 %v4955_v3 }
 0x4df   : > { %v1169_v13 = vpop.xlane.xlu1 %1168 }
 0x4e0   : > { %vm1173_vm8 = vcmp.eq.f32.partialorder %v1165_v0, %v1169_v13 }
 0x4e1   : > { %v1175_v14 = vsel %vm1173_vm8, %v5552_v47, 16.0 }
 0x4e2   : > { %v1177_v15 = vsel %vm1146_vm3, %v1175_v14, inf }
 0x4e3   : > { %1178 = vmin.xlane.f32.xlu1 %v1177_v15  ;;  %v1172_v16 = vpop.xlane.xlu0 %1171 }
 0x4e4   : > { %vm1174_vm9 = vcmp.eq.f32.partialorder %v1166_v4, %v1172_v16 }
 0x4e5   : > { %v1176_v17 = vsel %vm1174_vm9, %v5552_v47, 16.0 }
 0x4e6   : > { %v1180_v18 = vsel %vm1146_vm3, %v1176_v17, inf }
 0x4e7   : > { %1181 = vmin.xlane.f32.xlu0 %v1180_v18 }
 0x570   : > { %v1179_v26 = vpop.xlane.xlu1 %1178 }
 0x571   : > { %vm1183_vm10 = vcmp.eq.f32.partialorder %v5552_v47, %v1179_v26 }
 0x572   : > { %v5593_v27 = vsel %vm1183_vm10, -3e+38, %v1165_v0  ;;  %v1187_v30 = vsel %vm1183_vm10, 1.0, %v4955_v3 }
 0x573   : > { %v1534_v28 = vsel %vm1146_vm3, %v5593_v27, -inf }
 0x574   : > { %1535 = vmax.xlane.f32.xlu1 %v1534_v28  ;;  %v1182_v29 = vpop.xlane.xlu0 %1181 }
 0x575   : > { %vm1184_vm11 = vcmp.eq.f32.partialorder %v5552_v47, %v1182_v29 }
 0x576   : > { %v5599_v31 = vsel %vm1184_vm11, -3e+38, %v1166_v4  ;;  %v1188_v32 = vsel %vm1184_vm11, 1.0, %v4955_v3 }
 0x577   : > { %v1189_v33 = vpack.c.bf16 %v1188_v32, %v1187_v30  ;;  %v1537_v34 = vsel %vm1146_vm3, %v5599_v31, -inf }
 0x578   : > { %1538 = vmax.xlane.f32.xlu0 %v1537_v34 }
 0x579   : > { %3692 = vmatmul.mubr.msk.bf16.vlgmr.msra.gmra.mrb[12].mxu0 %vm1146_vm3, %v1189_v33 }
 0x57a   : > { %3731 = vmatprep.mubr.msk.bf16.mxu0 %vm4956_vm0, %v4955_v3 }
 0x601   : > { %v1536_v48 = vpop.xlane.xlu1 %1535 }
 0x602   : > { %vm1540_vm12 = vcmp.eq.f32.partialorder %v5593_v27, %v1536_v48  ;;  %v5708_v48 = vld [vmem:[#allocation17 + $0x30] sm:$0xff]  }
 0x603   : > { %v1542_v49 = vsel %vm1540_vm12, %v5552_v47, 16.0 }
 0x604   : > { %v1544_v50 = vsel %vm1146_vm3, %v1542_v49, inf  ;;  %v5714_v49 = vld [vmem:[#allocation17 + $0x38] sm:$0xff]  }
 0x605   : > { %1545 = vmin.xlane.f32.xlu1 %v1544_v50  ;;  %v1539_v51 = vpop.xlane.xlu0 %1538 }
 0x606   : > { %vm1541_vm13 = vcmp.eq.f32.partialorder %v5599_v31, %v1539_v51 }
 0x607   : > { %v1543_v52 = vsel %vm1541_vm13, %v5552_v47, 16.0 }
 0x608   : > { %v1547_v53 = vsel %vm1146_vm3, %v1543_v52, inf }
 0x609   : > { %1548 = vmin.xlane.f32.xlu0 %v1547_v53 }
 0x64c   : > { %v1227_v57 = vpop.f32.mrb[12].mxu0 }
 0x64d   : > { %v1228_v58 = vadd.f32 %v1227_v57, %v5645_v55  ;;  %v3693_v59 = vpop.f32.mrb[13].mxu0 }
 0x64e   : > { %v1230_v60 = vpop.f32.mrb[14].mxu0 }
 0x64f   : > { %v1234_v61 = vmin.f32 %v1228_v58, 20.0  ;;  %v1231_v62 = vadd.f32 %v1230_v60, %v5647_v56  ;;  %v3694_v63 = vpop.f32.mrb[15].mxu0  ;;  %vm1252_vm14 = vcmp.gt.f32.partialorder %v1228_v58, 20.0 }
 0x651   : > { %v1236_v0 = vmul.f32 1.442695, %v1234_v61  ;;  %v1235_v1 = vmin.f32 %v1231_v62, 20.0  ;;  %vm1253_vm15 = vcmp.gt.f32.partialorder %v1231_v62, 20.0 }
 0x653   : > { %4258 = vpow2.f32 %v1236_v0  ;;  %v1238_v2 = vmul.f32 1.442695, %v1235_v1 }
 0x655   : > { %4260 = vpow2.f32 %v1238_v2 }
 0x65d   : > { %v4259_v4 = vpop.eup %4258 }
 0x65e   : > { %v1240_v5 = vadd.f32 1.0, %v4259_v4 }
 0x65f   : > { %v4261_v6 = vpop.eup %4260 }
 0x660   : > { %v1242_v7 = vmul.f32 %v1240_v5, %v1240_v5  ;;  %v1241_v8 = vadd.f32 1.0, %v4261_v6 }
 0x662   : > { %v1246_v9 = vadd.f32 1.0, %v1242_v7  ;;  %v1243_v10 = vmul.f32 %v1241_v8, %v1241_v8  ;;  %v3368_v12 = vadd.f32 -1.0, %v1242_v7 }
 0x664   : > { %4262 = vrcp.f32 %v1246_v9  ;;  %v1247_v11 = vadd.f32 1.0, %v1243_v10  ;;  %v3369_v15 = vadd.f32 -1.0, %v1243_v10 }
 0x666   : > { %4264 = vrcp.f32 %v1247_v11 }
 0x66e   : > { %v4263_v13 = vpop.eup %4262 }
 0x66f   : > { %v1250_v14 = vmul.f32 %v4263_v13, %v3368_v12 }
 0x670   : > { %v4265_v16 = vpop.eup %4264 }
 0x671   : > { %v1254_v17 = vmul.f32 %v1250_v14, %v1228_v58  ;;  %v1251_v18 = vmul.f32 %v4265_v16, %v3369_v15 }
 0x673   : > { %v1255_v19 = vmul.f32 %v1251_v18, %v1231_v62  ;;  %v1256_v20 = vsel %vm1252_vm14, %v1228_v58, %v1254_v17  ;;  %v5726_v58 = vld [vmem:[#allocation16] ss:$0 sm:$0xff] }
 0x675   : > { %v1257_v21 = vsel %vm1253_vm15, %v1231_v62, %v1255_v19 }
 0x676   : > { %v1258_v22 = vpack.c.bf16 %v1257_v21, %v1256_v20 }
 0x678   : > { %3712 = vmatmul.mubr.bf16.vlgmr.msra.gmra.mrb[4].mxu1 %v1258_v22 }
 0x679   : > { %3736 = vmatpush3.bf16.msra.mxu1 %v5584_v23  ;;  %3737 = vmatprep.mubr.msk.bf16.mxu1 %vm4956_vm0, %v4955_v3 }
 0x67a   : > { %3761 = vmatprep.subr.bf16.mxu1 %v4955_v3 }
 0x692   : > { %v1546_v24 = vpop.xlane.xlu1 %1545 }
 0x693   : > { %vm1550_vm1 = vcmp.eq.f32.partialorder %v5552_v47, %v1546_v24 }
 0x694   : > { %v5657_v25 = vsel %vm1550_vm1, -3e+38, %v5593_v27  ;;  %v1554_v29 = vsel %vm1550_vm1, 1.0, %v4955_v3  ;;  %v5672_v27 = vld [vmem:[#allocation17] sm:$0xff]  }
 0x695   : > { %v1759_v26 = vsel %vm1146_vm3, %v5657_v25, -inf  ;;  %3716 = vmatpush3.bf16.msra.mxu0 %v5672_v27 }
 0x696   : > { %1760 = vmax.xlane.f32.xlu1 %v1759_v26  ;;  %v1549_v28 = vpop.xlane.xlu0 %1548  ;;  %3717 = vmatprep.subr.bf16.mxu0 %v4955_v3 }
 0x697   : > { %vm1551_vm2 = vcmp.eq.f32.partialorder %v5552_v47, %v1549_v28 }
 0x698   : > { %v5664_v30 = vsel %vm1551_vm2, -3e+38, %v5599_v31  ;;  %v1555_v32 = vsel %vm1551_vm2, 1.0, %v4955_v3  ;;  %v5678_v31 = vld [vmem:[#allocation17 + $0x8] sm:$0xff]  }
 0x699   : > { %v1556_v33 = vpack.c.bf16 %v1555_v32, %v1554_v29  ;;  %v1762_v34 = vsel %vm1146_vm3, %v5664_v30, -inf  ;;  %3718 = vmatpush3.bf16.msra.mxu0 %v5678_v31 }
 0x69a   : > { %1763 = vmax.xlane.f32.xlu0 %v1762_v34  ;;  %3719 = vmatprep.subr.bf16.mxu0 %v4955_v3 }
 0x69b   : > { %3738 = vmatmul.mubr.msk.bf16.vlgmr.msra.gmra.mrb[8].mxu1 %vm1146_vm3, %v1556_v33 }
 0x69c   : > { %3777 = vmatprep.mubr.msk.bf16.mxu1 %vm4956_vm0, %v4955_v3  ;;  %3762 = vmatpush3.bf16.msra.mxu1 %v5672_v27 }
 0x69d   : > { %3763 = vmatprep.subr.bf16.mxu1 %v4955_v3  ;;  %3720 = vmatpush3.bf16.msra.mxu0 %v5684_v35 }
 0x69e   : > { %3721 = vmatprep.subr.bf16.mxu0 %v4955_v3 }
 0x6a0   : > { %3764 = vmatpush3.bf16.msra.mxu1 %v5678_v31 }
 0x6a1   : > { %3765 = vmatprep.subr.bf16.mxu1 %v4955_v3  ;;  %3722 = vmatpush3.bf16.msra.mxu0 %v5690_v36 }
 0x6a2   : > { %3723 = vmatprep.subr.bf16.mxu0 %v4955_v3 }
 0x6a4   : > { %3766 = vmatpush3.bf16.msra.mxu1 %v5684_v35 }
 0x6a5   : > { %3767 = vmatprep.subr.bf16.mxu1 %v4955_v3  ;;  %3724 = vmatpush3.bf16.msra.mxu0 %v5696_v37 }
 0x6a6   : > { %3725 = vmatprep.subr.bf16.mxu0 %v4955_v3 }
 0x6a8   : > { %3768 = vmatpush3.bf16.msra.mxu1 %v5690_v36 }
 0x6a9   : > { %3769 = vmatprep.subr.bf16.mxu1 %v4955_v3  ;;  %3726 = vmatpush3.bf16.msra.mxu0 %v5702_v38 }
 0x6aa   : > { %3727 = vmatprep.subr.bf16.mxu0 %v4955_v3 }
 0x6ac   : > { %3770 = vmatpush3.bf16.msra.mxu1 %v5696_v37 }
 0x6ad   : > { %3771 = vmatprep.subr.bf16.mxu1 %v4955_v3  ;;  %3728 = vmatpush3.bf16.msra.mxu0 %v5708_v48 }
 0x6ae   : > { %3729 = vmatprep.subr.bf16.mxu0 %v4955_v3 }
 0x6b0   : > { %3772 = vmatpush3.bf16.msra.mxu1 %v5702_v38 }
 0x6b1   : > { %3773 = vmatprep.subr.bf16.mxu1 %v4955_v3  ;;  %3730 = vmatpush3.bf16.msra.mxu0 %v5714_v49 }
 0x6b2   : > { %3741 = vmatprep.subr.bf16.mxu0 %v4955_v3 }
 0x6b4   : > { %3774 = vmatpush3.bf16.msra.mxu1 %v5708_v48 }
 0x6b5   : > { %3775 = vmatprep.subr.bf16.mxu1 %v4955_v3 }
 0x6b8   : > { %3776 = vmatpush3.bf16.msra.mxu1 %v5714_v49 }
 0x6b9   : > { %3787 = vmatprep.subr.bf16.mxu1 %v4955_v3 }
 0x723   : > { %v1761_v50 = vpop.xlane.xlu1 %1760 }
 0x724   : > { %vm1765_vm4 = vcmp.eq.f32.partialorder %v5657_v25, %v1761_v50 }
 0x725   : > { %v1767_v51 = vsel %vm1765_vm4, %v5552_v47, 16.0 }
 0x726   : > { %v1769_v52 = vsel %vm1146_vm3, %v1767_v51, inf }
 0x727   : > { %1770 = vmin.xlane.f32.xlu1 %v1769_v52  ;;  %v1764_v53 = vpop.xlane.xlu0 %1763 }
 0x728   : > { %vm1766_vm5 = vcmp.eq.f32.partialorder %v5664_v30, %v1764_v53 }
 0x729   : > { %v1768_v54 = vsel %vm1766_vm5, %v5552_v47, 16.0 }
 0x72a   : > { %v1772_v57 = vsel %vm1146_vm3, %v1768_v54, inf }
 0x72b   : > { %1773 = vmin.xlane.f32.xlu0 %v1772_v57 }
 0x74b   : > { %v1364_v59 = vpop.f32.mrb[4].mxu1 }
 0x74c   : > { %v1365_v60 = vadd.f32 %v5726_v58, %v1364_v59  ;;  %v3713_v61 = vpop.f32.mrb[5].mxu1 }
 0x74d   : > { %v1367_v62 = vpop.f32.mrb[6].mxu1 }
 0x74e   : > { %v1371_v63 = vmin.f32 %v1365_v60, 20.0  ;;  %v1368_v0 = vadd.f32 %v5726_v58, %v1367_v62  ;;  %v3714_v1 = vpop.f32.mrb[7].mxu1  ;;  %vm1389_vm6 = vcmp.gt.f32.partialorder %v1365_v60, 20.0 }
 0x750   : > { %v1373_v2 = vmul.f32 1.442695, %v1371_v63  ;;  %v1372_v4 = vmin.f32 %v1368_v0, 20.0  ;;  %vm1390_vm7 = vcmp.gt.f32.partialorder %v1368_v0, 20.0 }
 0x752   : > { %4266 = vpow2.f32 %v1373_v2  ;;  %v1375_v5 = vmul.f32 1.442695, %v1372_v4 }
 0x754   : > { %4268 = vpow2.f32 %v1375_v5 }
 0x75c   : > { %v4267_v6 = vpop.eup %4266 }
 0x75d   : > { %v1377_v7 = vadd.f32 1.0, %v4267_v6 }
 0x75e   : > { %v4269_v8 = vpop.eup %4268 }
 0x75f   : > { %v1379_v9 = vmul.f32 %v1377_v7, %v1377_v7  ;;  %v1378_v10 = vadd.f32 1.0, %v4269_v8 }
 0x761   : > { %v1383_v11 = vadd.f32 1.0, %v1379_v9  ;;  %v1380_v12 = vmul.f32 %v1378_v10, %v1378_v10  ;;  %v3379_v14 = vadd.f32 -1.0, %v1379_v9 }
 0x763   : > { %4270 = vrcp.f32 %v1383_v11  ;;  %v1384_v13 = vadd.f32 1.0, %v1380_v12  ;;  %v3380_v17 = vadd.f32 -1.0, %v1380_v12 }
 0x765   : > { %4272 = vrcp.f32 %v1384_v13 }
 0x76d   : > { %v4271_v15 = vpop.eup %4270 }
 0x76e   : > { %v1387_v16 = vmul.f32 %v4271_v15, %v3379_v14  ;;  %v1594_v18 = vpop.f32.mrb[8].mxu1 }
 0x76f   : > { %v4273_v19 = vpop.eup %4272  ;;  %v1595_v20 = vadd.f32 %v1594_v18, %v5645_v55  ;;  %v3739_v21 = vpop.f32.mrb[9].mxu1 }
 0x770   : > { %v1391_v22 = vmul.f32 %v1387_v16, %v1365_v60  ;;  %v1388_v24 = vmul.f32 %v4273_v19, %v3380_v17  ;;  %v1597_v26 = vpop.f32.mrb[10].mxu1 }
 0x771   : > { %v1601_v28 = vmin.f32 %v1595_v20, 20.0  ;;  %v1598_v29 = vadd.f32 %v1597_v26, %v5647_v56  ;;  %v3740_v32 = vpop.f32.mrb[11].mxu1  ;;  %vm1619_vm8 = vcmp.gt.f32.partialorder %v1595_v20, 20.0 }
 0x772   : > { %v1392_v33 = vmul.f32 %v1388_v24, %v1368_v0  ;;  %v1393_v51 = vsel %vm1389_vm6, %v1365_v60, %v1391_v22 }
 0x773   : > { %v1603_v34 = vmul.f32 1.442695, %v1601_v28  ;;  %v1602_v50 = vmin.f32 %v1598_v29, 20.0  ;;  %vm1620_vm9 = vcmp.gt.f32.partialorder %v1598_v29, 20.0 }
 0x774   : > { %v1394_v52 = vsel %vm1390_vm7, %v1368_v0, %v1392_v33 }
 0x775   : > { %4274 = vpow2.f32 %v1603_v34  ;;  %v1605_v53 = vmul.f32 1.442695, %v1602_v50  ;;  %v1395_v54 = vpack.c.bf16 %v1394_v52, %v1393_v51 }
 0x777   : > { %4276 = vpow2.f32 %v1605_v53  ;;  %3732 = vmatmul.mubr.bf16.vlgmr.msra.gmra.mrb[16].mxu0 %v1395_v54 }
 0x778   : > { %3742 = vmatpush3.bf16.msra.mxu0 %v5607_v39  ;;  %3757 = vmatprep.mubr.msk.bf16.mxu0 %vm4956_vm0, %v4955_v3 }
 0x779   : > { %3743 = vmatprep.subr.bf16.mxu0 %v4955_v3 }
 0x77c   : > { %3744 = vmatpush3.bf16.msra.mxu0 %v5611_v40 }
 0x77d   : > { %3745 = vmatprep.subr.bf16.mxu0 %v4955_v3 }
 0x77f   : > { %v4275_v57 = vpop.eup %4274 }
 0x780   : > { %v1607_v59 = vadd.f32 1.0, %v4275_v57  ;;  %3746 = vmatpush3.bf16.msra.mxu0 %v5615_v41 }
 0x781   : > { %v4277_v60 = vpop.eup %4276  ;;  %3747 = vmatprep.subr.bf16.mxu0 %v4955_v3 }
 0x782   : > { %v1609_v61 = vmul.f32 %v1607_v59, %v1607_v59  ;;  %v1608_v62 = vadd.f32 1.0, %v4277_v60 }
 0x784   : > { %v1613_v63 = vadd.f32 1.0, %v1609_v61  ;;  %v1610_v0 = vmul.f32 %v1608_v62, %v1608_v62  ;;  %3748 = vmatpush3.bf16.msra.mxu0 %v5619_v42  ;;  %v3393_v2 = vadd.f32 -1.0, %v1609_v61 }
 0x785   : > { %3749 = vmatprep.subr.bf16.mxu0 %v4955_v3 }
 0x786   : > { %4278 = vrcp.f32 %v1613_v63  ;;  %v1614_v1 = vadd.f32 1.0, %v1610_v0  ;;  %v3394_v6 = vadd.f32 -1.0, %v1610_v0 }
 0x788   : > { %4280 = vrcp.f32 %v1614_v1  ;;  %3750 = vmatpush3.bf16.msra.mxu0 %v5623_v43 }
 0x789   : > { %3751 = vmatprep.subr.bf16.mxu0 %v4955_v3 }
 0x78c   : > { %3752 = vmatpush3.bf16.msra.mxu0 %v5627_v44 }
 0x78d   : > { %3753 = vmatprep.subr.bf16.mxu0 %v4955_v3 }
 0x790   : > { %v4279_v4 = vpop.eup %4278  ;;  %3754 = vmatpush3.bf16.msra.mxu0 %v5631_v45 }
 0x791   : > { %v1617_v5 = vmul.f32 %v4279_v4, %v3393_v2  ;;  %3755 = vmatprep.subr.bf16.mxu0 %v4955_v3 }
 0x792   : > { %v4281_v7 = vpop.eup %4280 }
 0x793   : > { %v1621_v8 = vmul.f32 %v1617_v5, %v1595_v20  ;;  %v1618_v9 = vmul.f32 %v4281_v7, %v3394_v6 }
 0x794   : > { %3756 = vmatpush3.bf16.msra.mxu0 %v5635_v46 }
 0x795   : > { %v1622_v10 = vmul.f32 %v1618_v9, %v1598_v29  ;;  %3781 = vmatprep.subr.bf16.mxu0 %v4955_v3  ;;  %v1623_v11 = vsel %vm1619_vm8, %v1595_v20, %v1621_v8 }
 0x797   : > { %v1624_v12 = vsel %vm1620_vm9, %v1598_v29, %v1622_v10 }
 0x798   : > { %v1625_v13 = vpack.c.bf16 %v1624_v12, %v1623_v11 }
 0x79a   : > { %3758 = vmatmul.mubr.bf16.vlgmr.msra.gmra.mrb[20].mxu0 %v1625_v13 }
 0x79b   : > { %3782 = vmatpush3.bf16.msra.mxu0 %v5584_v23  ;;  %3783 = vmatprep.mubr.msk.bf16.mxu0 %vm4956_vm0, %v4955_v3 }
 0x79c   : > { %3807 = vmatprep.subr.bf16.mxu0 %v4955_v3 }
 0x7b4   : > { %v1771_v14 = vpop.xlane.xlu1 %1770 }
 0x7b5   : > { %vm1775_vm10 = vcmp.eq.f32.partialorder %v5552_v47, %v1771_v14 }
 0x7b6   : > { %v5756_v15 = vsel %vm1775_vm10, -3e+38, %v5657_v25  ;;  %v1779_v18 = vsel %vm1775_vm10, 1.0, %v4955_v3 }
 0x7b7   : > { %v1984_v16 = vsel %vm1146_vm3, %v5756_v15, -inf }
 0x7b8   : > { %1985 = vmax.xlane.f32.xlu1 %v1984_v16  ;;  %v1774_v17 = vpop.xlane.xlu0 %1773 }
 0x7b9   : > { %vm1776_vm11 = vcmp.eq.f32.partialorder %v5552_v47, %v1774_v17 }
 0x7ba   : > { %v5763_v19 = vsel %vm1776_vm11, -3e+38, %v5664_v30  ;;  %v1780_v20 = vsel %vm1776_vm11, 1.0, %v4955_v3 }
 0x7bb   : > { %v1781_v21 = vpack.c.bf16 %v1780_v20, %v1779_v18  ;;  %v1987_v22 = vsel %vm1146_vm3, %v5763_v19, -inf }
 0x7bc   : > { %1988 = vmax.xlane.f32.xlu0 %v1987_v22 }
 0x7bd   : > { %3784 = vmatmul.mubr.msk.bf16.vlgmr.msra.gmra.mrb[24].mxu0 %vm1146_vm3, %v1781_v21 }
 0x7be   : > { %3808 = vmatpush3.bf16.msra.mxu0 %v5672_v27  ;;  %3823 = vmatprep.mubr.msk.bf16.mxu0 %vm4956_vm0, %v4955_v3 }
 0x7bf   : > { %3809 = vmatprep.subr.bf16.mxu0 %v4955_v3 }
 0x7c2   : > { %3810 = vmatpush3.bf16.msra.mxu0 %v5678_v31 }
 0x7c3   : > { %3811 = vmatprep.subr.bf16.mxu0 %v4955_v3 }
 0x7c6   : > { %3812 = vmatpush3.bf16.msra.mxu0 %v5684_v35 }
 0x7c7   : > { %3813 = vmatprep.subr.bf16.mxu0 %v4955_v3 }
 0x7ca   : > { %3814 = vmatpush3.bf16.msra.mxu0 %v5690_v36 }
 0x7cb   : > { %3815 = vmatprep.subr.bf16.mxu0 %v4955_v3 }
 0x7ce   : > { %3816 = vmatpush3.bf16.msra.mxu0 %v5696_v37 }
 0x7cf   : > { %3817 = vmatprep.subr.bf16.mxu0 %v4955_v3 }
 0x7d2   : > { %3818 = vmatpush3.bf16.msra.mxu0 %v5702_v38 }
 0x7d3   : > { %3819 = vmatprep.subr.bf16.mxu0 %v4955_v3 }
 0x7d6   : > { %3820 = vmatpush3.bf16.msra.mxu0 %v5708_v48 }
 0x7d7   : > { %3821 = vmatprep.subr.bf16.mxu0 %v4955_v3 }
 0x7da   : > { %3822 = vmatpush3.bf16.msra.mxu0 %v5714_v49 }
 0x7db   : > { %3833 = vmatprep.subr.bf16.mxu0 %v4955_v3 }
 0x845   : > { %v1986_v25 = vpop.xlane.xlu1 %1985 }
 0x846   : > { %vm1990_vm12 = vcmp.eq.f32.partialorder %v5756_v15, %v1986_v25 }
 0x847   : > { %v1992_v30 = vsel %vm1990_vm12, %v5552_v47, 16.0 }
 0x848   : > { %v1994_v24 = vsel %vm1146_vm3, %v1992_v30, inf }
 0x849   : > { %1995 = vmin.xlane.f32.xlu1 %v1994_v24  ;;  %v1989_v26 = vpop.xlane.xlu0 %1988 }
 0x84a   : > { %vm1991_vm13 = vcmp.eq.f32.partialorder %v5763_v19, %v1989_v26  ;;  %v5791_v28 = vpop.f32.mrb[16].mxu0 }
 0x84b   : > { %v3733_v29 = vpop.f32.mrb[17].mxu0  ;;  %v1993_v32 = vsel %vm1991_vm13, %v5552_v47, 16.0 }
 0x84c   : > { %v5794_v33 = vpop.f32.mrb[18].mxu0  ;;  %v1997_v34 = vsel %vm1146_vm3, %v1993_v32, inf }
 0x84d   : > { %1998 = vmin.xlane.f32.xlu0 %v1997_v34  ;;  %v3734_v50 = vpop.f32.mrb[19].mxu0 }
 0x86d   : > { %v1660_v51 = vpop.f32.mrb[20].mxu0 }
 0x86e   : > { %v1661_v52 = vadd.f32 %v5726_v58, %v1660_v51  ;;  %v3759_v53 = vpop.f32.mrb[21].mxu0 }
 0x86f   : > { %v1663_v54 = vpop.f32.mrb[22].mxu0 }
 0x870   : > { %v1667_v57 = vmin.f32 %v1661_v52, 20.0  ;;  %v1664_v59 = vadd.f32 %v5726_v58, %v1663_v54  ;;  %v3760_v60 = vpop.f32.mrb[23].mxu0  ;;  %vm1685_vm14 = vcmp.gt.f32.partialorder %v1661_v52, 20.0 }
 0x872   : > { %v1669_v61 = vmul.f32 1.442695, %v1667_v57  ;;  %v1668_v62 = vmin.f32 %v1664_v59, 20.0  ;;  %vm1686_vm15 = vcmp.gt.f32.partialorder %v1664_v59, 20.0 }
 0x874   : > { %4282 = vpow2.f32 %v1669_v61  ;;  %v1671_v63 = vmul.f32 1.442695, %v1668_v62 }
 0x876   : > { %4284 = vpow2.f32 %v1671_v63 }
 0x87e   : > { %v4283_v0 = vpop.eup %4282 }
 0x87f   : > { %v1673_v1 = vadd.f32 1.0, %v4283_v0 }
 0x880   : > { %v4285_v2 = vpop.eup %4284 }
 0x881   : > { %v1675_v4 = vmul.f32 %v1673_v1, %v1673_v1  ;;  %v1674_v5 = vadd.f32 1.0, %v4285_v2 }
 0x883   : > { %v1679_v6 = vadd.f32 1.0, %v1675_v4  ;;  %v1676_v7 = vmul.f32 %v1674_v5, %v1674_v5  ;;  %v3395_v9 = vadd.f32 -1.0, %v1675_v4 }
 0x885   : > { %4286 = vrcp.f32 %v1679_v6  ;;  %v1680_v8 = vadd.f32 1.0, %v1676_v7  ;;  %v3396_v12 = vadd.f32 -1.0, %v1676_v7 }
 0x887   : > { %4288 = vrcp.f32 %v1680_v8 }
 0x88f   : > { %v4287_v10 = vpop.eup %4286 }
 0x890   : > { %v1683_v11 = vmul.f32 %v4287_v10, %v3395_v9  ;;  %v1819_v13 = vpop.f32.mrb[24].mxu0 }
 0x891   : > { %v4289_v14 = vpop.eup %4288  ;;  %v1820_v16 = vadd.f32 %v1819_v13, %v5645_v55  ;;  %v3785_v17 = vpop.f32.mrb[25].mxu0 }
 0x892   : > { %v1687_v18 = vmul.f32 %v1683_v11, %v1661_v52  ;;  %v1684_v20 = vmul.f32 %v4289_v14, %v3396_v12  ;;  %v1822_v21 = vpop.f32.mrb[26].mxu0 }
 0x893   : > { %v1826_v22 = vmin.f32 %v1820_v16, 20.0  ;;  %v1823_v25 = vadd.f32 %v1822_v21, %v5647_v56  ;;  %v3786_v30 = vpop.f32.mrb[27].mxu0  ;;  %vm1844_vm1 = vcmp.gt.f32.partialorder %v1820_v16, 20.0 }
 0x894   : > { %v1688_v24 = vmul.f32 %v1684_v20, %v1664_v59  ;;  %v1689_v32 = vsel %vm1685_vm14, %v1661_v52, %v1687_v18 }
 0x895   : > { %v1828_v26 = vmul.f32 1.442695, %v1826_v22  ;;  %v1827_v29 = vmin.f32 %v1823_v25, 20.0  ;;  %vm1845_vm2 = vcmp.gt.f32.partialorder %v1823_v25, 20.0 }
 0x896   : > { %v1690_v34 = vsel %vm1686_vm15, %v1664_v59, %v1688_v24 }
 0x897   : > { %4290 = vpow2.f32 %v1828_v26  ;;  %v1830_v50 = vmul.f32 1.442695, %v1827_v29  ;;  %v1691_v51 = vpack.c.bf16 %v1690_v34, %v1689_v32 }
 0x899   : > { %4292 = vpow2.f32 %v1830_v50  ;;  %3778 = vmatmul.mubr.bf16.vlgmr.msra.gmra.mrb[12].mxu1 %v1691_v51 }
 0x89a   : > { %3788 = vmatpush3.bf16.msra.mxu1 %v5607_v39  ;;  %3803 = vmatprep.mubr.msk.bf16.mxu1 %vm4956_vm0, %v4955_v3 }
 0x89b   : > { %3789 = vmatprep.subr.bf16.mxu1 %v4955_v3 }
 0x89e   : > { %3790 = vmatpush3.bf16.msra.mxu1 %v5611_v40 }
 0x89f   : > { %3791 = vmatprep.subr.bf16.mxu1 %v4955_v3 }
 0x8a1   : > { %v4291_v53 = vpop.eup %4290 }
 0x8a2   : > { %v1832_v54 = vadd.f32 1.0, %v4291_v53  ;;  %3792 = vmatpush3.bf16.msra.mxu1 %v5615_v41 }
 0x8a3   : > { %v4293_v52 = vpop.eup %4292  ;;  %3793 = vmatprep.subr.bf16.mxu1 %v4955_v3 }
 0x8a4   : > { %v1834_v57 = vmul.f32 %v1832_v54, %v1832_v54  ;;  %v1833_v59 = vadd.f32 1.0, %v4293_v52 }
 0x8a6   : > { %v1838_v60 = vadd.f32 1.0, %v1834_v57  ;;  %v1835_v39 = vmul.f32 %v1833_v59, %v1833_v59  ;;  %3794 = vmatpush3.bf16.msra.mxu1 %v5619_v42  ;;  %v3400_v40 = vadd.f32 -1.0, %v1834_v57 }
 0x8a7   : > { %3795 = vmatprep.subr.bf16.mxu1 %v4955_v3 }
 0x8a8   : > { %4294 = vrcp.f32 %v1838_v60  ;;  %v1839_v61 = vadd.f32 1.0, %v1835_v39  ;;  %v3401_v63 = vadd.f32 -1.0, %v1835_v39 }
 0x8aa   : > { %4296 = vrcp.f32 %v1839_v61  ;;  %3796 = vmatpush3.bf16.msra.mxu1 %v5623_v43 }
 0x8ab   : > { %3797 = vmatprep.subr.bf16.mxu1 %v4955_v3 }
 0x8ae   : > { %3798 = vmatpush3.bf16.msra.mxu1 %v5627_v44 }
 0x8af   : > { %3799 = vmatprep.subr.bf16.mxu1 %v4955_v3 }
 0x8b2   : > { %v4295_v41 = vpop.eup %4294  ;;  %3800 = vmatpush3.bf16.msra.mxu1 %v5631_v45 }
 0x8b3   : > { %v1842_v62 = vmul.f32 %v4295_v41, %v3400_v40  ;;  %3801 = vmatprep.subr.bf16.mxu1 %v4955_v3 }
 0x8b4   : > { %v4297_v42 = vpop.eup %4296 }
 0x8b5   : > { %v1846_v0 = vmul.f32 %v1842_v62, %v1820_v16  ;;  %v1843_v1 = vmul.f32 %v4297_v42, %v3401_v63 }
 0x8b6   : > { %3802 = vmatpush3.bf16.msra.mxu1 %v5635_v46 }
 0x8b7   : > { %v1847_v43 = vmul.f32 %v1843_v1, %v1823_v25  ;;  %3827 = vmatprep.subr.bf16.mxu1 %v4955_v3  ;;  %v1848_v44 = vsel %vm1844_vm1, %v1820_v16, %v1846_v0 }
 0x8b9   : > { %v1849_v2 = vsel %vm1845_vm2, %v1823_v25, %v1847_v43 }
 0x8ba   : > { %v1850_v4 = vpack.c.bf16 %v1849_v2, %v1848_v44 }
 0x8bc   : > { %3804 = vmatmul.mubr.bf16.vlgmr.msra.gmra.mrb[16].mxu1 %v1850_v4 }
 0x8bd   : > { %3828 = vmatpush3.bf16.msra.mxu1 %v5584_v23  ;;  %3829 = vmatprep.mubr.msk.bf16.mxu1 %vm4956_vm0, %v4955_v3 }
 0x8be   : > { %3853 = vmatprep.subr.bf16.mxu1 %v4955_v3 }
 0x8d6   : > { %v1996_v45 = vpop.xlane.xlu1 %1995 }
 0x8d7   : > { %vm2000_vm4 = vcmp.eq.f32.partialorder %v5552_v47, %v1996_v45 }
 0x8d8   : > { %v5825_v46 = vsel %vm2000_vm4, -3e+38, %v5756_v15  ;;  %v2004_v7 = vsel %vm2000_vm4, 1.0, %v4955_v3  ;;  %v5856_v15 = vld [vmem:[#allocation19] ss:$0 sm:$0xff] }
 0x8d9   : > { %v2209_v5 = vsel %vm1146_vm3, %v5825_v46, -inf  ;;  %v5864_v12 = vadd.f32 %v5856_v15, %v5794_v33 }
 0x8da   : > { %2210 = vmax.xlane.f32.xlu1 %v2209_v5  ;;  %v1999_v6 = vpop.xlane.xlu0 %1998 }
 0x8db   : > { %vm2001_vm5 = vcmp.eq.f32.partialorder %v5552_v47, %v1999_v6  ;;  %v1509_v14 = vmin.f32 %v5864_v12, 20.0  ;;  %vm1527_vm10 = vcmp.gt.f32.partialorder %v5864_v12, 20.0 }
 0x8dc   : > { %v5832_v8 = vsel %vm2001_vm5, -3e+38, %v5763_v19  ;;  %v2005_v9 = vsel %vm2001_vm5, 1.0, %v4955_v3  ;;  %v5860_v19 = vadd.f32 %v5856_v15, %v5791_v28 }
 0x8dd   : > { %v2006_v10 = vpack.c.bf16 %v2005_v9, %v2004_v7  ;;  %v2212_v11 = vsel %vm1146_vm3, %v5832_v8, -inf  ;;  %v1512_v17 = vmul.f32 1.442695, %v1509_v14 }
 0x8de   : > { %2213 = vmax.xlane.f32.xlu0 %v2212_v11  ;;  %v1508_v13 = vmin.f32 %v5860_v19, 20.0  ;;  %vm1526_vm8 = vcmp.gt.f32.partialorder %v5860_v19, 20.0 }
 0x8df   : > { %3830 = vmatmul.mubr.msk.bf16.vlgmr.msra.gmra.mrb[20].mxu1 %vm1146_vm3, %v2006_v10 }
 0x8e0   : > { %3854 = vmatpush3.bf16.msra.mxu1 %v5672_v27  ;;  %3869 = vmatprep.mubr.msk.bf16.mxu1 %vm4956_vm0, %v4955_v3  ;;  %v1510_v16 = vmul.f32 1.442695, %v1508_v13 }
 0x8e1   : > { %3855 = vmatprep.subr.bf16.mxu1 %v4955_v3 }
 0x8e2   : > { %4298 = vpow2.f32 %v1510_v16 }
 0x8e3   : > { %4300 = vpow2.f32 %v1512_v17 }
 0x8e4   : > { %3856 = vmatpush3.bf16.msra.mxu1 %v5678_v31 }
 0x8e5   : > { %3857 = vmatprep.subr.bf16.mxu1 %v4955_v3 }
 0x8e8   : > { %3858 = vmatpush3.bf16.msra.mxu1 %v5684_v35 }
 0x8e9   : > { %3859 = vmatprep.subr.bf16.mxu1 %v4955_v3 }
 0x8ec   : > { %3860 = vmatpush3.bf16.msra.mxu1 %v5690_v36  ;;  %v4299_v29 = vpop.eup %4298 }
 0x8ed   : > { %3861 = vmatprep.subr.bf16.mxu1 %v4955_v3  ;;  %v4301_v51 = vpop.eup %4300  ;;  %v1514_v52 = vadd.f32 1.0, %v4299_v29 }
 0x8ee   : > { %v1515_v59 = vadd.f32 1.0, %v4301_v51 }
 0x8ef   : > { %v1516_v60 = vmul.f32 %v1514_v52, %v1514_v52 }
 0x8f0   : > { %3862 = vmatpush3.bf16.msra.mxu1 %v5696_v37  ;;  %v1517_v39 = vmul.f32 %v1515_v59, %v1515_v59 }
 0x8f1   : > { %3863 = vmatprep.subr.bf16.mxu1 %v4955_v3  ;;  %v1520_v61 = vadd.f32 1.0, %v1516_v60  ;;  %v3390_v4 = vadd.f32 -1.0, %v1516_v60 }
 0x8f2   : > { %v1521_v40 = vadd.f32 1.0, %v1517_v39  ;;  %v3391_v6 = vadd.f32 -1.0, %v1517_v39 }
 0x8f4   : > { %3864 = vmatpush3.bf16.msra.mxu1 %v5702_v38 }
 0x8f5   : > { %3865 = vmatprep.subr.bf16.mxu1 %v4955_v3 }
 0x8f8   : > { %3866 = vmatpush3.bf16.msra.mxu1 %v5708_v48 }
 0x8f9   : > { %3867 = vmatprep.subr.bf16.mxu1 %v4955_v3 }
 0x8fc   : > { %3868 = vmatpush3.bf16.msra.mxu1 %v5714_v49 }
 0x8fd   : > { %3879 = vmatprep.subr.bf16.mxu1 %v4955_v3 }
 0x967   : > { %v2211_v18 = vpop.xlane.xlu1 %2210 }
 0x968   : > { %vm2215_vm6 = vcmp.eq.f32.partialorder %v5825_v46, %v2211_v18 }
 0x969   : > { %v2217_v20 = vsel %vm2215_vm6, %v5552_v47, 16.0 }
 0x96a   : > { %v2219_v28 = vsel %vm1146_vm3, %v2217_v20, inf }
 0x96b   : > { %2220 = vmin.xlane.f32.xlu1 %v2219_v28  ;;  %v2214_v21 = vpop.xlane.xlu0 %2213 }
 0x96c   : > { %vm2216_vm7 = vcmp.eq.f32.partialorder %v5832_v8, %v2214_v21  ;;  %v1726_v33 = vpop.f32.mrb[12].mxu1 }
 0x96d   : > { %v1727_v22 = vadd.f32 %v5856_v15, %v1726_v33  ;;  %v3779_v25 = vpop.f32.mrb[13].mxu1  ;;  %v2218_v30 = vsel %vm2216_vm7, %v5552_v47, 16.0 }
 0x96e   : > { %v1729_v24 = vpop.f32.mrb[14].mxu1  ;;  %v2222_v26 = vsel %vm1146_vm3, %v2218_v30, inf }
 0x96f   : > { %v1733_v32 = vmin.f32 %v1727_v22, 20.0  ;;  %v1730_v34 = vadd.f32 %v5856_v15, %v1729_v24  ;;  %2223 = vmin.xlane.f32.xlu0 %v2222_v26  ;;  %v3780_v50 = vpop.f32.mrb[15].mxu1  ;;  %vm1751_vm9 = vcmp.gt.f32.partialorder %v1727_v22, 20.0 }
 0x971   : > { %v1735_v53 = vmul.f32 1.442695, %v1733_v32  ;;  %v1734_v54 = vmin.f32 %v1730_v34, 20.0  ;;  %vm1752_vm11 = vcmp.gt.f32.partialorder %v1730_v34, 20.0 }
 0x973   : > { %4302 = vpow2.f32 %v1735_v53  ;;  %v1737_v57 = vmul.f32 1.442695, %v1734_v54 }
 0x975   : > { %4304 = vpow2.f32 %v1737_v57 }
 0x976   : > { %4306 = vrcp.f32 %v1520_v61 }
 0x977   : > { %4308 = vrcp.f32 %v1521_v40 }
 0x97d   : > { %v4303_v41 = vpop.eup %4302 }
 0x97e   : > { %v1739_v62 = vadd.f32 1.0, %v4303_v41 }
 0x97f   : > { %v4305_v63 = vpop.eup %4304 }
 0x980   : > { %v1741_v42 = vmul.f32 %v1739_v62, %v1739_v62  ;;  %v1740_v0 = vadd.f32 1.0, %v4305_v63  ;;  %v4307_v2 = vpop.eup %4306 }
 0x981   : > { %v4309_v45 = vpop.eup %4308  ;;  %v1524_v5 = vmul.f32 %v4307_v2, %v3390_v4 }
 0x982   : > { %v1745_v1 = vadd.f32 1.0, %v1741_v42  ;;  %v1742_v43 = vmul.f32 %v1740_v0, %v1740_v0  ;;  %v1525_v7 = vmul.f32 %v4309_v45, %v3391_v6  ;;  %v3397_v9 = vadd.f32 -1.0, %v1741_v42 }
 0x983   : > { %v1528_v11 = vmul.f32 %v1524_v5, %v5860_v19 }
 0x984   : > { %4310 = vrcp.f32 %v1745_v1  ;;  %v1746_v44 = vadd.f32 1.0, %v1742_v43  ;;  %v3398_v14 = vadd.f32 -1.0, %v1742_v43  ;;  %v1529_v28 = vmul.f32 %v1525_v7, %v5864_v12 }
 0x985   : > { %v1530_v29 = vsel %vm1526_vm8, %v5860_v19, %v1528_v11 }
 0x986   : > { %4312 = vrcp.f32 %v1746_v44  ;;  %v1531_v52 = vsel %vm1527_vm10, %v5864_v12, %v1529_v28  ;;  %v5893_v28 = vld [vmem:[#allocation14] sm:$0xff]  }
 0x98e   : > { %v4311_v10 = vpop.eup %4310 }
 0x98f   : > { %v1749_v13 = vmul.f32 %v4311_v10, %v3397_v9  ;;  %v1885_v16 = vpop.f32.mrb[16].mxu1 }
 0x990   : > { %v4313_v17 = vpop.eup %4312  ;;  %v1886_v18 = vadd.f32 %v5726_v58, %v1885_v16  ;;  %v3805_v20 = vpop.f32.mrb[17].mxu1 }
 0x991   : > { %v1753_v21 = vmul.f32 %v1749_v13, %v1727_v22  ;;  %v1750_v33 = vmul.f32 %v4313_v17, %v3398_v14  ;;  %v1888_v25 = vpop.f32.mrb[18].mxu1 }
 0x992   : > { %v1892_v30 = vmin.f32 %v1886_v18, 20.0  ;;  %v1889_v24 = vadd.f32 %v5726_v58, %v1888_v25  ;;  %v3806_v26 = vpop.f32.mrb[19].mxu1  ;;  %vm1910_vm12 = vcmp.gt.f32.partialorder %v1886_v18, 20.0  ;;  %v5903_v25 = vld [vmem:[#allocation14 + $0x10] sm:$0xff]  }
 0x993   : > { %v1755_v32 = vsel %vm1751_vm9, %v1727_v22, %v1753_v21  ;;  %v1754_v50 = vmul.f32 %v1750_v33, %v1730_v34  ;;  %v5899_v21 = vld [vmem:[#allocation14 + $0x8] sm:$0xff]  }
 0x994   : > { %v5883_v51 = vadd.f32 %v1755_v32, %v1530_v29  ;;  %v1894_v53 = vmul.f32 1.442695, %v1892_v30  ;;  %v1893_v54 = vmin.f32 %v1889_v24, 20.0  ;;  %vm1911_vm13 = vcmp.gt.f32.partialorder %v1889_v24, 20.0 }
 0x995   : > { %v1756_v57 = vsel %vm1752_vm11, %v1730_v34, %v1754_v50  ;;  %v5907_v50 = vld [vmem:[#allocation14 + $0x18] sm:$0xff]  }
 0x996   : > { %v5886_v59 = vadd.f32 %v1756_v57, %v1531_v52  ;;  %4314 = vpow2.f32 %v1894_v53  ;;  %v1896_v60 = vmul.f32 1.442695, %v1893_v54  ;;  %v5911_v54 = vld [vmem:[#allocation14 + $0x20] sm:$0xff]   ;;  %v5915_v52 = vld [vmem:[#allocation14 + $0x28] sm:$0xff]  }
 0x998   : > { %4316 = vpow2.f32 %v1896_v60 }
 0x9a0   : > { %v4315_v39 = vpop.eup %4314 }
 0x9a1   : > { %v1898_v61 = vadd.f32 1.0, %v4315_v39  ;;  %v5919_v39 = vld [vmem:[#allocation14 + $0x30] sm:$0xff]  }
 0x9a2   : > { %v4317_v19 = vpop.eup %4316 }
 0x9a3   : > { %v1900_v40 = vmul.f32 %v1898_v61, %v1898_v61  ;;  %v1899_v41 = vadd.f32 1.0, %v4317_v19 }
 0x9a5   : > { %v1904_v22 = vadd.f32 1.0, %v1900_v40  ;;  %v1901_v62 = vmul.f32 %v1899_v41, %v1899_v41  ;;  %v3402_v42 = vadd.f32 -1.0, %v1900_v40 }
 0x9a7   : > { %4318 = vrcp.f32 %v1904_v22  ;;  %v1905_v63 = vadd.f32 1.0, %v1901_v62  ;;  %v3403_v12 = vadd.f32 -1.0, %v1901_v62  ;;  %v5924_v62 = vld [vmem:[#allocation14 + $0x38] sm:$0xff]  }
 0x9a9   : > { %4320 = vrcp.f32 %v1905_v63 }
 0x9b1   : > { %v4319_v0 = vpop.eup %4318 }
 0x9b2   : > { %v1908_v1 = vmul.f32 %v4319_v0, %v3402_v42  ;;  %v2044_v34 = vpop.f32.mrb[20].mxu1 }
 0x9b3   : > { %v4321_v43 = vpop.eup %4320  ;;  %v5889_v44 = vadd.f32 %v2044_v34, %v5645_v55  ;;  %v3831_v2 = vpop.f32.mrb[21].mxu1 }
 0x9b4   : > { %v1912_v4 = vmul.f32 %v1908_v1, %v1886_v18  ;;  %v1909_v45 = vmul.f32 %v4321_v43, %v3403_v12  ;;  %v2047_v5 = vpop.f32.mrb[22].mxu1 }
 0x9b5   : > { %v2051_v6 = vmin.f32 %v5889_v44, 20.0  ;;  %v2048_v7 = vadd.f32 %v2047_v5, %v5647_v56  ;;  %v3832_v9 = vpop.f32.mrb[23].mxu1  ;;  %vm2069_vm14 = vcmp.gt.f32.partialorder %v5889_v44, 20.0 }
 0x9b6   : > { %v1913_v10 = vmul.f32 %v1909_v45, %v1889_v24  ;;  %v1914_v14 = vsel %vm1910_vm12, %v1886_v18, %v1912_v4 }
 0x9b7   : > { %v2053_v11 = vmul.f32 1.442695, %v2051_v6  ;;  %v2052_v13 = vmin.f32 %v2048_v7, 20.0  ;;  %vm2070_vm15 = vcmp.gt.f32.partialorder %v2048_v7, 20.0 }
 0x9b8   : > { %v1915_v16 = vsel %vm1911_vm13, %v1889_v24, %v1913_v10 }
 0x9b9   : > { %4322 = vpow2.f32 %v2053_v11  ;;  %v2055_v17 = vmul.f32 1.442695, %v2052_v13  ;;  %v1916_v20 = vpack.c.bf16 %v1915_v16, %v1914_v14 }
 0x9bb   : > { %4324 = vpow2.f32 %v2055_v17  ;;  %3824 = vmatmul.mubr.bf16.vlgmr.msra.gmra.mrb[28].mxu0 %v1916_v20 }
 0x9bc   : > { %3834 = vmatpush3.bf16.msra.mxu0 %v5893_v28  ;;  %3849 = vmatprep.mubr.msk.bf16.mxu0 %vm4956_vm0, %v4955_v3 }
 0x9bd   : > { %3835 = vmatprep.subr.bf16.mxu0 %v4955_v3 }
 0x9c0   : > { %3836 = vmatpush3.bf16.msra.mxu0 %v5899_v21 }
 0x9c1   : > { %3837 = vmatprep.subr.bf16.mxu0 %v4955_v3 }
 0x9c3   : > { %v4323_v18 = vpop.eup %4322 }
 0x9c4   : > { %v2057_v33 = vadd.f32 1.0, %v4323_v18  ;;  %3838 = vmatpush3.bf16.msra.mxu0 %v5903_v25 }
 0x9c5   : > { %v4325_v30 = vpop.eup %4324  ;;  %3839 = vmatprep.subr.bf16.mxu0 %v4955_v3 }
 0x9c6   : > { %v2059_v24 = vmul.f32 %v2057_v33, %v2057_v33  ;;  %v2058_v26 = vadd.f32 1.0, %v4325_v30 }
 0x9c8   : > { %v2063_v29 = vadd.f32 1.0, %v2059_v24  ;;  %v2060_v32 = vmul.f32 %v2058_v26, %v2058_v26  ;;  %3840 = vmatpush3.bf16.msra.mxu0 %v5907_v50  ;;  %v3407_v57 = vadd.f32 -1.0, %v2059_v24 }
 0x9c9   : > { %3841 = vmatprep.subr.bf16.mxu0 %v4955_v3 }
 0x9ca   : > { %4326 = vrcp.f32 %v2063_v29  ;;  %v2064_v53 = vadd.f32 1.0, %v2060_v32  ;;  %v3408_v19 = vadd.f32 -1.0, %v2060_v32 }
 0x9cc   : > { %4328 = vrcp.f32 %v2064_v53  ;;  %3842 = vmatpush3.bf16.msra.mxu0 %v5911_v54 }
 0x9cd   : > { %3843 = vmatprep.subr.bf16.mxu0 %v4955_v3 }
 0x9d0   : > { %3844 = vmatpush3.bf16.msra.mxu0 %v5915_v52 }
 0x9d1   : > { %3845 = vmatprep.subr.bf16.mxu0 %v4955_v3 }
 0x9d4   : > { %v4327_v60 = vpop.eup %4326  ;;  %3846 = vmatpush3.bf16.msra.mxu0 %v5919_v39 }
 0x9d5   : > { %v2067_v61 = vmul.f32 %v4327_v60, %v3407_v57  ;;  %3847 = vmatprep.subr.bf16.mxu0 %v4955_v3 }
 0x9d6   : > { %v4329_v40 = vpop.eup %4328 }
 0x9d7   : > { %v2071_v41 = vmul.f32 %v2067_v61, %v5889_v44  ;;  %v2068_v22 = vmul.f32 %v4329_v40, %v3408_v19 }
 0x9d8   : > { %3848 = vmatpush3.bf16.msra.mxu0 %v5924_v62 }
 0x9d9   : > { %v2072_v63 = vmul.f32 %v2068_v22, %v2048_v7  ;;  %3873 = vmatprep.subr.bf16.mxu0 %v4955_v3  ;;  %v2073_v42 = vsel %vm2069_vm14, %v5889_v44, %v2071_v41 }
 0x9db   : > { %v2074_v0 = vsel %vm2070_vm15, %v2048_v7, %v2072_v63 }
 0x9dc   : > { %v2075_v1 = vpack.c.bf16 %v2074_v0, %v2073_v42 }
 0x9de   : > { %3850 = vmatmul.mubr.bf16.vlgmr.msra.gmra.mrb[32].mxu0 %v2075_v1 }
 0x9df   : > { %3874 = vmatpush3.bf16.msra.mxu0 %v5584_v23  ;;  %3875 = vmatprep.mubr.msk.bf16.mxu0 %vm4956_vm0, %v4955_v3 }
 0x9e0   : > { %3899 = vmatprep.subr.bf16.mxu0 %v4955_v3 }
 0x9f8   : > { %v2221_v12 = vpop.xlane.xlu1 %2220 }
 0x9f9   : > { %vm2225_vm1 = vcmp.eq.f32.partialorder %v5552_v47, %v2221_v12 }
 0x9fa   : > { %v5936_v34 = vsel %vm2225_vm1, -3e+38, %v5825_v46  ;;  %v2229_v2 = vsel %vm2225_vm1, 1.0, %v4955_v3 }
 0x9fb   : > { %v2434_v43 = vsel %vm1146_vm3, %v5936_v34, -inf }
 0x9fc   : > { %2435 = vmax.xlane.f32.xlu1 %v2434_v43  ;;  %v2224_v44 = vpop.xlane.xlu0 %2223 }
 0x9fd   : > { %vm2226_vm2 = vcmp.eq.f32.partialorder %v5552_v47, %v2224_v44 }
 0x9fe   : > { %v5943_v4 = vsel %vm2226_vm2, -3e+38, %v5832_v8  ;;  %v2230_v45 = vsel %vm2226_vm2, 1.0, %v4955_v3 }
 0x9ff   : > { %v2231_v5 = vpack.c.bf16 %v2230_v45, %v2229_v2  ;;  %v2437_v6 = vsel %vm1146_vm3, %v5943_v4, -inf }
 0xa00   : > { %2438 = vmax.xlane.f32.xlu0 %v2437_v6 }
 0xa01   : > { %3876 = vmatmul.mubr.msk.bf16.vlgmr.msra.gmra.mrb[36].mxu0 %vm1146_vm3, %v2231_v5 }
 0xa02   : > { %3900 = vmatpush3.bf16.msra.mxu0 %v5672_v27  ;;  %3915 = vmatprep.mubr.msk.bf16.mxu0 %vm4956_vm0, %v4955_v3 }
 0xa03   : > { %3901 = vmatprep.subr.bf16.mxu0 %v4955_v3 }
 0xa06   : > { %3902 = vmatpush3.bf16.msra.mxu0 %v5678_v31 }
 0xa07   : > { %3903 = vmatprep.subr.bf16.mxu0 %v4955_v3 }
 0xa0a   : > { %3904 = vmatpush3.bf16.msra.mxu0 %v5684_v35 }
 0xa0b   : > { %3905 = vmatprep.subr.bf16.mxu0 %v4955_v3 }
 0xa0e   : > { %3906 = vmatpush3.bf16.msra.mxu0 %v5690_v36 }
 0xa0f   : > { %3907 = vmatprep.subr.bf16.mxu0 %v4955_v3 }
 0xa12   : > { %3908 = vmatpush3.bf16.msra.mxu0 %v5696_v37 }
 0xa13   : > { %3909 = vmatprep.subr.bf16.mxu0 %v4955_v3 }
 0xa16   : > { %3910 = vmatpush3.bf16.msra.mxu0 %v5702_v38 }
 0xa17   : > { %3911 = vmatprep.subr.bf16.mxu0 %v4955_v3 }
 0xa1a   : > { %3912 = vmatpush3.bf16.msra.mxu0 %v5708_v48 }
 0xa1b   : > { %3913 = vmatprep.subr.bf16.mxu0 %v4955_v3 }
 0xa1e   : > { %3914 = vmatpush3.bf16.msra.mxu0 %v5714_v49 }
 0xa1f   : > { %3925 = vmatprep.subr.bf16.mxu0 %v4955_v3 }
 0xa89   : > { %v2436_v27 = vpop.xlane.xlu1 %2435 }
 0xa8a   : > { %vm2440_vm4 = vcmp.eq.f32.partialorder %v5936_v34, %v2436_v27 }
 0xa8b   : > { %v2442_v31 = vsel %vm2440_vm4, %v5552_v47, 16.0 }
 0xa8c   : > { %v2444_v35 = vsel %vm1146_vm3, %v2442_v31, inf }
 0xa8d   : > { %2445 = vmin.xlane.f32.xlu1 %v2444_v35  ;;  %v2439_v36 = vpop.xlane.xlu0 %2438 }
 0xa8e   : > { %vm2441_vm5 = vcmp.eq.f32.partialorder %v5943_v4, %v2439_v36  ;;  %v1951_v37 = vpop.f32.mrb[28].mxu0 }
 0xa8f   : > { %v1952_v38 = vadd.f32 %v5856_v15, %v1951_v37  ;;  %v3825_v48 = vpop.f32.mrb[29].mxu0  ;;  %v2443_v46 = vsel %vm2441_vm5, %v5552_v47, 16.0 }
 0xa90   : > { %v1954_v49 = vpop.f32.mrb[30].mxu0  ;;  %v2447_v8 = vsel %vm1146_vm3, %v2443_v46, inf }
 0xa91   : > { %v1958_v7 = vmin.f32 %v1952_v38, 20.0  ;;  %v1955_v9 = vadd.f32 %v5856_v15, %v1954_v49  ;;  %2448 = vmin.xlane.f32.xlu0 %v2447_v8  ;;  %v3826_v10 = vpop.f32.mrb[31].mxu0  ;;  %vm1976_vm6 = vcmp.gt.f32.partialorder %v1952_v38, 20.0 }
 0xa93   : > { %v1960_v11 = vmul.f32 1.442695, %v1958_v7  ;;  %v1959_v13 = vmin.f32 %v1955_v9, 20.0  ;;  %vm1977_vm7 = vcmp.gt.f32.partialorder %v1955_v9, 20.0 }
 0xa95   : > { %4330 = vpow2.f32 %v1960_v11  ;;  %v1962_v14 = vmul.f32 1.442695, %v1959_v13 }
 0xa97   : > { %4332 = vpow2.f32 %v1962_v14 }
 0xa9f   : > { %v4331_v16 = vpop.eup %4330 }
 0xaa0   : > { %v1964_v17 = vadd.f32 1.0, %v4331_v16 }
 0xaa1   : > { %v4333_v20 = vpop.eup %4332 }
 0xaa2   : > { %v1966_v18 = vmul.f32 %v1964_v17, %v1964_v17  ;;  %v1965_v33 = vadd.f32 1.0, %v4333_v20 }
 0xaa4   : > { %v1970_v30 = vadd.f32 1.0, %v1966_v18  ;;  %v1967_v24 = vmul.f32 %v1965_v33, %v1965_v33  ;;  %v3404_v29 = vadd.f32 -1.0, %v1966_v18 }
 0xaa6   : > { %4334 = vrcp.f32 %v1970_v30  ;;  %v1971_v26 = vadd.f32 1.0, %v1967_v24  ;;  %v3405_v57 = vadd.f32 -1.0, %v1967_v24 }
 0xaa8   : > { %4336 = vrcp.f32 %v1971_v26 }
 0xab0   : > { %v4335_v32 = vpop.eup %4334 }
 0xab1   : > { %v1974_v53 = vmul.f32 %v4335_v32, %v3404_v29  ;;  %v2110_v60 = vpop.f32.mrb[32].mxu0 }
 0xab2   : > { %v4337_v61 = vpop.eup %4336  ;;  %v2111_v19 = vadd.f32 %v5726_v58, %v2110_v60  ;;  %v3851_v40 = vpop.f32.mrb[33].mxu0 }
 0xab3   : > { %v1978_v41 = vmul.f32 %v1974_v53, %v1952_v38  ;;  %v1975_v22 = vmul.f32 %v4337_v61, %v3405_v57  ;;  %v2113_v63 = vpop.f32.mrb[34].mxu0 }
 0xab4   : > { %v2117_v42 = vmin.f32 %v2111_v19, 20.0  ;;  %v2114_v0 = vadd.f32 %v5726_v58, %v2113_v63  ;;  %v3852_v1 = vpop.f32.mrb[35].mxu0  ;;  %vm2135_vm8 = vcmp.gt.f32.partialorder %v2111_v19, 20.0 }
 0xab5   : > { %v1980_v12 = vsel %vm1976_vm6, %v1952_v38, %v1978_v41  ;;  %v1979_v43 = vmul.f32 %v1975_v22, %v1955_v9 }
 0xab6   : > { %v5978_v44 = vadd.f32 %v1980_v12, %v5883_v51  ;;  %v2119_v2 = vmul.f32 1.442695, %v2117_v42  ;;  %v2118_v45 = vmin.f32 %v2114_v0, 20.0  ;;  %vm2136_vm9 = vcmp.gt.f32.partialorder %v2114_v0, 20.0 }
 0xab7   : > { %v1981_v5 = vsel %vm1977_vm7, %v1955_v9, %v1979_v43 }
 0xab8   : > { %v5981_v6 = vadd.f32 %v1981_v5, %v5886_v59  ;;  %4338 = vpow2.f32 %v2119_v2  ;;  %v2121_v27 = vmul.f32 1.442695, %v2118_v45 }
 0xaba   : > { %4340 = vpow2.f32 %v2121_v27 }
 0xac2   : > { %v4339_v31 = vpop.eup %4338 }
 0xac3   : > { %v2123_v35 = vadd.f32 1.0, %v4339_v31 }
 0xac4   : > { %v4341_v36 = vpop.eup %4340 }
 0xac5   : > { %v2125_v58 = vmul.f32 %v2123_v35, %v2123_v35  ;;  %v2124_v37 = vadd.f32 1.0, %v4341_v36 }
 0xac7   : > { %v2129_v38 = vadd.f32 1.0, %v2125_v58  ;;  %v2126_v48 = vmul.f32 %v2124_v37, %v2124_v37  ;;  %v3409_v46 = vadd.f32 -1.0, %v2125_v58 }
 0xac9   : > { %4342 = vrcp.f32 %v2129_v38  ;;  %v2130_v51 = vadd.f32 1.0, %v2126_v48  ;;  %v3410_v7 = vadd.f32 -1.0, %v2126_v48 }
 0xacb   : > { %4344 = vrcp.f32 %v2130_v51 }
 0xad3   : > { %v4343_v49 = vpop.eup %4342 }
 0xad4   : > { %v2133_v8 = vmul.f32 %v4343_v49, %v3409_v46  ;;  %v2269_v9 = vpop.f32.mrb[36].mxu0 }
 0xad5   : > { %v4345_v59 = vpop.eup %4344  ;;  %v2270_v10 = vadd.f32 %v2269_v9, %v5645_v55  ;;  %v3877_v11 = vpop.f32.mrb[37].mxu0  ;;  %v6030_v9 = vld [vmem:[#allocation17 + $0x18] sm:$0xff]  }
 0xad6   : > { %v2137_v13 = vmul.f32 %v2133_v8, %v2111_v19  ;;  %v2134_v14 = vmul.f32 %v4345_v59, %v3410_v7  ;;  %v2272_v16 = vpop.f32.mrb[38].mxu0  ;;  %v6016_v7 = vld [vmem:[#allocation17] sm:$0xff]   ;;  %v6042_v11 = vld [vmem:[#allocation17 + $0x30] sm:$0xff]  }
 0xad7   : > { %v2276_v17 = vmin.f32 %v2270_v10, 20.0  ;;  %v2273_v20 = vadd.f32 %v2272_v16, %v5647_v56  ;;  %v3878_v18 = vpop.f32.mrb[39].mxu0  ;;  %vm2294_vm10 = vcmp.gt.f32.partialorder %v2270_v10, 20.0  ;;  %v6034_v59 = vld [vmem:[#allocation17 + $0x20] sm:$0xff]  }
 0xad8   : > { %v2138_v33 = vmul.f32 %v2134_v14, %v2114_v0  ;;  %v2139_v26 = vsel %vm2135_vm8, %v2111_v19, %v2137_v13  ;;  %v6046_v13 = vld [vmem:[#allocation17 + $0x38] sm:$0xff]  }
 0xad9   : > { %v2278_v30 = vmul.f32 1.442695, %v2276_v17  ;;  %v2277_v24 = vmin.f32 %v2273_v20, 20.0  ;;  %vm2295_vm11 = vcmp.gt.f32.partialorder %v2273_v20, 20.0 }
 0xada   : > { %v2140_v29 = vsel %vm2136_vm9, %v2114_v0, %v2138_v33 }
 0xadb   : > { %4346 = vpow2.f32 %v2278_v30  ;;  %v2280_v32 = vmul.f32 1.442695, %v2277_v24  ;;  %v2141_v53 = vpack.c.bf16 %v2140_v29, %v2139_v26 }
 0xadd   : > { %4348 = vpow2.f32 %v2280_v32  ;;  %3870 = vmatmul.mubr.bf16.vlgmr.msra.gmra.mrb[24].mxu1 %v2141_v53 }
 0xade   : > { %3880 = vmatpush3.bf16.msra.mxu1 %v5893_v28  ;;  %3895 = vmatprep.mubr.msk.bf16.mxu1 %vm4956_vm0, %v4955_v3 }
 0xadf   : > { %3881 = vmatprep.subr.bf16.mxu1 %v4955_v3 }
 0xae2   : > { %3882 = vmatpush3.bf16.msra.mxu1 %v5899_v21 }
 0xae3   : > { %3883 = vmatprep.subr.bf16.mxu1 %v4955_v3 }
 0xae5   : > { %v4347_v57 = vpop.eup %4346 }
 0xae6   : > { %v2282_v60 = vadd.f32 1.0, %v4347_v57  ;;  %3884 = vmatpush3.bf16.msra.mxu1 %v5903_v25 }
 0xae7   : > { %v4349_v61 = vpop.eup %4348  ;;  %3885 = vmatprep.subr.bf16.mxu1 %v4955_v3 }
 0xae8   : > { %v2284_v19 = vmul.f32 %v2282_v60, %v2282_v60  ;;  %v2283_v40 = vadd.f32 1.0, %v4349_v61 }
 0xaea   : > { %v2288_v41 = vadd.f32 1.0, %v2284_v19  ;;  %v2285_v22 = vmul.f32 %v2283_v40, %v2283_v40  ;;  %3886 = vmatpush3.bf16.msra.mxu1 %v5907_v50  ;;  %v3414_v42 = vadd.f32 -1.0, %v2284_v19  ;;  %v724_v40 = vld [vmem:[%s622_s15] sm:$0xff] }
 0xaeb   : > { %3887 = vmatprep.subr.bf16.mxu1 %v4955_v3 }
 0xaec   : > { %4350 = vrcp.f32 %v2288_v41  ;;  %v2289_v63 = vadd.f32 1.0, %v2285_v22  ;;  %v3415_v12 = vadd.f32 -1.0, %v2285_v22 }
 0xaee   : > { %4352 = vrcp.f32 %v2289_v63  ;;  %3888 = vmatpush3.bf16.msra.mxu1 %v5911_v54 }
 0xaef   : > { %3889 = vmatprep.subr.bf16.mxu1 %v4955_v3 }
 0xaf2   : > { %3890 = vmatpush3.bf16.msra.mxu1 %v5915_v52 }
 0xaf3   : > { %3891 = vmatprep.subr.bf16.mxu1 %v4955_v3 }
 0xaf6   : > { %v4351_v0 = vpop.eup %4350  ;;  %3892 = vmatpush3.bf16.msra.mxu1 %v5919_v39 }
 0xaf7   : > { %v2292_v1 = vmul.f32 %v4351_v0, %v3414_v42  ;;  %3893 = vmatprep.subr.bf16.mxu1 %v4955_v3 }
 0xaf8   : > { %v4353_v43 = vpop.eup %4352 }
 0xaf9   : > { %v2296_v2 = vmul.f32 %v2292_v1, %v2270_v10  ;;  %v2293_v45 = vmul.f32 %v4353_v43, %v3415_v12 }
 0xafa   : > { %3894 = vmatpush3.bf16.msra.mxu1 %v5924_v62 }
 0xafb   : > { %v2297_v5 = vmul.f32 %v2293_v45, %v2273_v20  ;;  %3919 = vmatprep.subr.bf16.mxu1 %v4955_v3  ;;  %v2298_v27 = vsel %vm2294_vm10, %v2270_v10, %v2296_v2  ;;  %v6038_v10 = vld [vmem:[#allocation17 + $0x28] sm:$0xff]  }
 0xafd   : > { %v2299_v31 = vsel %vm2295_vm11, %v2273_v20, %v2297_v5 }
 0xafe   : > { %v2300_v35 = vpack.c.bf16 %v2299_v31, %v2298_v27 }
 0xb00   : > { %3896 = vmatmul.mubr.bf16.vlgmr.msra.gmra.mrb[28].mxu1 %v2300_v35 }
 0xb01   : > { %3920 = vmatpush3.bf16.msra.mxu1 %v5584_v23  ;;  %3921 = vmatprep.mubr.msk.bf16.mxu1 %vm4956_vm0, %v4955_v3 }
 0xb02   : > { %3945 = vmatprep.subr.bf16.mxu1 %v4955_v3 }
 0xb1a   : > { %v2446_v36 = vpop.xlane.xlu1 %2445 }
 0xb1b   : > { %vm2450_vm12 = vcmp.eq.f32.partialorder %v5552_v47, %v2446_v36  ;;  %v6060_v36 = vld [vmem:[#allocation16] ss:$0 sm:$0xff] }
 0xb1c   : > { %v2452_v58 = vsel %vm2450_vm12, -3e+38, %v5936_v34  ;;  %v2454_v48 = vsel %vm2450_vm12, 1.0, %v4955_v3  ;;  %v6022_v34 = vld [vmem:[#allocation17 + $0x8] sm:$0xff]  }
 0xb1d   : > { %v2659_v37 = vsel %vm1146_vm3, %v2452_v58, -inf }
 0xb1e   : > { %2660 = vmax.xlane.f32.xlu1 %v2659_v37  ;;  %v2449_v38 = vpop.xlane.xlu0 %2448 }
 0xb1f   : > { %vm2451_vm13 = vcmp.eq.f32.partialorder %v5552_v47, %v2449_v38 }
 0xb20   : > { %v2455_v51 = vsel %vm2451_vm13, 1.0, %v4955_v3  ;;  %v2453_v46 = vsel %vm2451_vm13, -3e+38, %v5943_v4  ;;  %v6026_v4 = vld [vmem:[#allocation17 + $0x10] sm:$0xff]  }
 0xb21   : > { %v2456_v49 = vpack.c.bf16 %v2455_v51, %v2454_v48  ;;  %v2662_v8 = vsel %vm1146_vm3, %v2453_v46, -inf }
 0xb22   : > { %2663 = vmax.xlane.f32.xlu0 %v2662_v8 }
 0xb23   : > { %3922 = vmatmul.mubr.msk.bf16.vlgmr.msra.gmra.mrb[32].mxu1 %vm1146_vm3, %v2456_v49 }
 0xb24   : > { %3946 = vmatpush3.bf16.msra.mxu1 %v6016_v7  ;;  %3961 = vmatprep.mubr.msk.bf16.mxu1 %vm4956_vm0, %v4955_v3 }
 0xb25   : > { %3947 = vmatprep.subr.bf16.mxu1 %v4955_v3 }
 0xb28   : > { %3948 = vmatpush3.bf16.msra.mxu1 %v6022_v34 }
 0xb29   : > { %3949 = vmatprep.subr.bf16.mxu1 %v4955_v3 }
 0xb2c   : > { %3950 = vmatpush3.bf16.msra.mxu1 %v6026_v4 }
 0xb2d   : > { %3951 = vmatprep.subr.bf16.mxu1 %v4955_v3 }
 0xb30   : > { %3952 = vmatpush3.bf16.msra.mxu1 %v6030_v9 }
 0xb31   : > { %3953 = vmatprep.subr.bf16.mxu1 %v4955_v3 }
 0xb34   : > { %3954 = vmatpush3.bf16.msra.mxu1 %v6034_v59 }
 0xb35   : > { %3955 = vmatprep.subr.bf16.mxu1 %v4955_v3 }
 0xb38   : > { %3956 = vmatpush3.bf16.msra.mxu1 %v6038_v10 }
 0xb39   : > { %3957 = vmatprep.subr.bf16.mxu1 %v4955_v3 }
 0xb3c   : > { %3958 = vmatpush3.bf16.msra.mxu1 %v6042_v11 }
 0xb3d   : > { %3959 = vmatprep.subr.bf16.mxu1 %v4955_v3 }
 0xb40   : > { %3960 = vmatpush3.bf16.msra.mxu1 %v6046_v13 }
 0xb41   : > { %3971 = vmatprep.subr.bf16.mxu1 %v4955_v3 }
 0xbab   : > { %v2661_v14 = vpop.xlane.xlu1 %2660 }
 0xbac   : > { %vm2665_vm14 = vcmp.eq.f32.partialorder %v2452_v58, %v2661_v14 }
 0xbad   : > { %v2667_v16 = vsel %vm2665_vm14, %v5552_v47, 16.0 }
 0xbae   : > { %v2669_v17 = vsel %vm1146_vm3, %v2667_v16, inf }
 0xbaf   : > { %2670 = vmin.xlane.f32.xlu1 %v2669_v17  ;;  %v2664_v20 = vpop.xlane.xlu0 %2663 }
 0xbb0   : > { %vm2666_vm15 = vcmp.eq.f32.partialorder %v2453_v46, %v2664_v20  ;;  %v2176_v18 = vpop.f32.mrb[24].mxu1 }
 0xbb1   : > { %v2177_v33 = vadd.f32 %v5856_v15, %v2176_v18  ;;  %v3871_v30 = vpop.f32.mrb[25].mxu1  ;;  %v2668_v24 = vsel %vm2666_vm15, %v5552_v47, 16.0 }
 0xbb2   : > { %v2179_v26 = vpop.f32.mrb[26].mxu1  ;;  %v2672_v29 = vsel %vm1146_vm3, %v2668_v24, inf }
 0xbb3   : > { %v2183_v32 = vmin.f32 %v2177_v33, 20.0  ;;  %v2180_v53 = vadd.f32 %v5856_v15, %v2179_v26  ;;  %2673 = vmin.xlane.f32.xlu0 %v2672_v29  ;;  %v3872_v57 = vpop.f32.mrb[27].mxu1  ;;  %v725_v15 = vld [vmem:[%s622_s15 + $0x8] sm:$0xff]  ;;  %vm2201_vm1 = vcmp.gt.f32.partialorder %v2177_v33, 20.0 }
 0xbb5   : > { %v2185_v60 = vmul.f32 1.442695, %v2183_v32  ;;  %v2184_v61 = vmin.f32 %v2180_v53, 20.0  ;;  %vm2202_vm2 = vcmp.gt.f32.partialorder %v2180_v53, 20.0 }
 0xbb7   : > { %4354 = vpow2.f32 %v2185_v60  ;;  %v2187_v19 = vmul.f32 1.442695, %v2184_v61 }
 0xbb9   : > { %4356 = vpow2.f32 %v2187_v19 }
 0xbc0   : > { %3024 = vperm.xlu1 %4215, %v724_v40  }
 0xbc1   : > { %v4355_v41 = vpop.eup %4354 }
 0xbc2   : > { %v2189_v22 = vadd.f32 1.0, %v4355_v41 }
 0xbc3   : > { %v4357_v63 = vpop.eup %4356 }
 0xbc4   : > { %v2191_v42 = vmul.f32 %v2189_v22, %v2189_v22  ;;  %v2190_v0 = vadd.f32 1.0, %v4357_v63 }
 0xbc6   : > { %v2195_v1 = vadd.f32 1.0, %v2191_v42  ;;  %v2192_v12 = vmul.f32 %v2190_v0, %v2190_v0  ;;  %v3411_v2 = vadd.f32 -1.0, %v2191_v42 }
 0xbc8   : > { %4358 = vrcp.f32 %v2195_v1  ;;  %v2196_v43 = vadd.f32 1.0, %v2192_v12  ;;  %v3412_v27 = vadd.f32 -1.0, %v2192_v12 }
 0xbc9   : > { %3029 = vperm.xlu0 %4214, %v725_v15  }
 0xbca   : > { %4360 = vrcp.f32 %v2196_v43 }
 0xbd2   : > { %v4359_v45 = vpop.eup %4358 }
 0xbd3   : > { %v2199_v5 = vmul.f32 %v4359_v45, %v3411_v2  ;;  %v2335_v31 = vpop.f32.mrb[28].mxu1 }
 0xbd4   : > { %v4361_v35 = vpop.eup %4360  ;;  %v2336_v58 = vadd.f32 %v6060_v36, %v2335_v31  ;;  %v3897_v37 = vpop.f32.mrb[29].mxu1 }
 0xbd5   : > { %v2203_v38 = vmul.f32 %v2199_v5, %v2177_v33  ;;  %v2200_v48 = vmul.f32 %v4361_v35, %v3412_v27  ;;  %v2338_v51 = vpop.f32.mrb[30].mxu1 }
 0xbd6   : > { %v2342_v46 = vmin.f32 %v2336_v58, 20.0  ;;  %v2339_v49 = vadd.f32 %v6060_v36, %v2338_v51  ;;  %v3898_v8 = vpop.f32.mrb[31].mxu1  ;;  %vm2360_vm4 = vcmp.gt.f32.partialorder %v2336_v58, 20.0 }
 0xbd7   : > { %v2205_v14 = vsel %vm2201_vm1, %v2177_v33, %v2203_v38  ;;  %v2204_v16 = vmul.f32 %v2200_v48, %v2180_v53 }
 0xbd8   : > { %v6065_v17 = vadd.f32 %v2205_v14, %v5978_v44  ;;  %v2344_v20 = vmul.f32 1.442695, %v2342_v46  ;;  %v2343_v18 = vmin.f32 %v2339_v49, 20.0  ;;  %vm2361_vm5 = vcmp.gt.f32.partialorder %v2339_v49, 20.0 }
 0xbd9   : > { %v2206_v30 = vsel %vm2202_vm2, %v2180_v53, %v2204_v16 }
 0xbda   : > { %v6068_v24 = vadd.f32 %v2206_v30, %v5981_v6  ;;  %4362 = vpow2.f32 %v2344_v20  ;;  %v2346_v26 = vmul.f32 1.442695, %v2343_v18 }
 0xbdc   : > { %4364 = vpow2.f32 %v2346_v26 }
 0xbe4   : > { %v4363_v29 = vpop.eup %4362 }
 0xbe5   : > { %v2348_v32 = vadd.f32 1.0, %v4363_v29 }
 0xbe6   : > { %v4365_v57 = vpop.eup %4364 }
 0xbe7   : > { %v2350_v60 = vmul.f32 %v2348_v32, %v2348_v32  ;;  %v2349_v61 = vadd.f32 1.0, %v4365_v57 }
 0xbe9   : > { %v2354_v33 = vadd.f32 1.0, %v2350_v60  ;;  %v2351_v19 = vmul.f32 %v2349_v61, %v2349_v61  ;;  %v3416_v40 = vadd.f32 -1.0, %v2350_v60 }
 0xbeb   : > { %4366 = vrcp.f32 %v2354_v33  ;;  %v2355_v44 = vadd.f32 1.0, %v2351_v19  ;;  %v3417_v53 = vadd.f32 -1.0, %v2351_v19 }
 0xbed   : > { %4368 = vrcp.f32 %v2355_v44 }
 0xbf5   : > { %v4367_v41 = vpop.eup %4366 }
 0xbf6   : > { %v2358_v22 = vmul.f32 %v4367_v41, %v3416_v40  ;;  %v2494_v63 = vpop.f32.mrb[32].mxu1 }
 0xbf7   : > { %v4369_v6 = vpop.eup %4368  ;;  %v2495_v42 = vadd.f32 %v2494_v63, %v5645_v55  ;;  %v3923_v0 = vpop.f32.mrb[33].mxu1 }
 0xbf8   : > { %v2362_v1 = vmul.f32 %v2358_v22, %v2336_v58  ;;  %v2359_v12 = vmul.f32 %v4369_v6, %v3417_v53  ;;  %v2497_v15 = vpop.f32.mrb[34].mxu1 }
 0xbf9   : > { %v2501_v43 = vmin.f32 %v2495_v42, 20.0  ;;  %v2498_v2 = vadd.f32 %v2497_v15, %v5647_v56  ;;  %v3924_v45 = vpop.f32.mrb[35].mxu1  ;;  %vm2519_vm6 = vcmp.gt.f32.partialorder %v2495_v42, 20.0 }
 0xbfa   : > { %v2363_v5 = vmul.f32 %v2359_v12, %v2339_v49  ;;  %v2364_v35 = vsel %vm2360_vm4, %v2336_v58, %v2362_v1 }
 0xbfb   : > { %v2503_v27 = vmul.f32 1.442695, %v2501_v43  ;;  %v2502_v31 = vmin.f32 %v2498_v2, 20.0  ;;  %vm2520_vm7 = vcmp.gt.f32.partialorder %v2498_v2, 20.0 }
 0xbfc   : > { %v2365_v37 = vsel %vm2361_vm5, %v2339_v49, %v2363_v5 }
 0xbfd   : > { %4370 = vpow2.f32 %v2503_v27  ;;  %v2505_v38 = vmul.f32 1.442695, %v2502_v31  ;;  %v2366_v48 = vpack.c.bf16 %v2365_v37, %v2364_v35 }
 0xbff   : > { %4372 = vpow2.f32 %v2505_v38  ;;  %3916 = vmatmul.mubr.bf16.vlgmr.msra.gmra.mrb[40].mxu0 %v2366_v48 }
 0xc00   : > { %3926 = vmatpush3.bf16.msra.mxu0 %v5893_v28  ;;  %3941 = vmatprep.mubr.msk.bf16.mxu0 %vm4956_vm0, %v4955_v3 }
 0xc01   : > { %3927 = vmatprep.subr.bf16.mxu0 %v4955_v3 }
 0xc04   : > { %3928 = vmatpush3.bf16.msra.mxu0 %v5899_v21 }
 0xc05   : > { %3929 = vmatprep.subr.bf16.mxu0 %v4955_v3 }
 0xc07   : > { %v4371_v51 = vpop.eup %4370 }
 0xc08   : > { %v2507_v46 = vadd.f32 1.0, %v4371_v51  ;;  %3930 = vmatpush3.bf16.msra.mxu0 %v5903_v25 }
 0xc09   : > { %v4373_v58 = vpop.eup %4372  ;;  %3931 = vmatprep.subr.bf16.mxu0 %v4955_v3 }
 0xc0a   : > { %v2509_v49 = vmul.f32 %v2507_v46, %v2507_v46  ;;  %v2508_v8 = vadd.f32 1.0, %v4373_v58 }
 0xc0c   : > { %v2513_v14 = vadd.f32 1.0, %v2509_v49  ;;  %v2510_v16 = vmul.f32 %v2508_v8, %v2508_v8  ;;  %3932 = vmatpush3.bf16.msra.mxu0 %v5907_v50  ;;  %v3421_v18 = vadd.f32 -1.0, %v2509_v49 }
 0xc0d   : > { %3933 = vmatprep.subr.bf16.mxu0 %v4955_v3 }
 0xc0e   : > { %4374 = vrcp.f32 %v2513_v14  ;;  %v2514_v20 = vadd.f32 1.0, %v2510_v16  ;;  %v3422_v29 = vadd.f32 -1.0, %v2510_v16 }
 0xc10   : > { %4376 = vrcp.f32 %v2514_v20  ;;  %3934 = vmatpush3.bf16.msra.mxu0 %v5911_v54 }
 0xc11   : > { %3935 = vmatprep.subr.bf16.mxu0 %v4955_v3 }
 0xc14   : > { %3936 = vmatpush3.bf16.msra.mxu0 %v5915_v52 }
 0xc15   : > { %3937 = vmatprep.subr.bf16.mxu0 %v4955_v3 }
 0xc18   : > { %v4375_v30 = vpop.eup %4374  ;;  %3938 = vmatpush3.bf16.msra.mxu0 %v5919_v39 }
 0xc19   : > { %v2517_v26 = vmul.f32 %v4375_v30, %v3421_v18  ;;  %3939 = vmatprep.subr.bf16.mxu0 %v4955_v3 }
 0xc1a   : > { %v4377_v32 = vpop.eup %4376 }
 0xc1b   : > { %v2521_v57 = vmul.f32 %v2517_v26, %v2495_v42  ;;  %v2518_v60 = vmul.f32 %v4377_v32, %v3422_v29 }
 0xc1c   : > { %3940 = vmatpush3.bf16.msra.mxu0 %v5924_v62 }
 0xc1d   : > { %v2522_v61 = vmul.f32 %v2518_v60, %v2498_v2  ;;  %3965 = vmatprep.subr.bf16.mxu0 %v4955_v3  ;;  %v2523_v33 = vsel %vm2519_vm6, %v2495_v42, %v2521_v57 }
 0xc1f   : > { %v2524_v19 = vsel %vm2520_vm7, %v2498_v2, %v2522_v61 }
 0xc20   : > { %v2525_v44 = vpack.c.bf16 %v2524_v19, %v2523_v33 }
 0xc22   : > { %3942 = vmatmul.mubr.bf16.vlgmr.msra.gmra.mrb[44].mxu0 %v2525_v44 }
 0xc23   : > { %3966 = vmatpush3.bf16.msra.mxu0 %v5584_v23  ;;  %3967 = vmatprep.mubr.msk.bf16.mxu0 %vm4956_vm0, %v4955_v3  ;;  %v6116_v23 = vld [vmem:[#allocation19] ss:$0 sm:$0xff] }
 0xc24   : > { %3991 = vmatprep.subr.bf16.mxu0 %v4955_v3 }
 0xc3c   : > { %v2671_v40 = vpop.xlane.xlu1 %2670 }
 0xc3d   : > { %vm2675_vm8 = vcmp.eq.f32.partialorder %v5552_v47, %v2671_v40 }
 0xc3e   : > { %v2677_v22 = vsel %vm2675_vm8, 1.0, %v4955_v3 }
 0xc40   : > { %v2674_v41 = vpop.xlane.xlu0 %2673 }
 0xc41   : > { %vm2676_vm9 = vcmp.eq.f32.partialorder %v5552_v47, %v2674_v41 }
 0xc42   : > { %v2678_v53 = vsel %vm2676_vm9, 1.0, %v4955_v3 }
 0xc43   : > { %v2679_v63 = vpack.c.bf16 %v2678_v53, %v2677_v22 }
 0xc45   : > { %3968 = vmatmul.mubr.msk.bf16.vlgmr.msra.gmra.mrb[48].mxu0 %vm1146_vm3, %v2679_v63 }
 0xc46   : > { %3992 = vmatpush3.bf16.msra.mxu0 %v6016_v7  ;;  %4007 = vmatprep.mubr.msk.bf16.mxu0 %vm4956_vm0, %v4955_v3 }
 0xc47   : > { %3993 = vmatprep.subr.bf16.mxu0 %v4955_v3 }
 0xc4a   : > { %3994 = vmatpush3.bf16.msra.mxu0 %v6022_v34 }
 0xc4b   : > { %3995 = vmatprep.subr.bf16.mxu0 %v4955_v3 }
 0xc4e   : > { %3996 = vmatpush3.bf16.msra.mxu0 %v6026_v4 }
 0xc4f   : > { %3997 = vmatprep.subr.bf16.mxu0 %v4955_v3 }
 0xc52   : > { %3998 = vmatpush3.bf16.msra.mxu0 %v6030_v9 }
 0xc53   : > { %3999 = vmatprep.subr.bf16.mxu0 %v4955_v3 }
 0xc56   : > { %4000 = vmatpush3.bf16.msra.mxu0 %v6034_v59 }
 0xc57   : > { %4001 = vmatprep.subr.bf16.mxu0 %v4955_v3 }
 0xc5a   : > { %4002 = vmatpush3.bf16.msra.mxu0 %v6038_v10 }
 0xc5b   : > { %4003 = vmatprep.subr.bf16.mxu0 %v4955_v3 }
 0xc5e   : > { %4004 = vmatpush3.bf16.msra.mxu0 %v6042_v11 }
 0xc5f   : > { %4005 = vmatprep.subr.bf16.mxu0 %v4955_v3 }
 0xc62   : > { %4006 = vmatpush3.bf16.msra.mxu0 %v6046_v13 }
 0xcd2   : > { %v2401_v47 = vpop.f32.mrb[40].mxu0 }
 0xcd3   : > { %v2402_v7 = vadd.f32 %v6116_v23, %v2401_v47  ;;  %v3917_v34 = vpop.f32.mrb[41].mxu0 }
 0xcd4   : > { %v2404_v4 = vpop.f32.mrb[42].mxu0 }
 0xcd5   : > { %v2408_v9 = vmin.f32 %v2402_v7, 20.0  ;;  %v2405_v59 = vadd.f32 %v6116_v23, %v2404_v4  ;;  %v3918_v6 = vpop.f32.mrb[43].mxu0  ;;  %vm2426_vm3 = vcmp.gt.f32.partialorder %v2402_v7, 20.0 }
 0xcd7   : > { %v2410_v10 = vmul.f32 1.442695, %v2408_v9  ;;  %v2409_v42 = vmin.f32 %v2405_v59, 20.0  ;;  %vm2427_vm10 = vcmp.gt.f32.partialorder %v2405_v59, 20.0 }
 0xcd9   : > { %4378 = vpow2.f32 %v2410_v10  ;;  %v2412_v0 = vmul.f32 1.442695, %v2409_v42 }
 0xcdb   : > { %4380 = vpow2.f32 %v2412_v0 }
 0xce3   : > { %v4379_v11 = vpop.eup %4378 }
 0xce4   : > { %v2414_v1 = vadd.f32 1.0, %v4379_v11 }
 0xce5   : > { %v4381_v12 = vpop.eup %4380 }
 0xce6   : > { %v2416_v13 = vmul.f32 %v2414_v1, %v2414_v1  ;;  %v2415_v15 = vadd.f32 1.0, %v4381_v12 }
 0xce8   : > { %v2420_v43 = vadd.f32 1.0, %v2416_v13  ;;  %v2417_v2 = vmul.f32 %v2415_v15, %v2415_v15  ;;  %v3418_v5 = vadd.f32 -1.0, %v2416_v13 }
 0xcea   : > { %4382 = vrcp.f32 %v2420_v43  ;;  %v2421_v45 = vadd.f32 1.0, %v2417_v2  ;;  %v3419_v35 = vadd.f32 -1.0, %v2417_v2 }
 0xcec   : > { %4384 = vrcp.f32 %v2421_v45 }
 0xcf4   : > { %v4383_v27 = vpop.eup %4382 }
 0xcf5   : > { %v2424_v31 = vmul.f32 %v4383_v27, %v3418_v5  ;;  %v2560_v37 = vpop.f32.mrb[44].mxu0 }
 0xcf6   : > { %v4385_v38 = vpop.eup %4384  ;;  %v2561_v48 = vadd.f32 %v6060_v36, %v2560_v37  ;;  %v3943_v51 = vpop.f32.mrb[45].mxu0 }
 0xcf7   : > { %v2428_v46 = vmul.f32 %v2424_v31, %v2402_v7  ;;  %v2425_v58 = vmul.f32 %v4385_v38, %v3419_v35  ;;  %v2563_v49 = vpop.f32.mrb[46].mxu0 }
 0xcf8   : > { %v2567_v8 = vmin.f32 %v2561_v48, 20.0  ;;  %v2564_v14 = vadd.f32 %v6060_v36, %v2563_v49  ;;  %v3944_v16 = vpop.f32.mrb[47].mxu0  ;;  %vm2585_vm11 = vcmp.gt.f32.partialorder %v2561_v48, 20.0 }
 0xcf9   : > { %v2430_v20 = vsel %vm2426_vm3, %v2402_v7, %v2428_v46  ;;  %v2429_v18 = vmul.f32 %v2425_v58, %v2405_v59  ;;  %v4254_v16 = vld [vmem:[#allocation20 + $0x20] sm:$0xff]  }
 0xcfa   : > { %v2569_v30 = vmul.f32 1.442695, %v2567_v8  ;;  %v2568_v26 = vmin.f32 %v2564_v14, 20.0  ;;  %v6123_v29 = vadd.f32 %v2430_v20, %v6065_v17  ;;  %vm2586_vm12 = vcmp.gt.f32.partialorder %v2564_v14, 20.0  ;;  %v4251_v8 = vld [vmem:[#allocation20 + $0x8] sm:$0xff]  }
 0xcfb   : > { %v2431_v32 = vsel %vm2427_vm10, %v2405_v59, %v2429_v18  ;;  %v4255_v20 = vld [vmem:[#allocation20 + $0x28] sm:$0xff]   ;;  %v4256_v18 = vld [vmem:[#allocation20 + $0x30] sm:$0xff]  }
 0xcfc   : > { %4386 = vpow2.f32 %v2569_v30  ;;  %v2571_v57 = vmul.f32 1.442695, %v2568_v26  ;;  %v6126_v60 = vadd.f32 %v2431_v32, %v6068_v24  ;;  %v4257_v30 = vld [vmem:[#allocation20 + $0x38] sm:$0xff]  }
 0xcfd   : > { %v4452_v26 = vld [vmem:[%s5496_s7] sm:$0xff]  }
 0xcfe   : > { %4388 = vpow2.f32 %v2571_v57 }
 0xd06   : > { %v4387_v61 = vpop.eup %4386 }
 0xd07   : > { %v2573_v33 = vadd.f32 1.0, %v4387_v61 }
 0xd08   : > { %v4389_v19 = vpop.eup %4388 }
 0xd09   : > { %v2575_v44 = vmul.f32 %v2573_v33, %v2573_v33  ;;  %v2574_v40 = vadd.f32 1.0, %v4389_v19 }
 0xd0b   : > { %v2579_v41 = vadd.f32 1.0, %v2575_v44  ;;  %v2576_v22 = vmul.f32 %v2574_v40, %v2574_v40  ;;  %v3423_v63 = vadd.f32 -1.0, %v2575_v44 }
 0xd0d   : > { %4390 = vrcp.f32 %v2579_v41  ;;  %v2580_v53 = vadd.f32 1.0, %v2576_v22  ;;  %v3424_v7 = vadd.f32 -1.0, %v2576_v22 }
 0xd0f   : > { %4392 = vrcp.f32 %v2580_v53 }
 0xd17   : > { %v4391_v17 = vpop.eup %4390 }
 0xd18   : > { %v2583_v47 = vmul.f32 %v4391_v17, %v3423_v63  ;;  %v2717_v34 = vpop.f32.mrb[48].mxu0 }
 0xd19   : > { %v4393_v4 = vpop.eup %4392  ;;  %v2718_v24 = vadd.f32 %v2717_v34, %v5645_v55  ;;  %v3969_v9 = vpop.f32.mrb[49].mxu0 }
 0xd1a   : > { %v2587_v59 = vmul.f32 %v2583_v47, %v2561_v48  ;;  %v2584_v6 = vmul.f32 %v4393_v4, %v3424_v7  ;;  %v2720_v10 = vpop.f32.mrb[50].mxu0 }
 0xd1b   : > { %v2724_v42 = vmin.f32 %v2718_v24, 20.0  ;;  %v2721_v0 = vadd.f32 %v2720_v10, %v5647_v56  ;;  %v3970_v11 = vpop.f32.mrb[51].mxu0  ;;  %vm2742_vm13 = vcmp.gt.f32.partialorder %v2718_v24, 20.0 }
 0xd1c   : > { %v2588_v1 = vmul.f32 %v2584_v6, %v2564_v14  ;;  %v2589_v15 = vsel %vm2585_vm11, %v2561_v48, %v2587_v59 }
 0xd1d   : > { %v2726_v12 = vmul.f32 1.442695, %v2724_v42  ;;  %v2725_v13 = vmin.f32 %v2721_v0, 20.0  ;;  %vm2743_vm14 = vcmp.gt.f32.partialorder %v2721_v0, 20.0 }
 0xd1e   : > { %v2590_v43 = vsel %vm2586_vm12, %v2564_v14, %v2588_v1  ;;  %v4252_v14 = vld [vmem:[#allocation20 + $0x10] sm:$0xff]  }
 0xd1f   : > { %4394 = vpow2.f32 %v2726_v12  ;;  %v2728_v2 = vmul.f32 1.442695, %v2725_v13  ;;  %v2591_v45 = vpack.c.bf16 %v2590_v43, %v2589_v15 }
 0xd21   : > { %4396 = vpow2.f32 %v2728_v2  ;;  %3962 = vmatmul.mubr.bf16.vlgmr.msra.gmra.mrb[36].mxu1 %v2591_v45 }
 0xd22   : > { %3972 = vmatpush3.bf16.msra.mxu1 %v5893_v28  ;;  %3987 = vmatprep.mubr.msk.bf16.mxu1 %vm4956_vm0, %v4955_v3 }
 0xd23   : > { %3973 = vmatprep.subr.bf16.mxu1 %v4955_v3 }
 0xd26   : > { %3974 = vmatpush3.bf16.msra.mxu1 %v5899_v21 }
 0xd27   : > { %3975 = vmatprep.subr.bf16.mxu1 %v4955_v3 }
 0xd29   : > { %v4395_v55 = vpop.eup %4394 }
 0xd2a   : > { %v2730_v56 = vadd.f32 1.0, %v4395_v55  ;;  %3976 = vmatpush3.bf16.msra.mxu1 %v5903_v25 }
 0xd2b   : > { %v4397_v5 = vpop.eup %4396  ;;  %3977 = vmatprep.subr.bf16.mxu1 %v4955_v3 }
 0xd2c   : > { %v2732_v27 = vmul.f32 %v2730_v56, %v2730_v56  ;;  %v2731_v31 = vadd.f32 1.0, %v4397_v5 }
 0xd2e   : > { %v2736_v35 = vadd.f32 1.0, %v2732_v27  ;;  %v2733_v28 = vmul.f32 %v2731_v31, %v2731_v31  ;;  %3978 = vmatpush3.bf16.msra.mxu1 %v5907_v50  ;;  %v3428_v21 = vadd.f32 -1.0, %v2732_v27 }
 0xd2f   : > { %3979 = vmatprep.subr.bf16.mxu1 %v4955_v3 }
 0xd30   : > { %4398 = vrcp.f32 %v2736_v35  ;;  %v2737_v37 = vadd.f32 1.0, %v2733_v28  ;;  %v3429_v48 = vadd.f32 -1.0, %v2733_v28 }
 0xd32   : > { %4400 = vrcp.f32 %v2737_v37  ;;  %3980 = vmatpush3.bf16.msra.mxu1 %v5911_v54 }
 0xd33   : > { %3981 = vmatprep.subr.bf16.mxu1 %v4955_v3 }
 0xd36   : > { %3982 = vmatpush3.bf16.msra.mxu1 %v5915_v52 }
 0xd37   : > { %3983 = vmatprep.subr.bf16.mxu1 %v4955_v3 }
 0xd3a   : > { %v4399_v25 = vpop.eup %4398  ;;  %3984 = vmatpush3.bf16.msra.mxu1 %v5919_v39  ;;  %v4250_v39 = vld [vmem:[#allocation20] sm:$0xff]  }
 0xd3b   : > { %v2740_v38 = vmul.f32 %v4399_v25, %v3428_v21  ;;  %3985 = vmatprep.subr.bf16.mxu1 %v4955_v3 }
 0xd3c   : > { %v4401_v50 = vpop.eup %4400 }
 0xd3d   : > { %v2744_v51 = vmul.f32 %v2740_v38, %v2718_v24  ;;  %v2741_v46 = vmul.f32 %v4401_v50, %v3429_v48 }
 0xd3e   : > { %3986 = vmatpush3.bf16.msra.mxu1 %v5924_v62  ;;  %v4253_v62 = vld [vmem:[#allocation20 + $0x18] sm:$0xff]  }
 0xd3f   : > { %v2745_v54 = vmul.f32 %v2741_v46, %v2721_v0  ;;  %4011 = vmatprep.subr.bf16.mxu1 %v4955_v3  ;;  %v2746_v52 = vsel %vm2742_vm13, %v2718_v24, %v2744_v51 }
 0xd41   : > { %v2747_v58 = vsel %vm2743_vm14, %v2721_v0, %v2745_v54 }
 0xd42   : > { %v2748_v49 = vpack.c.bf16 %v2747_v58, %v2746_v52 }
 0xd44   : > { %3988 = vmatmul.mubr.bf16.vlgmr.msra.gmra.mrb[40].mxu1 %v2748_v49 }
 0xd45   : > { %4027 = vmatprep.mubr.msk.bf16.mxu1 %vm4956_vm0, %v4955_v3  ;;  %4012 = vmatpush3.bf16.msra.mxu1 %v4250_v39 }
 0xd46   : > { %4013 = vmatprep.subr.bf16.mxu1 %v4955_v3 }
 0xd49   : > { %4014 = vmatpush3.bf16.msra.mxu1 %v4251_v8 }
 0xd4a   : > { %4015 = vmatprep.subr.bf16.mxu1 %v4955_v3 }
 0xd4d   : > { %4016 = vmatpush3.bf16.msra.mxu1 %v4252_v14 }
 0xd4e   : > { %4017 = vmatprep.subr.bf16.mxu1 %v4955_v3 }
 0xd51   : > { %4018 = vmatpush3.bf16.msra.mxu1 %v4253_v62 }
 0xd52   : > { %4019 = vmatprep.subr.bf16.mxu1 %v4955_v3 }
 0xd55   : > { %4020 = vmatpush3.bf16.msra.mxu1 %v4254_v16 }
 0xd56   : > { %4021 = vmatprep.subr.bf16.mxu1 %v4955_v3 }
 0xd59   : > { %4022 = vmatpush3.bf16.msra.mxu1 %v4255_v20 }
 0xd5a   : > { %4023 = vmatprep.subr.bf16.mxu1 %v4955_v3 }
 0xd5d   : > { %4024 = vmatpush3.bf16.msra.mxu1 %v4256_v18 }
 0xd5e   : > { %4025 = vmatprep.subr.bf16.mxu1 %v4955_v3 }
 0xd61   : > { %4026 = vmatpush3.bf16.msra.mxu1 %v4257_v30 }
 0xd64   : > { %4028 = vmatmul.mubr.bf16.vlgmr.msra.gmra.mrb[44].mxu1 %v4452_v26 }
 0xdf4   : > { %v2626_v32 = vpop.f32.mrb[36].mxu1 }
 0xdf5   : > { %v2627_v57 = vadd.f32 %v6116_v23, %v2626_v32  ;;  %v3963_v61 = vpop.f32.mrb[37].mxu1 }
 0xdf6   : > { %v2629_v33 = vpop.f32.mrb[38].mxu1 }
 0xdf7   : > { %v2633_v19 = vmin.f32 %v2627_v57, 20.0  ;;  %v2630_v44 = vadd.f32 %v6116_v23, %v2629_v33  ;;  %v3964_v40 = vpop.f32.mrb[39].mxu1  ;;  %vm2651_vm0 = vcmp.gt.f32.partialorder %v2627_v57, 20.0 }
 0xdf9   : > { %v2635_v41 = vmul.f32 1.442695, %v2633_v19  ;;  %v2634_v22 = vmin.f32 %v2630_v44, 20.0  ;;  %vm2652_vm15 = vcmp.gt.f32.partialorder %v2630_v44, 20.0 }
 0xdfb   : > { %4402 = vpow2.f32 %v2635_v41  ;;  %v2637_v53 = vmul.f32 1.442695, %v2634_v22 }
 0xdfd   : > { %4404 = vpow2.f32 %v2637_v53 }
 0xe05   : > { %v4403_v63 = vpop.eup %4402 }
 0xe06   : > { %v2639_v17 = vadd.f32 1.0, %v4403_v63 }
 0xe07   : > { %v4405_v3 = vpop.eup %4404 }
 0xe08   : > { %v2641_v47 = vmul.f32 %v2639_v17, %v2639_v17  ;;  %v2640_v7 = vadd.f32 1.0, %v4405_v3 }
 0xe0a   : > { %v2645_v34 = vadd.f32 1.0, %v2641_v47  ;;  %v2642_v4 = vmul.f32 %v2640_v7, %v2640_v7  ;;  %v3425_v9 = vadd.f32 -1.0, %v2641_v47 }
 0xe0c   : > { %4406 = vrcp.f32 %v2645_v34  ;;  %v2646_v24 = vadd.f32 1.0, %v2642_v4  ;;  %v3426_v10 = vadd.f32 -1.0, %v2642_v4 }
 0xe0e   : > { %4408 = vrcp.f32 %v2646_v24 }
 0xe16   : > { %v4407_v59 = vpop.eup %4406 }
 0xe17   : > { %v2649_v6 = vmul.f32 %v4407_v59, %v3425_v9  ;;  %v2783_v42 = vpop.f32.mrb[40].mxu1 }
 0xe18   : > { %v4409_v0 = vpop.eup %4408  ;;  %v2784_v11 = vadd.f32 %v6060_v36, %v2783_v42  ;;  %v3989_v1 = vpop.f32.mrb[41].mxu1 }
 0xe19   : > { %v2653_v12 = vmul.f32 %v2649_v6, %v2627_v57  ;;  %v2650_v13 = vmul.f32 %v4409_v0, %v3426_v10  ;;  %v2786_v15 = vpop.f32.mrb[42].mxu1 }
 0xe1a   : > { %v2790_v43 = vmin.f32 %v2784_v11, 20.0  ;;  %v2787_v2 = vadd.f32 %v6060_v36, %v2786_v15  ;;  %v3990_v45 = vpop.f32.mrb[43].mxu1  ;;  %vm2808_vm1 = vcmp.gt.f32.partialorder %v2784_v11, 20.0 }
 0xe1b   : > { %v2654_v55 = vmul.f32 %v2650_v13, %v2630_v44  ;;  %v2655_v56 = vsel %vm2651_vm0, %v2627_v57, %v2653_v12 }
 0xe1c   : > { %v2792_v5 = vmul.f32 1.442695, %v2790_v43  ;;  %v2791_v27 = vmin.f32 %v2787_v2, 20.0  ;;  %v6163_v31 = vadd.f32 %v2655_v56, %v6123_v29  ;;  %vm2809_vm2 = vcmp.gt.f32.partialorder %v2787_v2, 20.0 }
 0xe1d   : > { %v2656_v35 = vsel %vm2652_vm15, %v2630_v44, %v2654_v55 }
 0xe1e   : > { %4410 = vpow2.f32 %v2792_v5  ;;  %v2794_v28 = vmul.f32 1.442695, %v2791_v27  ;;  %v6166_v37 = vadd.f32 %v2656_v35, %v6126_v60 }
 0xe20   : > { %4412 = vpow2.f32 %v2794_v28 }
 0xe28   : > { %v4411_v21 = vpop.eup %4410 }
 0xe29   : > { %v2796_v25 = vadd.f32 1.0, %v4411_v21 }
 0xe2a   : > { %v4413_v38 = vpop.eup %4412 }
 0xe2b   : > { %v2798_v36 = vmul.f32 %v2796_v25, %v2796_v25  ;;  %v2797_v48 = vadd.f32 1.0, %v4413_v38 }
 0xe2d   : > { %v2802_v50 = vadd.f32 1.0, %v2798_v36  ;;  %v2799_v51 = vmul.f32 %v2797_v48, %v2797_v48  ;;  %v3430_v54 = vadd.f32 -1.0, %v2798_v36 }
 0xe2f   : > { %4414 = vrcp.f32 %v2802_v50  ;;  %v2803_v46 = vadd.f32 1.0, %v2799_v51  ;;  %v3431_v58 = vadd.f32 -1.0, %v2799_v51 }
 0xe31   : > { %4416 = vrcp.f32 %v2803_v46 }
 0xe37   : > { %v2989_v20 = vpop.f32.mrb[44].mxu1 }
 0xe38   : > { %v4029_v18 = vpop.f32.mrb[45].mxu1 }
 0xe39   : > { %v4415_v29 = vpop.eup %4414  ;;  %v2992_v30 = vpop.f32.mrb[46].mxu1 }
 0xe3a   : > { %v2806_v52 = vmul.f32 %v4415_v29, %v3430_v54  ;;  %v4030_v26 = vpop.f32.mrb[47].mxu1 }
 0xe3b   : > { %v4417_v49 = vpop.eup %4416 }
 0xe3c   : > { %v2810_v39 = vmul.f32 %v2806_v52, %v2784_v11  ;;  %v2807_v8 = vmul.f32 %v4417_v49, %v3431_v58 }
 0xe3e   : > { %v2811_v60 = vmul.f32 %v2807_v8, %v2787_v2  ;;  %v2812_v14 = vsel %vm2808_vm1, %v2784_v11, %v2810_v39  ;;  %v3434_v11 = vld [vmem:[#allocation22] ss:$0 sm:$0xff] }
 0xe3f   : > { %v2990_v15 = vadd.f32 %v3434_v11, %v2989_v20  ;;  %v2993_v5 = vadd.f32 %v3434_v11, %v2992_v30 }
 0xe40   : > { %v2813_v62 = vsel %vm2809_vm2, %v2787_v2, %v2811_v60 }
 0xe41   : > { %v2814_v16 = vpack.c.bf16 %v2813_v62, %v2812_v14  ;;  %v3025_v62 = vpop.permute.xlu1 %3024 }
 0xe43   : > { %4008 = vmatmul.mubr.bf16.vlgmr.msra.gmra.mrb[52].mxu0 %v2814_v16  ;;  %v3030_v16 = vpop.permute.xlu0 %3029 }
 0xf16   : > { %v2849_v32 = vpop.f32.mrb[52].mxu0 }
 0xf17   : > { %v2850_v57 = vadd.f32 %v6116_v23, %v2849_v32  ;;  %v4009_v61 = vpop.f32.mrb[53].mxu0 }
 0xf18   : > { %v2852_v33 = vpop.f32.mrb[54].mxu0 }
 0xf19   : > { %v2856_v19 = vmin.f32 %v2850_v57, 20.0  ;;  %v2853_v44 = vadd.f32 %v6116_v23, %v2852_v33  ;;  %v4010_v40 = vpop.f32.mrb[55].mxu0  ;;  %vm2874_vm4 = vcmp.gt.f32.partialorder %v2850_v57, 20.0 }
 0xf1b   : > { %v2858_v41 = vmul.f32 1.442695, %v2856_v19  ;;  %v2857_v22 = vmin.f32 %v2853_v44, 20.0  ;;  %vm2875_vm5 = vcmp.gt.f32.partialorder %v2853_v44, 20.0 }
 0xf1d   : > { %4418 = vpow2.f32 %v2858_v41  ;;  %v2860_v53 = vmul.f32 1.442695, %v2857_v22 }
 0xf1f   : > { %4420 = vpow2.f32 %v2860_v53 }
 0xf27   : > { %v4419_v63 = vpop.eup %4418 }
 0xf28   : > { %v2862_v17 = vadd.f32 1.0, %v4419_v63 }
 0xf29   : > { %v4421_v3 = vpop.eup %4420 }
 0xf2a   : > { %v2864_v47 = vmul.f32 %v2862_v17, %v2862_v17  ;;  %v2863_v7 = vadd.f32 1.0, %v4421_v3 }
 0xf2c   : > { %v2868_v34 = vadd.f32 1.0, %v2864_v47  ;;  %v2865_v4 = vmul.f32 %v2863_v7, %v2863_v7  ;;  %v3432_v9 = vadd.f32 -1.0, %v2864_v47 }
 0xf2e   : > { %4422 = vrcp.f32 %v2868_v34  ;;  %v2869_v24 = vadd.f32 1.0, %v2865_v4  ;;  %v3433_v23 = vadd.f32 -1.0, %v2865_v4 }
 0xf30   : > { %4424 = vrcp.f32 %v2869_v24 }
 0xf38   : > { %v4423_v59 = vpop.eup %4422 }
 0xf39   : > { %v2872_v6 = vmul.f32 %v4423_v59, %v3432_v9 }
 0xf3a   : > { %v4425_v10 = vpop.eup %4424 }
 0xf3b   : > { %v2876_v42 = vmul.f32 %v2872_v6, %v2850_v57  ;;  %v2873_v0 = vmul.f32 %v4425_v10, %v3433_v23 }
 0xf3d   : > { %v2877_v1 = vmul.f32 %v2873_v0, %v2853_v44  ;;  %v2878_v12 = vsel %vm2874_vm4, %v2850_v57, %v2876_v42 }
 0xf3e   : > { %v2880_v13 = vadd.f32 %v2878_v12, %v6163_v31 }
 0xf3f   : > { %v2879_v43 = vsel %vm2875_vm5, %v2853_v44, %v2877_v1 }
 0xf40   : > { %v2882_v2 = vmul.f32 0.14285715, %v2880_v13  ;;  %v2881_v45 = vadd.f32 %v2879_v43, %v6166_v37 }
 0xf42   : > { %v2996_v55 = vadd.f32 %v2990_v15, %v2882_v2  ;;  %v2883_v56 = vmul.f32 0.14285715, %v2881_v45 }
 0xf44   : > { %v2998_v27 = vmin.f32 %v2996_v55, 20.0  ;;  %v2997_v35 = vadd.f32 %v2993_v5, %v2883_v56  ;;  %vm3016_vm6 = vcmp.gt.f32.partialorder %v2996_v55, 20.0 }
 0xf46   : > { %v3000_v28 = vmul.f32 1.442695, %v2998_v27  ;;  %v2999_v21 = vmin.f32 %v2997_v35, 20.0  ;;  %vm3017_vm7 = vcmp.gt.f32.partialorder %v2997_v35, 20.0 }
 0xf48   : > { %4426 = vpow2.f32 %v3000_v28  ;;  %v3002_v25 = vmul.f32 1.442695, %v2999_v21 }
 0xf4a   : > { %4428 = vpow2.f32 %v3002_v25 }
 0xf52   : > { %v4427_v38 = vpop.eup %4426 }
 0xf53   : > { %v3004_v36 = vadd.f32 1.0, %v4427_v38 }
 0xf54   : > { %v4429_v48 = vpop.eup %4428 }
 0xf55   : > { %v3006_v31 = vmul.f32 %v3004_v36, %v3004_v36  ;;  %v3005_v50 = vadd.f32 1.0, %v4429_v48 }
 0xf57   : > { %v3010_v51 = vadd.f32 1.0, %v3006_v31  ;;  %v3007_v46 = vmul.f32 %v3005_v50, %v3005_v50  ;;  %v3443_v54 = vadd.f32 -1.0, %v3006_v31 }
 0xf59   : > { %4430 = vrcp.f32 %v3010_v51  ;;  %v3011_v37 = vadd.f32 1.0, %v3007_v46  ;;  %v3444_v58 = vadd.f32 -1.0, %v3007_v46 }
 0xf5b   : > { %4432 = vrcp.f32 %v3011_v37 }
 0xf63   : > { %v4431_v29 = vpop.eup %4430 }
 0xf64   : > { %v3014_v52 = vmul.f32 %v4431_v29, %v3443_v54 }
 0xf65   : > { %v4433_v49 = vpop.eup %4432 }
 0xf66   : > { %v3018_v39 = vmul.f32 %v3014_v52, %v2996_v55  ;;  %v3015_v8 = vmul.f32 %v4433_v49, %v3444_v58 }
 0xf68   : > { %v3020_v60 = vsel %vm3016_vm6, %v2996_v55, %v3018_v39  ;;  %v3019_v14 = vmul.f32 %v3015_v8, %v2997_v35 }
 0xf69   : > { %v3032_v18 = vmul.f32 %v3025_v62, %v3020_v60 }
 0xf6a   : > { %v3021_v20 = vsel %vm3017_vm7, %v2997_v35, %v3019_v14 }
 0xf6b   : > { %v3033_v30 = vmul.f32 %v3030_v16, %v3021_v20 }
 0xf6d   : > { %v3462_v26 = vpack.c.bf16 %v3033_v30, %v3032_v18 }
 0xf6f   : > { %3463 = vst [vmem:[%s715_s1] sm:$0xff] %v3462_v26  }
 0xf70   : > { %4838 = shalt.err (!%p4835_p5)
}
 0xf71   : > { %s4839_s8 = scalar_lea.hbm %s6178_s11, 128  ;;  %s4843_s7 = scalar_lea.hbm %s6328_s9, 256 }
 0xf72   : > { %p4840_p1 = scmp.ne.s32.totalorder %s6178_s11, %s4839_s8  ;;  %p4844_p10 = scmp.lt.u32.totalorder %s6178_s11, %s6328_s9 }
 0xf73   : > { %p4845_p0 = scmp.lt.u32.totalorder %s4843_s7, %s4839_s8  ;;  %p4847_p4 = scmp.lt.u32.totalorder %s4839_s8, %s6178_s11 }
 0xf74   : > { %p4841_p11 = pnand %p4840_p1, %p6329_p7 }
 0xf75   : > { %p4846_p3 = por %p4845_p0, %p4844_p10 }
 0xf76   : > { %p4842_p9 = pneg %p4841_p11 }
 0xf77   : > { %p4848_p6 = por %p4847_p4, %p4846_p3 }
 0xf79   : > { %p4849_p13 = pnand %p4848_p6, %p4842_p9 }
 0xf7b   : > { %4852 = shalt.err (!%p4849_p13)
}
 0xf7c   : > { %s4960_s15 = smov 64   ;;  %s4961_s14 = smov 4  }
 0xf7d   : > { %4079 = dma.vmem_to_hbm [thread:$0]  (%p6329_p7), %s6180_s24, 128, %s6178_s11, %s3045_s23, %s4960_s15, %s4960_s15, %s4961_s14  }
 0xf7e PF: > { %s6330_s12 = sld [smem:[#allocation38_spill]]  ;;  %s3075_s1 = sand.u32 1, %s4915_s25  }
 0xf7f   : > { %p6332_p8 = scmp.ge.s32.totalorder %s4935_s30, 2  ;;  %s3076_s18 = scalar_lea.sflag [#allocation4], %s3075_s1 }
 0xf84   : > { %p6331_p2 = scmp.ne.s32.totalorder %s6330_s12, 0 }
 0xf86   : > { %p4123_p12 = pnand %p6332_p8, %p6331_p2 }
 0xf88   : > { %4910 = dma.done.wait (!%p4123_p12), %s3076_s18, 128  }
 0xf89   : > { %4912 = vsyncadd (!%p4123_p12), %s3076_s18, 4294967168  ;;  %s39_s30 = sadd.s32 1, %s4935_s30   ;;  %s6333_s5 = sld [smem:[#allocation33_spill]] }
 0xf8a   : > { %p36_p5 = scmp.ge.s32.totalorder %s39_s30, 4   ;;  %s6334_s27 = sld [smem:[#allocation37_spill]] }
 0xf8b   : > { %s6335_s16 = sld [smem:[#allocation36_spill]]  ;;  %s6336_s25 = smov %s4919_s26 }
 0xf8c   : > { %s6338_s28 = smov %s4931_s29  ;;  %38 = sbr.rel (!%p36_p5) target bundleno = 28 (0x1c), region = 193 }
 0xf8f   : > { %s6337_s26 = smov %s6333_s5 }
 0xf91   : > { %s6339_s29 = smov %s6335_s16 }
 0xf93   :  { %3081 = vsyncpa [#allocation3], 1 }
 0xf94   :  { %3083 = vsyncpa [#allocation3 + $0x1], 1 }
 0xf95   :  { %3084 = vsyncpa [#allocation6], 1 }
 0xf96   :  { %3086 = vsyncpa [#allocation6 + $0x1], 1 }
 0xf97   :  { %3087 = vsyncpa [#allocation9], 1 }
 0xf98   :  { %3089 = vsyncpa [#allocation9 + $0x1], 1 }
 0xf99   :  { %3090 = vsyncpa [#allocation12], 1 }
 0xf9a   :  { %3091 = vsyncpa [#allocation15], 1 }
 0xf9b   :  { %3092 = vsyncpa [#allocation18], 1 }
 0xf9c   :  { %3093 = vsyncpa [#allocation21], 1 }
 0xf9d   :  { %3094 = vsyncpa [#allocation4], 1 }
 0xf9e   :  { %3096 = vsyncpa [#allocation4 + $0x1], 1 }

</bundles_post_ra>
